<compile_context>
chip_gen: v5e
topology: v5e:2x2
jax: 0.10.0
libtpu: 0.0.40
codegen_flags: <defaults>
</compile_context>

<pallas_src>
import functools

import jax
import jax.numpy as jnp
from jax.experimental import pallas as pl
from jax.experimental.pallas import tpu as pltpu


def _prelu(v, a):
    # nn.PReLU with a single shared parameter a (broadcasts).
    return jnp.maximum(v, 0.0) + a * jnp.minimum(v, 0.0)


# ---------------------------------------------------------------------------
# Fused kernel: one (image, row-tile) per grid step.
#   x_ref    : (H, W, Cin)      bf16  full image, resident across row tiles
#   w1_ref   : (Cin, P)         bf16  conv1 weight, bn1 scale folded in
#   b1_ref   : (1, P)           f32   bn1 shift
#   w2_ref   : (9P, P)          bf16  conv2 taps stacked on K, bn2 scale folded
#   b2_ref   : (1, P)           f32   bn2 shift
#   w3_ref   : (P, Cout)        bf16  conv3 weight, bn3 scale folded in
#   b3_ref   : (1, Cout)        f32   bn3 shift
#   alpha_ref: (1, 1)           f32   shared PReLU parameter (SMEM)
#   o_ref    : (TH, W, Cout)    bf16  output row tile
#   h1_ref   : (lead + (TH+2)*Wp + 8, P) bf16 VMEM scratch (zero-margined h1)
#
# Scratch layout: local row j (j = 0..TH+1, global row t*TH - 1 + j) lives at
# scratch rows [lead + j*Wp, lead + j*Wp + W); columns W..Wp-1 stay zero and
# implement conv2's zero padding at the W edges; unwritten halo rows (image
# top/bottom) implement the H-edge padding.
# ---------------------------------------------------------------------------
def _bottleneck_kernel(x_ref, w1_ref, b1_ref, w2_ref, b2_ref, w3_ref, b3_ref,
                       alpha_ref, o_ref, h1_ref, *, Wp, lead):
    TH, W, Cout = o_ref.shape
    P = w1_ref.shape[1]
    t = pl.program_id(1)
    num_t = pl.num_programs(1)
    a = alpha_ref[0, 0]                      # scalar read from SMEM, hoisted
    rstart = t * TH                          # first output row of this tile

    # Zero the scratch every step: margins + pad columns are the conv2 zero
    # padding.  Steps are fully independent => "parallel" row axis is safe.
    h1_ref[...] = jnp.zeros_like(h1_ref)

    # ---- Stage 1: 1x1 conv + bn1 + PReLU, per row, into the Wp-strided
    # scratch (halo rows recomputed from the resident x block). -------------
    def conv1_row(g, j):                     # global row g -> local row j
        xr = x_ref[g]                                        # (W, Cin) bf16
        h = jnp.dot(xr, w1_ref[...], preferred_element_type=jnp.float32)
        h = _prelu(h + b1_ref[...], a)
        h1_ref[pl.ds(lead + j * Wp, W), :] = h.astype(jnp.bfloat16)

    @pl.when(t > 0)
    def _():                                 # top halo row (if inside image)
        conv1_row(rstart - 1, 0)

    for i in range(TH):                      # core rows of this tile
        conv1_row(rstart + i, i + 1)

    @pl.when(t < num_t - 1)
    def _():                                 # bottom halo row
        conv1_row(rstart + TH, TH + 1)

    # ---- Stage 2: 3x3 conv as 9 accumulating MXU dots on shifted views of
    # the zero-margined h1 scratch (no (M, 9P) taps materialization).
    # Note: for P >= 128 the 9-dot form already saturates MXU depth; for
    # P < 128 a K=9P concat would use the MXU better but costs the temp. ----
    m_out = TH * Wp
    acc = None
    for kh in range(3):
        for kw in range(3):
            # Static start; kh*Wp component is sublane-aligned (Wp % 8 == 0),
            # only the +/-1 kw shift is off-by-one.
            tap = h1_ref[pl.ds(lead + kh * Wp + (kw - 1), m_out), :]
            wk = w2_ref[pl.ds((kh * 3 + kw) * P, P), :]
            d = jnp.dot(tap, wk, preferred_element_type=jnp.float32)
            acc = d if acc is None else acc + d
    h2 = _prelu(acc + b2_ref[...], a).astype(jnp.bfloat16)

    # ---- Stage 3: 1x1 conv + bn3 + residual + PReLU; store row by row,
    # dropping the Wp-W pad columns; residual re-read from x_ref per row. ---
    h3 = jnp.dot(h2, w3_ref[...], preferred_element_type=jnp.float32)
    h3 = h3 + b3_ref[...]
    for i in range(TH):
        res = x_ref[rstart + i].astype(jnp.float32)          # (W, Cin==Cout)
        row = h3[i * Wp:i * Wp + W, :]                       # real columns
        o_ref[i] = _prelu(row + res, a).astype(o_ref.dtype)


# ---------------------------------------------------------------------------
# Wrapper
# ---------------------------------------------------------------------------
def _fold_bn(gamma, beta, mean, var, eps=1e-5):
    scale = gamma / jnp.sqrt(var + eps)
    shift = beta - mean * scale
    return scale.astype(jnp.float32), shift.astype(jnp.float32)


def bottleneck_forward(x_nchw, params, *, stride=1, row_tile=8,
                       vmem_limit_mb=48):
    """Bottleneck forward (downsample=None).  x_nchw: (N, Cin, H, W).

    vmem_limit_mb: keep <= ~48 on v7x (64 MiB physical VMEM); can be raised
    toward ~96 on v5e/v6e (128 MiB physical) together with a larger row_tile.
    """
    assert stride == 1, "downsample=None => residual requires stride==1"
    N, Cin, H, W = x_nchw.shape

    w1 = params["conv1_w"]          # (P, Cin, 1, 1)
    w2 = params["conv2_w"]          # (P, P, 3, 3)
    w3 = params["conv3_w"]          # (4P, P, 1, 1)
    P = w1.shape[0]
    Cout = w3.shape[0]
    assert Cout == Cin, "identity residual requires inplanes == planes * 4"

    s1, b1 = _fold_bn(*params["bn1"])
    s2, b2 = _fold_bn(*params["bn2"])
    s3, b3 = _fold_bn(*params["bn3"])

    # Fold BN scales into weights; bf16 matmul operands, f32 accumulation.
    w1m = (w1[:, :, 0, 0].T * s1[None, :]).astype(jnp.bfloat16)       # (Cin,P)
    w2m = (jnp.transpose(w2, (2, 3, 1, 0)).reshape(9 * P, P)
           * s2[None, :]).astype(jnp.bfloat16)                        # (9P,P)
    w3m = (w3[:, :, 0, 0].T * s3[None, :]).astype(jnp.bfloat16)       # (P,Cout)
    b1v = b1.reshape(1, P)
    b2v = b2.reshape(1, P)
    b3v = b3.reshape(1, Cout)
    alpha = params["prelu_a"].reshape(1, 1).astype(jnp.float32)

    # Row tiling: largest divisor of H that is <= row_tile.
    TH = max(1, min(row_tile, H))
    while H % TH:
        TH -= 1
    T = H // TH

    # Flattened-row stride: >= W+1 (one zero pad column) rounded to a multiple
    # of 8 so the kh row-shifts of the 3x3 taps stay sublane-aligned.
    Wp = ((W + 1 + 7) // 8) * 8
    lead = 16                                 # leading zero margin (aligned)
    scratch_rows = lead + (TH + 2) * Wp + 8   # +8: slack for the last tap read

    # NCHW f32 -> NHWC bf16 (single fused transpose+cast pass; see TODO about
    # keeping the whole model NHWC to remove it entirely).
    x_nhwc = jnp.transpose(x_nchw, (0, 2, 3, 1)).astype(jnp.bfloat16)

    kernel = functools.partial(_bottleneck_kernel, Wp=Wp, lead=lead)

    def const(shape):  # resident operand: constant block index across grid
        return pl.BlockSpec(shape, lambda n, t, _s=len(shape): (0,) * _s)

    out_nhwc = pl.pallas_call(
        kernel,
        grid=(N, T),
        in_specs=[
            # Full image block; block index constant across row tiles, so it
            # is DMA'd once per image and stays resident.
            pl.BlockSpec((None, H, W, Cin), lambda n, t: (n, 0, 0, 0)),
            const((Cin, P)), const((1, P)),                         # w1, b1
            const((9 * P, P)), const((1, P)),                       # w2, b2
            const((P, Cout)), const((1, Cout)),                     # w3, b3
            pl.BlockSpec(memory_space=pltpu.MemorySpace.SMEM),      # alpha
        ],
        out_specs=pl.BlockSpec((None, TH, W, Cout), lambda n, t: (n, t, 0, 0)),
        out_shape=jax.ShapeDtypeStruct((N, H, W, Cout), jnp.bfloat16),
        scratch_shapes=[pltpu.VMEM((scratch_rows, P), jnp.bfloat16)],
        compiler_params=pltpu.CompilerParams(
            dimension_semantics=("parallel", "parallel"),
            vmem_limit_bytes=vmem_limit_mb * 1024 * 1024),
    )(x_nhwc, w1m, b1v, w2m, b2v, w3m, b3v, alpha)

    # NHWC bf16 -> NCHW (cast back to the caller dtype during the transpose).
    return jnp.transpose(out_nhwc, (0, 3, 1, 2)).astype(x_nchw.dtype)


# ---------------------------------------------------------------------------
# Pure-JAX reference (mirrors the PyTorch module, eval-mode BN)
# ---------------------------------------------------------------------------
def bottleneck_reference(x, params):
    hi = jax.lax.Precision.HIGHEST

    def conv(x, w, padding=0):
        return jax.lax.conv_general_dilated(
            x, w, (1, 1), [(padding, padding)] * 2,
            dimension_numbers=("NCHW", "OIHW", "NCHW"), precision=hi)

    def bn(x, g, b, m, v, eps=1e-5):
        sc = (g / jnp.sqrt(v + eps)).reshape(1, -1, 1, 1)
        sh = (b - m * g / jnp.sqrt(v + eps)).reshape(1, -1, 1, 1)
        return x * sc + sh

    a = params["prelu_a"]
    act = lambda t: jnp.maximum(t, 0.0) + a * jnp.minimum(t, 0.0)

    out = act(bn(conv(x, params["conv1_w"]), *params["bn1"]))
    out = act(bn(conv(out, params["conv2_w"], padding=1), *params["bn2"]))
    out = bn(conv(out, params["conv3_w"]), *params["bn3"])
    out = out + x            # downsample is None
    return act(out)


# ---------------------------------------------------------------------------
def make_params(key, inplanes, planes):
    ks = jax.random.split(key, 7)
    f32 = jnp.float32

    def bn_params(k, c):
        k1, k2, k3, k4 = jax.random.split(k, 4)
        gamma = 1.0 + 0.1 * jax.random.normal(k1, (c,), f32)
        beta = 0.1 * jax.random.normal(k2, (c,), f32)
        mean = 0.1 * jax.random.normal(k3, (c,), f32)
        var = 0.5 + 0.5 * jnp.abs(jax.random.normal(k4, (c,), f32))
        return (gamma, beta, mean, var)

    return {
        "conv1_w": 0.1 * jax.random.normal(ks[0], (planes, inplanes, 1, 1), f32),
        "conv2_w": 0.1 * jax.random.normal(ks[1], (planes, planes, 3, 3), f32),
        "conv3_w": 0.1 * jax.random.normal(ks[2], (planes * 4, planes, 1, 1), f32),
        "bn1": bn_params(ks[3], planes),
        "bn2": bn_params(ks[4], planes),
        "bn3": bn_params(ks[5], planes * 4),
        "prelu_a": jnp.array(0.25, f32),   # nn.PReLU default single param
    }


if __name__ == "__main__":
    # Small shapes consistent with the module: inplanes = planes * expansion.
    # H=16 with row_tile=8 exercises the row tiling + halo logic (T=2).
    N, inplanes, planes, H, W = 2, 16, 4, 16, 16

    key = jax.random.PRNGKey(0)
    kx, kp = jax.random.split(key)
    x = jax.random.normal(kx, (N, inplanes, H, W), jnp.float32)
    params = make_params(kp, inplanes, planes)

    fwd = jax.jit(bottleneck_forward)
    out = jax.block_until_ready(fwd(x, params))
    ref = jax.block_until_ready(bottleneck_reference(x, params))

    assert out.shape == (N, planes * 4, H, W)
    max_err = float(jnp.max(jnp.abs(out - ref)))
    # bf16 activation I/O + bf16 MXU matmuls (f32 accumulation) vs f32 ref.
    assert jnp.allclose(out, ref, rtol=3e-2, atol=3e-2), max_err

    print("KERNEL_OK")
</pallas_src>

<mosaic_0001>
module attributes {stable_mosaic.version = 11 : i64} {
  func.func @_bottleneck_kernel(%arg0: i32, %arg1: i32, %arg2: memref<1x16x16x16xbf16, #tpu.memory_space<vmem>>, %arg3: memref<16x4xbf16, #tpu.memory_space<vmem>>, %arg4: memref<1x4xf32, #tpu.memory_space<vmem>>, %arg5: memref<36x4xbf16, #tpu.memory_space<vmem>>, %arg6: memref<1x4xf32, #tpu.memory_space<vmem>>, %arg7: memref<4x16xbf16, #tpu.memory_space<vmem>>, %arg8: memref<1x16xf32, #tpu.memory_space<vmem>>, %arg9: memref<1x1xf32, #tpu.memory_space<smem>>, %arg10: memref<1x8x16x16xbf16, #tpu.memory_space<vmem>>, %arg11: memref<264x4xbf16, #tpu.memory_space<vmem>>) attributes {dimension_semantics = [#tpu.dimension_semantics<parallel>, #tpu.dimension_semantics<parallel>], iteration_bounds = array<i64: 2, 2>, scalar_prefetch = 0 : i64, scratch_operands = 1 : i64, tpu.core_type = #tpu.core_type<tc>, window_params = [{transform_indices = @transform_0, window_bounds = array<i64: 1, 16, 16, 16>}, {pipeline_mode = #tpu.pipeline_mode<synchronous>, transform_indices = @transform_1, window_bounds = array<i64: 16, 4>}, {pipeline_mode = #tpu.pipeline_mode<synchronous>, transform_indices = @transform_2, window_bounds = array<i64: 1, 4>}, {pipeline_mode = #tpu.pipeline_mode<synchronous>, transform_indices = @transform_3, window_bounds = array<i64: 36, 4>}, {pipeline_mode = #tpu.pipeline_mode<synchronous>, transform_indices = @transform_4, window_bounds = array<i64: 1, 4>}, {pipeline_mode = #tpu.pipeline_mode<synchronous>, transform_indices = @transform_5, window_bounds = array<i64: 4, 16>}, {pipeline_mode = #tpu.pipeline_mode<synchronous>, transform_indices = @transform_6, window_bounds = array<i64: 1, 16>}, {transform_indices = @transform_7, window_bounds = array<i64: 1, 1>}, {transform_indices = @transform_8, window_bounds = array<i64: 1, 8, 16, 16>}]} {
    %c0 = arith.constant 0 : index
    %c0_0 = arith.constant 0 : index
    %0 = memref.load %arg9[%c0, %c0_0] : memref<1x1xf32, #tpu.memory_space<smem>>
    %c8_i32 = arith.constant 8 : i32
    %1 = arith.muli %arg1, %c8_i32 : i32
    %cst = arith.constant 0.000000e+00 : bf16
    %2 = vector.broadcast %cst : bf16 to vector<264x4xbf16>
    %c0_1 = arith.constant 0 : index
    %c0_2 = arith.constant 0 : index
    %3 = vector.load %arg11[%c0_1, %c0_2] : memref<264x4xbf16, #tpu.memory_space<vmem>>, vector<264x4xbf16>
    tpu.vector_store %arg11[%c0_1, %c0_2], %2 {strides = array<i32>} : memref<264x4xbf16, #tpu.memory_space<vmem>>, vector<264x4xbf16>,
    %c0_i32 = arith.constant 0 : i32
    %4 = arith.cmpi sgt, %arg1, %c0_i32 : i32
    %5 = arith.extui %4 : i1 to i32
    %c0_i32_3 = arith.constant 0 : i32
    %6 = arith.cmpi ne, %5, %c0_i32_3 : i32
    scf.if %6 {
      %c1_i32_209 = arith.constant 1 : i32
      %349 = arith.subi %1, %c1_i32_209 : i32
      %c0_210 = arith.constant 0 : index
      %350 = arith.index_cast %349 : i32 to index
      %c0_211 = arith.constant 0 : index
      %c0_212 = arith.constant 0 : index
      %351 = vector.load %arg2[%c0_210, %350, %c0_211, %c0_212] : memref<1x16x16x16xbf16, #tpu.memory_space<vmem>>, vector<1x1x16x16xbf16>
      %352 = vector.shape_cast %351 : vector<1x1x16x16xbf16> to vector<16x16xbf16>
      %c0_213 = arith.constant 0 : index
      %c0_214 = arith.constant 0 : index
      %353 = vector.load %arg3[%c0_213, %c0_214] : memref<16x4xbf16, #tpu.memory_space<vmem>>, vector<16x4xbf16>
      %cst_215 = arith.constant dense<0.000000e+00> : vector<16x4xf32>
      %354 = tpu.matmul %352, %353, %cst_215 {dimension_numbers = #tpu.dot_dimension_numbers<[1], [0], [0], [1], [0, 0, 1, 1], [], []>} : vector<16x16xbf16>, vector<16x4xbf16>, vector<16x4xf32> -> vector<16x4xf32>
      %c0_216 = arith.constant 0 : index
      %c0_217 = arith.constant 0 : index
      %355 = vector.load %arg4[%c0_216, %c0_217] : memref<1x4xf32, #tpu.memory_space<vmem>>, vector<1x4xf32>
      %356 = vector.broadcast %355 : vector<1x4xf32> to vector<16x4xf32>
      %357 = arith.addf %354, %356 : vector<16x4xf32>
      %cst_218 = arith.constant 0.000000e+00 : f32
      %358 = vector.broadcast %cst_218 : f32 to vector<16x4xf32>
      %359 = arith.maximumf %357, %358 : vector<16x4xf32>
      %cst_219 = arith.constant 0.000000e+00 : f32
      %360 = vector.broadcast %cst_219 : f32 to vector<16x4xf32>
      %361 = arith.minimumf %357, %360 : vector<16x4xf32>
      %362 = vector.broadcast %0 : f32 to vector<16x4xf32>
      %363 = arith.mulf %362, %361 : vector<16x4xf32>
      %364 = arith.addf %359, %363 : vector<16x4xf32>
      %365 = arith.truncf %364 : vector<16x4xf32> to vector<16x4xbf16>
      %c16_220 = arith.constant 16 : index
      %c0_221 = arith.constant 0 : index
      %366 = vector.load %arg11[%c16_220, %c0_221] : memref<264x4xbf16, #tpu.memory_space<vmem>>, vector<16x4xbf16>
      tpu.vector_store %arg11[%c16_220, %c0_221], %365 {strides = array<i32>} : memref<264x4xbf16, #tpu.memory_space<vmem>>, vector<16x4xbf16>,
    } else {
    }
    %c0_i32_4 = arith.constant 0 : i32
    %7 = arith.addi %1, %c0_i32_4 : i32
    %c0_5 = arith.constant 0 : index
    %8 = arith.index_cast %7 : i32 to index
    %c0_6 = arith.constant 0 : index
    %c0_7 = arith.constant 0 : index
    %9 = vector.load %arg2[%c0_5, %8, %c0_6, %c0_7] : memref<1x16x16x16xbf16, #tpu.memory_space<vmem>>, vector<1x1x16x16xbf16>
    %10 = vector.shape_cast %9 : vector<1x1x16x16xbf16> to vector<16x16xbf16>
    %c0_8 = arith.constant 0 : index
    %c0_9 = arith.constant 0 : index
    %11 = vector.load %arg3[%c0_8, %c0_9] : memref<16x4xbf16, #tpu.memory_space<vmem>>, vector<16x4xbf16>
    %cst_10 = arith.constant dense<0.000000e+00> : vector<16x4xf32>
    %12 = tpu.matmul %10, %11, %cst_10 {dimension_numbers = #tpu.dot_dimension_numbers<[1], [0], [0], [1], [0, 0, 1, 1], [], []>} : vector<16x16xbf16>, vector<16x4xbf16>, vector<16x4xf32> -> vector<16x4xf32>
    %c0_11 = arith.constant 0 : index
    %c0_12 = arith.constant 0 : index
    %13 = vector.load %arg4[%c0_11, %c0_12] : memref<1x4xf32, #tpu.memory_space<vmem>>, vector<1x4xf32>
    %14 = vector.broadcast %13 : vector<1x4xf32> to vector<16x4xf32>
    %15 = arith.addf %12, %14 : vector<16x4xf32>
    %cst_13 = arith.constant 0.000000e+00 : f32
    %16 = vector.broadcast %cst_13 : f32 to vector<16x4xf32>
    %17 = arith.maximumf %15, %16 : vector<16x4xf32>
    %cst_14 = arith.constant 0.000000e+00 : f32
    %18 = vector.broadcast %cst_14 : f32 to vector<16x4xf32>
    %19 = arith.minimumf %15, %18 : vector<16x4xf32>
    %20 = vector.broadcast %0 : f32 to vector<16x4xf32>
    %21 = arith.mulf %20, %19 : vector<16x4xf32>
    %22 = arith.addf %17, %21 : vector<16x4xf32>
    %23 = arith.truncf %22 : vector<16x4xf32> to vector<16x4xbf16>
    %c40 = arith.constant 40 : index
    %c0_15 = arith.constant 0 : index
    %24 = vector.load %arg11[%c40, %c0_15] : memref<264x4xbf16, #tpu.memory_space<vmem>>, vector<16x4xbf16>
    tpu.vector_store %arg11[%c40, %c0_15], %23 {strides = array<i32>} : memref<264x4xbf16, #tpu.memory_space<vmem>>, vector<16x4xbf16>,
    %c1_i32 = arith.constant 1 : i32
    %25 = arith.addi %1, %c1_i32 : i32
    %c0_16 = arith.constant 0 : index
    %26 = arith.index_cast %25 : i32 to index
    %c0_17 = arith.constant 0 : index
    %c0_18 = arith.constant 0 : index
    %27 = vector.load %arg2[%c0_16, %26, %c0_17, %c0_18] : memref<1x16x16x16xbf16, #tpu.memory_space<vmem>>, vector<1x1x16x16xbf16>
    %28 = vector.shape_cast %27 : vector<1x1x16x16xbf16> to vector<16x16xbf16>
    %c0_19 = arith.constant 0 : index
    %c0_20 = arith.constant 0 : index
    %29 = vector.load %arg3[%c0_19, %c0_20] : memref<16x4xbf16, #tpu.memory_space<vmem>>, vector<16x4xbf16>
    %cst_21 = arith.constant dense<0.000000e+00> : vector<16x4xf32>
    %30 = tpu.matmul %28, %29, %cst_21 {dimension_numbers = #tpu.dot_dimension_numbers<[1], [0], [0], [1], [0, 0, 1, 1], [], []>} : vector<16x16xbf16>, vector<16x4xbf16>, vector<16x4xf32> -> vector<16x4xf32>
    %c0_22 = arith.constant 0 : index
    %c0_23 = arith.constant 0 : index
    %31 = vector.load %arg4[%c0_22, %c0_23] : memref<1x4xf32, #tpu.memory_space<vmem>>, vector<1x4xf32>
    %32 = vector.broadcast %31 : vector<1x4xf32> to vector<16x4xf32>
    %33 = arith.addf %30, %32 : vector<16x4xf32>
    %cst_24 = arith.constant 0.000000e+00 : f32
    %34 = vector.broadcast %cst_24 : f32 to vector<16x4xf32>
    %35 = arith.maximumf %33, %34 : vector<16x4xf32>
    %cst_25 = arith.constant 0.000000e+00 : f32
    %36 = vector.broadcast %cst_25 : f32 to vector<16x4xf32>
    %37 = arith.minimumf %33, %36 : vector<16x4xf32>
    %38 = vector.broadcast %0 : f32 to vector<16x4xf32>
    %39 = arith.mulf %38, %37 : vector<16x4xf32>
    %40 = arith.addf %35, %39 : vector<16x4xf32>
    %41 = arith.truncf %40 : vector<16x4xf32> to vector<16x4xbf16>
    %c64 = arith.constant 64 : index
    %c0_26 = arith.constant 0 : index
    %42 = vector.load %arg11[%c64, %c0_26] : memref<264x4xbf16, #tpu.memory_space<vmem>>, vector<16x4xbf16>
    tpu.vector_store %arg11[%c64, %c0_26], %41 {strides = array<i32>} : memref<264x4xbf16, #tpu.memory_space<vmem>>, vector<16x4xbf16>,
    %c2_i32 = arith.constant 2 : i32
    %43 = arith.addi %1, %c2_i32 : i32
    %c0_27 = arith.constant 0 : index
    %44 = arith.index_cast %43 : i32 to index
    %c0_28 = arith.constant 0 : index
    %c0_29 = arith.constant 0 : index
    %45 = vector.load %arg2[%c0_27, %44, %c0_28, %c0_29] : memref<1x16x16x16xbf16, #tpu.memory_space<vmem>>, vector<1x1x16x16xbf16>
    %46 = vector.shape_cast %45 : vector<1x1x16x16xbf16> to vector<16x16xbf16>
    %c0_30 = arith.constant 0 : index
    %c0_31 = arith.constant 0 : index
    %47 = vector.load %arg3[%c0_30, %c0_31] : memref<16x4xbf16, #tpu.memory_space<vmem>>, vector<16x4xbf16>
    %cst_32 = arith.constant dense<0.000000e+00> : vector<16x4xf32>
    %48 = tpu.matmul %46, %47, %cst_32 {dimension_numbers = #tpu.dot_dimension_numbers<[1], [0], [0], [1], [0, 0, 1, 1], [], []>} : vector<16x16xbf16>, vector<16x4xbf16>, vector<16x4xf32> -> vector<16x4xf32>
    %c0_33 = arith.constant 0 : index
    %c0_34 = arith.constant 0 : index
    %49 = vector.load %arg4[%c0_33, %c0_34] : memref<1x4xf32, #tpu.memory_space<vmem>>, vector<1x4xf32>
    %50 = vector.broadcast %49 : vector<1x4xf32> to vector<16x4xf32>
    %51 = arith.addf %48, %50 : vector<16x4xf32>
    %cst_35 = arith.constant 0.000000e+00 : f32
    %52 = vector.broadcast %cst_35 : f32 to vector<16x4xf32>
    %53 = arith.maximumf %51, %52 : vector<16x4xf32>
    %cst_36 = arith.constant 0.000000e+00 : f32
    %54 = vector.broadcast %cst_36 : f32 to vector<16x4xf32>
    %55 = arith.minimumf %51, %54 : vector<16x4xf32>
    %56 = vector.broadcast %0 : f32 to vector<16x4xf32>
    %57 = arith.mulf %56, %55 : vector<16x4xf32>
    %58 = arith.addf %53, %57 : vector<16x4xf32>
    %59 = arith.truncf %58 : vector<16x4xf32> to vector<16x4xbf16>
    %c88 = arith.constant 88 : index
    %c0_37 = arith.constant 0 : index
    %60 = vector.load %arg11[%c88, %c0_37] : memref<264x4xbf16, #tpu.memory_space<vmem>>, vector<16x4xbf16>
    tpu.vector_store %arg11[%c88, %c0_37], %59 {strides = array<i32>} : memref<264x4xbf16, #tpu.memory_space<vmem>>, vector<16x4xbf16>,
    %c3_i32 = arith.constant 3 : i32
    %61 = arith.addi %1, %c3_i32 : i32
    %c0_38 = arith.constant 0 : index
    %62 = arith.index_cast %61 : i32 to index
    %c0_39 = arith.constant 0 : index
    %c0_40 = arith.constant 0 : index
    %63 = vector.load %arg2[%c0_38, %62, %c0_39, %c0_40] : memref<1x16x16x16xbf16, #tpu.memory_space<vmem>>, vector<1x1x16x16xbf16>
    %64 = vector.shape_cast %63 : vector<1x1x16x16xbf16> to vector<16x16xbf16>
    %c0_41 = arith.constant 0 : index
    %c0_42 = arith.constant 0 : index
    %65 = vector.load %arg3[%c0_41, %c0_42] : memref<16x4xbf16, #tpu.memory_space<vmem>>, vector<16x4xbf16>
    %cst_43 = arith.constant dense<0.000000e+00> : vector<16x4xf32>
    %66 = tpu.matmul %64, %65, %cst_43 {dimension_numbers = #tpu.dot_dimension_numbers<[1], [0], [0], [1], [0, 0, 1, 1], [], []>} : vector<16x16xbf16>, vector<16x4xbf16>, vector<16x4xf32> -> vector<16x4xf32>
    %c0_44 = arith.constant 0 : index
    %c0_45 = arith.constant 0 : index
    %67 = vector.load %arg4[%c0_44, %c0_45] : memref<1x4xf32, #tpu.memory_space<vmem>>, vector<1x4xf32>
    %68 = vector.broadcast %67 : vector<1x4xf32> to vector<16x4xf32>
    %69 = arith.addf %66, %68 : vector<16x4xf32>
    %cst_46 = arith.constant 0.000000e+00 : f32
    %70 = vector.broadcast %cst_46 : f32 to vector<16x4xf32>
    %71 = arith.maximumf %69, %70 : vector<16x4xf32>
    %cst_47 = arith.constant 0.000000e+00 : f32
    %72 = vector.broadcast %cst_47 : f32 to vector<16x4xf32>
    %73 = arith.minimumf %69, %72 : vector<16x4xf32>
    %74 = vector.broadcast %0 : f32 to vector<16x4xf32>
    %75 = arith.mulf %74, %73 : vector<16x4xf32>
    %76 = arith.addf %71, %75 : vector<16x4xf32>
    %77 = arith.truncf %76 : vector<16x4xf32> to vector<16x4xbf16>
    %c112 = arith.constant 112 : index
    %c0_48 = arith.constant 0 : index
    %78 = vector.load %arg11[%c112, %c0_48] : memref<264x4xbf16, #tpu.memory_space<vmem>>, vector<16x4xbf16>
    tpu.vector_store %arg11[%c112, %c0_48], %77 {strides = array<i32>} : memref<264x4xbf16, #tpu.memory_space<vmem>>, vector<16x4xbf16>,
    %c4_i32 = arith.constant 4 : i32
    %79 = arith.addi %1, %c4_i32 : i32
    %c0_49 = arith.constant 0 : index
    %80 = arith.index_cast %79 : i32 to index
    %c0_50 = arith.constant 0 : index
    %c0_51 = arith.constant 0 : index
    %81 = vector.load %arg2[%c0_49, %80, %c0_50, %c0_51] : memref<1x16x16x16xbf16, #tpu.memory_space<vmem>>, vector<1x1x16x16xbf16>
    %82 = vector.shape_cast %81 : vector<1x1x16x16xbf16> to vector<16x16xbf16>
    %c0_52 = arith.constant 0 : index
    %c0_53 = arith.constant 0 : index
    %83 = vector.load %arg3[%c0_52, %c0_53] : memref<16x4xbf16, #tpu.memory_space<vmem>>, vector<16x4xbf16>
    %cst_54 = arith.constant dense<0.000000e+00> : vector<16x4xf32>
    %84 = tpu.matmul %82, %83, %cst_54 {dimension_numbers = #tpu.dot_dimension_numbers<[1], [0], [0], [1], [0, 0, 1, 1], [], []>} : vector<16x16xbf16>, vector<16x4xbf16>, vector<16x4xf32> -> vector<16x4xf32>
    %c0_55 = arith.constant 0 : index
    %c0_56 = arith.constant 0 : index
    %85 = vector.load %arg4[%c0_55, %c0_56] : memref<1x4xf32, #tpu.memory_space<vmem>>, vector<1x4xf32>
    %86 = vector.broadcast %85 : vector<1x4xf32> to vector<16x4xf32>
    %87 = arith.addf %84, %86 : vector<16x4xf32>
    %cst_57 = arith.constant 0.000000e+00 : f32
    %88 = vector.broadcast %cst_57 : f32 to vector<16x4xf32>
    %89 = arith.maximumf %87, %88 : vector<16x4xf32>
    %cst_58 = arith.constant 0.000000e+00 : f32
    %90 = vector.broadcast %cst_58 : f32 to vector<16x4xf32>
    %91 = arith.minimumf %87, %90 : vector<16x4xf32>
    %92 = vector.broadcast %0 : f32 to vector<16x4xf32>
    %93 = arith.mulf %92, %91 : vector<16x4xf32>
    %94 = arith.addf %89, %93 : vector<16x4xf32>
    %95 = arith.truncf %94 : vector<16x4xf32> to vector<16x4xbf16>
    %c136 = arith.constant 136 : index
    %c0_59 = arith.constant 0 : index
    %96 = vector.load %arg11[%c136, %c0_59] : memref<264x4xbf16, #tpu.memory_space<vmem>>, vector<16x4xbf16>
    tpu.vector_store %arg11[%c136, %c0_59], %95 {strides = array<i32>} : memref<264x4xbf16, #tpu.memory_space<vmem>>, vector<16x4xbf16>,
    %c5_i32 = arith.constant 5 : i32
    %97 = arith.addi %1, %c5_i32 : i32
    %c0_60 = arith.constant 0 : index
    %98 = arith.index_cast %97 : i32 to index
    %c0_61 = arith.constant 0 : index
    %c0_62 = arith.constant 0 : index
    %99 = vector.load %arg2[%c0_60, %98, %c0_61, %c0_62] : memref<1x16x16x16xbf16, #tpu.memory_space<vmem>>, vector<1x1x16x16xbf16>
    %100 = vector.shape_cast %99 : vector<1x1x16x16xbf16> to vector<16x16xbf16>
    %c0_63 = arith.constant 0 : index
    %c0_64 = arith.constant 0 : index
    %101 = vector.load %arg3[%c0_63, %c0_64] : memref<16x4xbf16, #tpu.memory_space<vmem>>, vector<16x4xbf16>
    %cst_65 = arith.constant dense<0.000000e+00> : vector<16x4xf32>
    %102 = tpu.matmul %100, %101, %cst_65 {dimension_numbers = #tpu.dot_dimension_numbers<[1], [0], [0], [1], [0, 0, 1, 1], [], []>} : vector<16x16xbf16>, vector<16x4xbf16>, vector<16x4xf32> -> vector<16x4xf32>
    %c0_66 = arith.constant 0 : index
    %c0_67 = arith.constant 0 : index
    %103 = vector.load %arg4[%c0_66, %c0_67] : memref<1x4xf32, #tpu.memory_space<vmem>>, vector<1x4xf32>
    %104 = vector.broadcast %103 : vector<1x4xf32> to vector<16x4xf32>
    %105 = arith.addf %102, %104 : vector<16x4xf32>
    %cst_68 = arith.constant 0.000000e+00 : f32
    %106 = vector.broadcast %cst_68 : f32 to vector<16x4xf32>
    %107 = arith.maximumf %105, %106 : vector<16x4xf32>
    %cst_69 = arith.constant 0.000000e+00 : f32
    %108 = vector.broadcast %cst_69 : f32 to vector<16x4xf32>
    %109 = arith.minimumf %105, %108 : vector<16x4xf32>
    %110 = vector.broadcast %0 : f32 to vector<16x4xf32>
    %111 = arith.mulf %110, %109 : vector<16x4xf32>
    %112 = arith.addf %107, %111 : vector<16x4xf32>
    %113 = arith.truncf %112 : vector<16x4xf32> to vector<16x4xbf16>
    %c160 = arith.constant 160 : index
    %c0_70 = arith.constant 0 : index
    %114 = vector.load %arg11[%c160, %c0_70] : memref<264x4xbf16, #tpu.memory_space<vmem>>, vector<16x4xbf16>
    tpu.vector_store %arg11[%c160, %c0_70], %113 {strides = array<i32>} : memref<264x4xbf16, #tpu.memory_space<vmem>>, vector<16x4xbf16>,
    %c6_i32 = arith.constant 6 : i32
    %115 = arith.addi %1, %c6_i32 : i32
    %c0_71 = arith.constant 0 : index
    %116 = arith.index_cast %115 : i32 to index
    %c0_72 = arith.constant 0 : index
    %c0_73 = arith.constant 0 : index
    %117 = vector.load %arg2[%c0_71, %116, %c0_72, %c0_73] : memref<1x16x16x16xbf16, #tpu.memory_space<vmem>>, vector<1x1x16x16xbf16>
    %118 = vector.shape_cast %117 : vector<1x1x16x16xbf16> to vector<16x16xbf16>
    %c0_74 = arith.constant 0 : index
    %c0_75 = arith.constant 0 : index
    %119 = vector.load %arg3[%c0_74, %c0_75] : memref<16x4xbf16, #tpu.memory_space<vmem>>, vector<16x4xbf16>
    %cst_76 = arith.constant dense<0.000000e+00> : vector<16x4xf32>
    %120 = tpu.matmul %118, %119, %cst_76 {dimension_numbers = #tpu.dot_dimension_numbers<[1], [0], [0], [1], [0, 0, 1, 1], [], []>} : vector<16x16xbf16>, vector<16x4xbf16>, vector<16x4xf32> -> vector<16x4xf32>
    %c0_77 = arith.constant 0 : index
    %c0_78 = arith.constant 0 : index
    %121 = vector.load %arg4[%c0_77, %c0_78] : memref<1x4xf32, #tpu.memory_space<vmem>>, vector<1x4xf32>
    %122 = vector.broadcast %121 : vector<1x4xf32> to vector<16x4xf32>
    %123 = arith.addf %120, %122 : vector<16x4xf32>
    %cst_79 = arith.constant 0.000000e+00 : f32
    %124 = vector.broadcast %cst_79 : f32 to vector<16x4xf32>
    %125 = arith.maximumf %123, %124 : vector<16x4xf32>
    %cst_80 = arith.constant 0.000000e+00 : f32
    %126 = vector.broadcast %cst_80 : f32 to vector<16x4xf32>
    %127 = arith.minimumf %123, %126 : vector<16x4xf32>
    %128 = vector.broadcast %0 : f32 to vector<16x4xf32>
    %129 = arith.mulf %128, %127 : vector<16x4xf32>
    %130 = arith.addf %125, %129 : vector<16x4xf32>
    %131 = arith.truncf %130 : vector<16x4xf32> to vector<16x4xbf16>
    %c184 = arith.constant 184 : index
    %c0_81 = arith.constant 0 : index
    %132 = vector.load %arg11[%c184, %c0_81] : memref<264x4xbf16, #tpu.memory_space<vmem>>, vector<16x4xbf16>
    tpu.vector_store %arg11[%c184, %c0_81], %131 {strides = array<i32>} : memref<264x4xbf16, #tpu.memory_space<vmem>>, vector<16x4xbf16>,
    %c7_i32 = arith.constant 7 : i32
    %133 = arith.addi %1, %c7_i32 : i32
    %c0_82 = arith.constant 0 : index
    %134 = arith.index_cast %133 : i32 to index
    %c0_83 = arith.constant 0 : index
    %c0_84 = arith.constant 0 : index
    %135 = vector.load %arg2[%c0_82, %134, %c0_83, %c0_84] : memref<1x16x16x16xbf16, #tpu.memory_space<vmem>>, vector<1x1x16x16xbf16>
    %136 = vector.shape_cast %135 : vector<1x1x16x16xbf16> to vector<16x16xbf16>
    %c0_85 = arith.constant 0 : index
    %c0_86 = arith.constant 0 : index
    %137 = vector.load %arg3[%c0_85, %c0_86] : memref<16x4xbf16, #tpu.memory_space<vmem>>, vector<16x4xbf16>
    %cst_87 = arith.constant dense<0.000000e+00> : vector<16x4xf32>
    %138 = tpu.matmul %136, %137, %cst_87 {dimension_numbers = #tpu.dot_dimension_numbers<[1], [0], [0], [1], [0, 0, 1, 1], [], []>} : vector<16x16xbf16>, vector<16x4xbf16>, vector<16x4xf32> -> vector<16x4xf32>
    %c0_88 = arith.constant 0 : index
    %c0_89 = arith.constant 0 : index
    %139 = vector.load %arg4[%c0_88, %c0_89] : memref<1x4xf32, #tpu.memory_space<vmem>>, vector<1x4xf32>
    %140 = vector.broadcast %139 : vector<1x4xf32> to vector<16x4xf32>
    %141 = arith.addf %138, %140 : vector<16x4xf32>
    %cst_90 = arith.constant 0.000000e+00 : f32
    %142 = vector.broadcast %cst_90 : f32 to vector<16x4xf32>
    %143 = arith.maximumf %141, %142 : vector<16x4xf32>
    %cst_91 = arith.constant 0.000000e+00 : f32
    %144 = vector.broadcast %cst_91 : f32 to vector<16x4xf32>
    %145 = arith.minimumf %141, %144 : vector<16x4xf32>
    %146 = vector.broadcast %0 : f32 to vector<16x4xf32>
    %147 = arith.mulf %146, %145 : vector<16x4xf32>
    %148 = arith.addf %143, %147 : vector<16x4xf32>
    %149 = arith.truncf %148 : vector<16x4xf32> to vector<16x4xbf16>
    %c208 = arith.constant 208 : index
    %c0_92 = arith.constant 0 : index
    %150 = vector.load %arg11[%c208, %c0_92] : memref<264x4xbf16, #tpu.memory_space<vmem>>, vector<16x4xbf16>
    tpu.vector_store %arg11[%c208, %c0_92], %149 {strides = array<i32>} : memref<264x4xbf16, #tpu.memory_space<vmem>>, vector<16x4xbf16>,
    %c1_i32_93 = arith.constant 1 : i32
    %151 = arith.cmpi slt, %arg1, %c1_i32_93 : i32
    %152 = arith.extui %151 : i1 to i32
    %c0_i32_94 = arith.constant 0 : i32
    %153 = arith.cmpi ne, %152, %c0_i32_94 : i32
    scf.if %153 {
      %c8_i32_209 = arith.constant 8 : i32
      %349 = arith.addi %1, %c8_i32_209 : i32
      %c0_210 = arith.constant 0 : index
      %350 = arith.index_cast %349 : i32 to index
      %c0_211 = arith.constant 0 : index
      %c0_212 = arith.constant 0 : index
      %351 = vector.load %arg2[%c0_210, %350, %c0_211, %c0_212] : memref<1x16x16x16xbf16, #tpu.memory_space<vmem>>, vector<1x1x16x16xbf16>
      %352 = vector.shape_cast %351 : vector<1x1x16x16xbf16> to vector<16x16xbf16>
      %c0_213 = arith.constant 0 : index
      %c0_214 = arith.constant 0 : index
      %353 = vector.load %arg3[%c0_213, %c0_214] : memref<16x4xbf16, #tpu.memory_space<vmem>>, vector<16x4xbf16>
      %cst_215 = arith.constant dense<0.000000e+00> : vector<16x4xf32>
      %354 = tpu.matmul %352, %353, %cst_215 {dimension_numbers = #tpu.dot_dimension_numbers<[1], [0], [0], [1], [0, 0, 1, 1], [], []>} : vector<16x16xbf16>, vector<16x4xbf16>, vector<16x4xf32> -> vector<16x4xf32>
      %c0_216 = arith.constant 0 : index
      %c0_217 = arith.constant 0 : index
      %355 = vector.load %arg4[%c0_216, %c0_217] : memref<1x4xf32, #tpu.memory_space<vmem>>, vector<1x4xf32>
      %356 = vector.broadcast %355 : vector<1x4xf32> to vector<16x4xf32>
      %357 = arith.addf %354, %356 : vector<16x4xf32>
      %cst_218 = arith.constant 0.000000e+00 : f32
      %358 = vector.broadcast %cst_218 : f32 to vector<16x4xf32>
      %359 = arith.maximumf %357, %358 : vector<16x4xf32>
      %cst_219 = arith.constant 0.000000e+00 : f32
      %360 = vector.broadcast %cst_219 : f32 to vector<16x4xf32>
      %361 = arith.minimumf %357, %360 : vector<16x4xf32>
      %362 = vector.broadcast %0 : f32 to vector<16x4xf32>
      %363 = arith.mulf %362, %361 : vector<16x4xf32>
      %364 = arith.addf %359, %363 : vector<16x4xf32>
      %365 = arith.truncf %364 : vector<16x4xf32> to vector<16x4xbf16>
      %c232 = arith.constant 232 : index
      %c0_220 = arith.constant 0 : index
      %366 = vector.load %arg11[%c232, %c0_220] : memref<264x4xbf16, #tpu.memory_space<vmem>>, vector<16x4xbf16>
      tpu.vector_store %arg11[%c232, %c0_220], %365 {strides = array<i32>} : memref<264x4xbf16, #tpu.memory_space<vmem>>, vector<16x4xbf16>,
    } else {
    }
    %c15 = arith.constant 15 : index
    %c0_95 = arith.constant 0 : index
    %154 = vector.load %arg11[%c15, %c0_95] : memref<264x4xbf16, #tpu.memory_space<vmem>>, vector<192x4xbf16>
    %c0_96 = arith.constant 0 : index
    %c0_97 = arith.constant 0 : index
    %155 = vector.load %arg5[%c0_96, %c0_97] : memref<36x4xbf16, #tpu.memory_space<vmem>>, vector<4x4xbf16>
    %cst_98 = arith.constant dense<0.000000e+00> : vector<192x4xf32>
    %156 = tpu.matmul %154, %155, %cst_98 {dimension_numbers = #tpu.dot_dimension_numbers<[1], [0], [0], [1], [0, 0, 1, 1], [], []>} : vector<192x4xbf16>, vector<4x4xbf16>, vector<192x4xf32> -> vector<192x4xf32>
    %c16 = arith.constant 16 : index
    %c0_99 = arith.constant 0 : index
    %157 = vector.load %arg11[%c16, %c0_99] : memref<264x4xbf16, #tpu.memory_space<vmem>>, vector<192x4xbf16>
    %c4 = arith.constant 4 : index
    %c0_100 = arith.constant 0 : index
    %158 = vector.load %arg5[%c4, %c0_100] : memref<36x4xbf16, #tpu.memory_space<vmem>>, vector<4x4xbf16>
    %cst_101 = arith.constant dense<0.000000e+00> : vector<192x4xf32>
    %159 = tpu.matmul %157, %158, %cst_101 {dimension_numbers = #tpu.dot_dimension_numbers<[1], [0], [0], [1], [0, 0, 1, 1], [], []>} : vector<192x4xbf16>, vector<4x4xbf16>, vector<192x4xf32> -> vector<192x4xf32>
    %160 = arith.addf %156, %159 : vector<192x4xf32>
    %c17 = arith.constant 17 : index
    %c0_102 = arith.constant 0 : index
    %161 = vector.load %arg11[%c17, %c0_102] : memref<264x4xbf16, #tpu.memory_space<vmem>>, vector<192x4xbf16>
    %c8 = arith.constant 8 : index
    %c0_103 = arith.constant 0 : index
    %162 = vector.load %arg5[%c8, %c0_103] : memref<36x4xbf16, #tpu.memory_space<vmem>>, vector<4x4xbf16>
    %cst_104 = arith.constant dense<0.000000e+00> : vector<192x4xf32>
    %163 = tpu.matmul %161, %162, %cst_104 {dimension_numbers = #tpu.dot_dimension_numbers<[1], [0], [0], [1], [0, 0, 1, 1], [], []>} : vector<192x4xbf16>, vector<4x4xbf16>, vector<192x4xf32> -> vector<192x4xf32>
    %164 = arith.addf %160, %163 : vector<192x4xf32>
    %c39 = arith.constant 39 : index
    %c0_105 = arith.constant 0 : index
    %165 = vector.load %arg11[%c39, %c0_105] : memref<264x4xbf16, #tpu.memory_space<vmem>>, vector<192x4xbf16>
    %c12 = arith.constant 12 : index
    %c0_106 = arith.constant 0 : index
    %166 = vector.load %arg5[%c12, %c0_106] : memref<36x4xbf16, #tpu.memory_space<vmem>>, vector<4x4xbf16>
    %cst_107 = arith.constant dense<0.000000e+00> : vector<192x4xf32>
    %167 = tpu.matmul %165, %166, %cst_107 {dimension_numbers = #tpu.dot_dimension_numbers<[1], [0], [0], [1], [0, 0, 1, 1], [], []>} : vector<192x4xbf16>, vector<4x4xbf16>, vector<192x4xf32> -> vector<192x4xf32>
    %168 = arith.addf %164, %167 : vector<192x4xf32>
    %c40_108 = arith.constant 40 : index
    %c0_109 = arith.constant 0 : index
    %169 = vector.load %arg11[%c40_108, %c0_109] : memref<264x4xbf16, #tpu.memory_space<vmem>>, vector<192x4xbf16>
    %c16_110 = arith.constant 16 : index
    %c0_111 = arith.constant 0 : index
    %170 = vector.load %arg5[%c16_110, %c0_111] : memref<36x4xbf16, #tpu.memory_space<vmem>>, vector<4x4xbf16>
    %cst_112 = arith.constant dense<0.000000e+00> : vector<192x4xf32>
    %171 = tpu.matmul %169, %170, %cst_112 {dimension_numbers = #tpu.dot_dimension_numbers<[1], [0], [0], [1], [0, 0, 1, 1], [], []>} : vector<192x4xbf16>, vector<4x4xbf16>, vector<192x4xf32> -> vector<192x4xf32>
    %172 = arith.addf %168, %171 : vector<192x4xf32>
    %c41 = arith.constant 41 : index
    %c0_113 = arith.constant 0 : index
    %173 = vector.load %arg11[%c41, %c0_113] : memref<264x4xbf16, #tpu.memory_space<vmem>>, vector<192x4xbf16>
    %c20 = arith.constant 20 : index
    %c0_114 = arith.constant 0 : index
    %174 = vector.load %arg5[%c20, %c0_114] : memref<36x4xbf16, #tpu.memory_space<vmem>>, vector<4x4xbf16>
    %cst_115 = arith.constant dense<0.000000e+00> : vector<192x4xf32>
    %175 = tpu.matmul %173, %174, %cst_115 {dimension_numbers = #tpu.dot_dimension_numbers<[1], [0], [0], [1], [0, 0, 1, 1], [], []>} : vector<192x4xbf16>, vector<4x4xbf16>, vector<192x4xf32> -> vector<192x4xf32>
    %176 = arith.addf %172, %175 : vector<192x4xf32>
    %c63 = arith.constant 63 : index
    %c0_116 = arith.constant 0 : index
    %177 = vector.load %arg11[%c63, %c0_116] : memref<264x4xbf16, #tpu.memory_space<vmem>>, vector<192x4xbf16>
    %c24 = arith.constant 24 : index
    %c0_117 = arith.constant 0 : index
    %178 = vector.load %arg5[%c24, %c0_117] : memref<36x4xbf16, #tpu.memory_space<vmem>>, vector<4x4xbf16>
    %cst_118 = arith.constant dense<0.000000e+00> : vector<192x4xf32>
    %179 = tpu.matmul %177, %178, %cst_118 {dimension_numbers = #tpu.dot_dimension_numbers<[1], [0], [0], [1], [0, 0, 1, 1], [], []>} : vector<192x4xbf16>, vector<4x4xbf16>, vector<192x4xf32> -> vector<192x4xf32>
    %180 = arith.addf %176, %179 : vector<192x4xf32>
    %c64_119 = arith.constant 64 : index
    %c0_120 = arith.constant 0 : index
    %181 = vector.load %arg11[%c64_119, %c0_120] : memref<264x4xbf16, #tpu.memory_space<vmem>>, vector<192x4xbf16>
    %c28 = arith.constant 28 : index
    %c0_121 = arith.constant 0 : index
    %182 = vector.load %arg5[%c28, %c0_121] : memref<36x4xbf16, #tpu.memory_space<vmem>>, vector<4x4xbf16>
    %cst_122 = arith.constant dense<0.000000e+00> : vector<192x4xf32>
    %183 = tpu.matmul %181, %182, %cst_122 {dimension_numbers = #tpu.dot_dimension_numbers<[1], [0], [0], [1], [0, 0, 1, 1], [], []>} : vector<192x4xbf16>, vector<4x4xbf16>, vector<192x4xf32> -> vector<192x4xf32>
    %184 = arith.addf %180, %183 : vector<192x4xf32>
    %c65 = arith.constant 65 : index
    %c0_123 = arith.constant 0 : index
    %185 = vector.load %arg11[%c65, %c0_123] : memref<264x4xbf16, #tpu.memory_space<vmem>>, vector<192x4xbf16>
    %c32 = arith.constant 32 : index
    %c0_124 = arith.constant 0 : index
    %186 = vector.load %arg5[%c32, %c0_124] : memref<36x4xbf16, #tpu.memory_space<vmem>>, vector<4x4xbf16>
    %cst_125 = arith.constant dense<0.000000e+00> : vector<192x4xf32>
    %187 = tpu.matmul %185, %186, %cst_125 {dimension_numbers = #tpu.dot_dimension_numbers<[1], [0], [0], [1], [0, 0, 1, 1], [], []>} : vector<192x4xbf16>, vector<4x4xbf16>, vector<192x4xf32> -> vector<192x4xf32>
    %188 = arith.addf %184, %187 : vector<192x4xf32>
    %c0_126 = arith.constant 0 : index
    %c0_127 = arith.constant 0 : index
    %189 = vector.load %arg6[%c0_126, %c0_127] : memref<1x4xf32, #tpu.memory_space<vmem>>, vector<1x4xf32>
    %190 = vector.broadcast %189 : vector<1x4xf32> to vector<192x4xf32>
    %191 = arith.addf %188, %190 : vector<192x4xf32>
    %cst_128 = arith.constant 0.000000e+00 : f32
    %192 = vector.broadcast %cst_128 : f32 to vector<192x4xf32>
    %193 = arith.maximumf %191, %192 : vector<192x4xf32>
    %cst_129 = arith.constant 0.000000e+00 : f32
    %194 = vector.broadcast %cst_129 : f32 to vector<192x4xf32>
    %195 = arith.minimumf %191, %194 : vector<192x4xf32>
    %196 = vector.broadcast %0 : f32 to vector<192x4xf32>
    %197 = arith.mulf %196, %195 : vector<192x4xf32>
    %198 = arith.addf %193, %197 : vector<192x4xf32>
    %199 = arith.truncf %198 : vector<192x4xf32> to vector<192x4xbf16>
    %c0_130 = arith.constant 0 : index
    %c0_131 = arith.constant 0 : index
    %200 = vector.load %arg7[%c0_130, %c0_131] : memref<4x16xbf16, #tpu.memory_space<vmem>>, vector<4x16xbf16>
    %cst_132 = arith.constant dense<0.000000e+00> : vector<192x16xf32>
    %201 = tpu.matmul %199, %200, %cst_132 {dimension_numbers = #tpu.dot_dimension_numbers<[1], [0], [0], [1], [0, 0, 1, 1], [], []>} : vector<192x4xbf16>, vector<4x16xbf16>, vector<192x16xf32> -> vector<192x16xf32>
    %c0_133 = arith.constant 0 : index
    %c0_134 = arith.constant 0 : index
    %202 = vector.load %arg8[%c0_133, %c0_134] : memref<1x16xf32, #tpu.memory_space<vmem>>, vector<1x16xf32>
    %203 = vector.broadcast %202 : vector<1x16xf32> to vector<192x16xf32>
    %204 = arith.addf %201, %203 : vector<192x16xf32>
    %c0_i32_135 = arith.constant 0 : i32
    %205 = arith.addi %1, %c0_i32_135 : i32
    %c0_136 = arith.constant 0 : index
    %206 = arith.index_cast %205 : i32 to index
    %c0_137 = arith.constant 0 : index
    %c0_138 = arith.constant 0 : index
    %207 = vector.load %arg2[%c0_136, %206, %c0_137, %c0_138] : memref<1x16x16x16xbf16, #tpu.memory_space<vmem>>, vector<1x1x16x16xbf16>
    %208 = vector.shape_cast %207 : vector<1x1x16x16xbf16> to vector<16x16xbf16>
    %209 = arith.extf %208 : vector<16x16xbf16> to vector<16x16xf32>
    %210 = vector.extract_strided_slice %204 {offsets = [0, 0], sizes = [16, 16], strides = [1, 1]} : vector<192x16xf32> to vector<16x16xf32>
    %211 = arith.addf %210, %209 : vector<16x16xf32>
    %cst_139 = arith.constant 0.000000e+00 : f32
    %212 = vector.broadcast %cst_139 : f32 to vector<16x16xf32>
    %213 = arith.maximumf %211, %212 : vector<16x16xf32>
    %cst_140 = arith.constant 0.000000e+00 : f32
    %214 = vector.broadcast %cst_140 : f32 to vector<16x16xf32>
    %215 = arith.minimumf %211, %214 : vector<16x16xf32>
    %216 = vector.broadcast %0 : f32 to vector<16x16xf32>
    %217 = arith.mulf %216, %215 : vector<16x16xf32>
    %218 = arith.addf %213, %217 : vector<16x16xf32>
    %219 = arith.truncf %218 : vector<16x16xf32> to vector<16x16xbf16>
    %c0_141 = arith.constant 0 : index
    %c0_142 = arith.constant 0 : index
    %c0_143 = arith.constant 0 : index
    %c0_144 = arith.constant 0 : index
    %220 = vector.load %arg10[%c0_141, %c0_142, %c0_143, %c0_144] : memref<1x8x16x16xbf16, #tpu.memory_space<vmem>>, vector<1x1x16x16xbf16>
    %221 = vector.shape_cast %220 : vector<1x1x16x16xbf16> to vector<16x16xbf16>
    %222 = vector.shape_cast %219 : vector<16x16xbf16> to vector<1x1x16x16xbf16>
    tpu.vector_store %arg10[%c0_141, %c0_142, %c0_143, %c0_144], %222 {strides = array<i32>} : memref<1x8x16x16xbf16, #tpu.memory_space<vmem>>, vector<1x1x16x16xbf16>,
    %c1_i32_145 = arith.constant 1 : i32
    %223 = arith.addi %1, %c1_i32_145 : i32
    %c0_146 = arith.constant 0 : index
    %224 = arith.index_cast %223 : i32 to index
    %c0_147 = arith.constant 0 : index
    %c0_148 = arith.constant 0 : index
    %225 = vector.load %arg2[%c0_146, %224, %c0_147, %c0_148] : memref<1x16x16x16xbf16, #tpu.memory_space<vmem>>, vector<1x1x16x16xbf16>
    %226 = vector.shape_cast %225 : vector<1x1x16x16xbf16> to vector<16x16xbf16>
    %227 = arith.extf %226 : vector<16x16xbf16> to vector<16x16xf32>
    %228 = vector.extract_strided_slice %204 {offsets = [24, 0], sizes = [16, 16], strides = [1, 1]} : vector<192x16xf32> to vector<16x16xf32>
    %229 = arith.addf %228, %227 : vector<16x16xf32>
    %cst_149 = arith.constant 0.000000e+00 : f32
    %230 = vector.broadcast %cst_149 : f32 to vector<16x16xf32>
    %231 = arith.maximumf %229, %230 : vector<16x16xf32>
    %cst_150 = arith.constant 0.000000e+00 : f32
    %232 = vector.broadcast %cst_150 : f32 to vector<16x16xf32>
    %233 = arith.minimumf %229, %232 : vector<16x16xf32>
    %234 = vector.broadcast %0 : f32 to vector<16x16xf32>
    %235 = arith.mulf %234, %233 : vector<16x16xf32>
    %236 = arith.addf %231, %235 : vector<16x16xf32>
    %237 = arith.truncf %236 : vector<16x16xf32> to vector<16x16xbf16>
    %c0_151 = arith.constant 0 : index
    %c1 = arith.constant 1 : index
    %c0_152 = arith.constant 0 : index
    %c0_153 = arith.constant 0 : index
    %238 = vector.load %arg10[%c0_151, %c1, %c0_152, %c0_153] : memref<1x8x16x16xbf16, #tpu.memory_space<vmem>>, vector<1x1x16x16xbf16>
    %239 = vector.shape_cast %238 : vector<1x1x16x16xbf16> to vector<16x16xbf16>
    %240 = vector.shape_cast %237 : vector<16x16xbf16> to vector<1x1x16x16xbf16>
    tpu.vector_store %arg10[%c0_151, %c1, %c0_152, %c0_153], %240 {strides = array<i32>} : memref<1x8x16x16xbf16, #tpu.memory_space<vmem>>, vector<1x1x16x16xbf16>,
    %c2_i32_154 = arith.constant 2 : i32
    %241 = arith.addi %1, %c2_i32_154 : i32
    %c0_155 = arith.constant 0 : index
    %242 = arith.index_cast %241 : i32 to index
    %c0_156 = arith.constant 0 : index
    %c0_157 = arith.constant 0 : index
    %243 = vector.load %arg2[%c0_155, %242, %c0_156, %c0_157] : memref<1x16x16x16xbf16, #tpu.memory_space<vmem>>, vector<1x1x16x16xbf16>
    %244 = vector.shape_cast %243 : vector<1x1x16x16xbf16> to vector<16x16xbf16>
    %245 = arith.extf %244 : vector<16x16xbf16> to vector<16x16xf32>
    %246 = vector.extract_strided_slice %204 {offsets = [48, 0], sizes = [16, 16], strides = [1, 1]} : vector<192x16xf32> to vector<16x16xf32>
    %247 = arith.addf %246, %245 : vector<16x16xf32>
    %cst_158 = arith.constant 0.000000e+00 : f32
    %248 = vector.broadcast %cst_158 : f32 to vector<16x16xf32>
    %249 = arith.maximumf %247, %248 : vector<16x16xf32>
    %cst_159 = arith.constant 0.000000e+00 : f32
    %250 = vector.broadcast %cst_159 : f32 to vector<16x16xf32>
    %251 = arith.minimumf %247, %250 : vector<16x16xf32>
    %252 = vector.broadcast %0 : f32 to vector<16x16xf32>
    %253 = arith.mulf %252, %251 : vector<16x16xf32>
    %254 = arith.addf %249, %253 : vector<16x16xf32>
    %255 = arith.truncf %254 : vector<16x16xf32> to vector<16x16xbf16>
    %c0_160 = arith.constant 0 : index
    %c2 = arith.constant 2 : index
    %c0_161 = arith.constant 0 : index
    %c0_162 = arith.constant 0 : index
    %256 = vector.load %arg10[%c0_160, %c2, %c0_161, %c0_162] : memref<1x8x16x16xbf16, #tpu.memory_space<vmem>>, vector<1x1x16x16xbf16>
    %257 = vector.shape_cast %256 : vector<1x1x16x16xbf16> to vector<16x16xbf16>
    %258 = vector.shape_cast %255 : vector<16x16xbf16> to vector<1x1x16x16xbf16>
    tpu.vector_store %arg10[%c0_160, %c2, %c0_161, %c0_162], %258 {strides = array<i32>} : memref<1x8x16x16xbf16, #tpu.memory_space<vmem>>, vector<1x1x16x16xbf16>,
    %c3_i32_163 = arith.constant 3 : i32
    %259 = arith.addi %1, %c3_i32_163 : i32
    %c0_164 = arith.constant 0 : index
    %260 = arith.index_cast %259 : i32 to index
    %c0_165 = arith.constant 0 : index
    %c0_166 = arith.constant 0 : index
    %261 = vector.load %arg2[%c0_164, %260, %c0_165, %c0_166] : memref<1x16x16x16xbf16, #tpu.memory_space<vmem>>, vector<1x1x16x16xbf16>
    %262 = vector.shape_cast %261 : vector<1x1x16x16xbf16> to vector<16x16xbf16>
    %263 = arith.extf %262 : vector<16x16xbf16> to vector<16x16xf32>
    %264 = vector.extract_strided_slice %204 {offsets = [72, 0], sizes = [16, 16], strides = [1, 1]} : vector<192x16xf32> to vector<16x16xf32>
    %265 = arith.addf %264, %263 : vector<16x16xf32>
    %cst_167 = arith.constant 0.000000e+00 : f32
    %266 = vector.broadcast %cst_167 : f32 to vector<16x16xf32>
    %267 = arith.maximumf %265, %266 : vector<16x16xf32>
    %cst_168 = arith.constant 0.000000e+00 : f32
    %268 = vector.broadcast %cst_168 : f32 to vector<16x16xf32>
    %269 = arith.minimumf %265, %268 : vector<16x16xf32>
    %270 = vector.broadcast %0 : f32 to vector<16x16xf32>
    %271 = arith.mulf %270, %269 : vector<16x16xf32>
    %272 = arith.addf %267, %271 : vector<16x16xf32>
    %273 = arith.truncf %272 : vector<16x16xf32> to vector<16x16xbf16>
    %c0_169 = arith.constant 0 : index
    %c3 = arith.constant 3 : index
    %c0_170 = arith.constant 0 : index
    %c0_171 = arith.constant 0 : index
    %274 = vector.load %arg10[%c0_169, %c3, %c0_170, %c0_171] : memref<1x8x16x16xbf16, #tpu.memory_space<vmem>>, vector<1x1x16x16xbf16>
    %275 = vector.shape_cast %274 : vector<1x1x16x16xbf16> to vector<16x16xbf16>
    %276 = vector.shape_cast %273 : vector<16x16xbf16> to vector<1x1x16x16xbf16>
    tpu.vector_store %arg10[%c0_169, %c3, %c0_170, %c0_171], %276 {strides = array<i32>} : memref<1x8x16x16xbf16, #tpu.memory_space<vmem>>, vector<1x1x16x16xbf16>,
    %c4_i32_172 = arith.constant 4 : i32
    %277 = arith.addi %1, %c4_i32_172 : i32
    %c0_173 = arith.constant 0 : index
    %278 = arith.index_cast %277 : i32 to index
    %c0_174 = arith.constant 0 : index
    %c0_175 = arith.constant 0 : index
    %279 = vector.load %arg2[%c0_173, %278, %c0_174, %c0_175] : memref<1x16x16x16xbf16, #tpu.memory_space<vmem>>, vector<1x1x16x16xbf16>
    %280 = vector.shape_cast %279 : vector<1x1x16x16xbf16> to vector<16x16xbf16>
    %281 = arith.extf %280 : vector<16x16xbf16> to vector<16x16xf32>
    %282 = vector.extract_strided_slice %204 {offsets = [96, 0], sizes = [16, 16], strides = [1, 1]} : vector<192x16xf32> to vector<16x16xf32>
    %283 = arith.addf %282, %281 : vector<16x16xf32>
    %cst_176 = arith.constant 0.000000e+00 : f32
    %284 = vector.broadcast %cst_176 : f32 to vector<16x16xf32>
    %285 = arith.maximumf %283, %284 : vector<16x16xf32>
    %cst_177 = arith.constant 0.000000e+00 : f32
    %286 = vector.broadcast %cst_177 : f32 to vector<16x16xf32>
    %287 = arith.minimumf %283, %286 : vector<16x16xf32>
    %288 = vector.broadcast %0 : f32 to vector<16x16xf32>
    %289 = arith.mulf %288, %287 : vector<16x16xf32>
    %290 = arith.addf %285, %289 : vector<16x16xf32>
    %291 = arith.truncf %290 : vector<16x16xf32> to vector<16x16xbf16>
    %c0_178 = arith.constant 0 : index
    %c4_179 = arith.constant 4 : index
    %c0_180 = arith.constant 0 : index
    %c0_181 = arith.constant 0 : index
    %292 = vector.load %arg10[%c0_178, %c4_179, %c0_180, %c0_181] : memref<1x8x16x16xbf16, #tpu.memory_space<vmem>>, vector<1x1x16x16xbf16>
    %293 = vector.shape_cast %292 : vector<1x1x16x16xbf16> to vector<16x16xbf16>
    %294 = vector.shape_cast %291 : vector<16x16xbf16> to vector<1x1x16x16xbf16>
    tpu.vector_store %arg10[%c0_178, %c4_179, %c0_180, %c0_181], %294 {strides = array<i32>} : memref<1x8x16x16xbf16, #tpu.memory_space<vmem>>, vector<1x1x16x16xbf16>,
    %c5_i32_182 = arith.constant 5 : i32
    %295 = arith.addi %1, %c5_i32_182 : i32
    %c0_183 = arith.constant 0 : index
    %296 = arith.index_cast %295 : i32 to index
    %c0_184 = arith.constant 0 : index
    %c0_185 = arith.constant 0 : index
    %297 = vector.load %arg2[%c0_183, %296, %c0_184, %c0_185] : memref<1x16x16x16xbf16, #tpu.memory_space<vmem>>, vector<1x1x16x16xbf16>
    %298 = vector.shape_cast %297 : vector<1x1x16x16xbf16> to vector<16x16xbf16>
    %299 = arith.extf %298 : vector<16x16xbf16> to vector<16x16xf32>
    %300 = vector.extract_strided_slice %204 {offsets = [120, 0], sizes = [16, 16], strides = [1, 1]} : vector<192x16xf32> to vector<16x16xf32>
    %301 = arith.addf %300, %299 : vector<16x16xf32>
    %cst_186 = arith.constant 0.000000e+00 : f32
    %302 = vector.broadcast %cst_186 : f32 to vector<16x16xf32>
    %303 = arith.maximumf %301, %302 : vector<16x16xf32>
    %cst_187 = arith.constant 0.000000e+00 : f32
    %304 = vector.broadcast %cst_187 : f32 to vector<16x16xf32>
    %305 = arith.minimumf %301, %304 : vector<16x16xf32>
    %306 = vector.broadcast %0 : f32 to vector<16x16xf32>
    %307 = arith.mulf %306, %305 : vector<16x16xf32>
    %308 = arith.addf %303, %307 : vector<16x16xf32>
    %309 = arith.truncf %308 : vector<16x16xf32> to vector<16x16xbf16>
    %c0_188 = arith.constant 0 : index
    %c5 = arith.constant 5 : index
    %c0_189 = arith.constant 0 : index
    %c0_190 = arith.constant 0 : index
    %310 = vector.load %arg10[%c0_188, %c5, %c0_189, %c0_190] : memref<1x8x16x16xbf16, #tpu.memory_space<vmem>>, vector<1x1x16x16xbf16>
    %311 = vector.shape_cast %310 : vector<1x1x16x16xbf16> to vector<16x16xbf16>
    %312 = vector.shape_cast %309 : vector<16x16xbf16> to vector<1x1x16x16xbf16>
    tpu.vector_store %arg10[%c0_188, %c5, %c0_189, %c0_190], %312 {strides = array<i32>} : memref<1x8x16x16xbf16, #tpu.memory_space<vmem>>, vector<1x1x16x16xbf16>,
    %c6_i32_191 = arith.constant 6 : i32
    %313 = arith.addi %1, %c6_i32_191 : i32
    %c0_192 = arith.constant 0 : index
    %314 = arith.index_cast %313 : i32 to index
    %c0_193 = arith.constant 0 : index
    %c0_194 = arith.constant 0 : index
    %315 = vector.load %arg2[%c0_192, %314, %c0_193, %c0_194] : memref<1x16x16x16xbf16, #tpu.memory_space<vmem>>, vector<1x1x16x16xbf16>
    %316 = vector.shape_cast %315 : vector<1x1x16x16xbf16> to vector<16x16xbf16>
    %317 = arith.extf %316 : vector<16x16xbf16> to vector<16x16xf32>
    %318 = vector.extract_strided_slice %204 {offsets = [144, 0], sizes = [16, 16], strides = [1, 1]} : vector<192x16xf32> to vector<16x16xf32>
    %319 = arith.addf %318, %317 : vector<16x16xf32>
    %cst_195 = arith.constant 0.000000e+00 : f32
    %320 = vector.broadcast %cst_195 : f32 to vector<16x16xf32>
    %321 = arith.maximumf %319, %320 : vector<16x16xf32>
    %cst_196 = arith.constant 0.000000e+00 : f32
    %322 = vector.broadcast %cst_196 : f32 to vector<16x16xf32>
    %323 = arith.minimumf %319, %322 : vector<16x16xf32>
    %324 = vector.broadcast %0 : f32 to vector<16x16xf32>
    %325 = arith.mulf %324, %323 : vector<16x16xf32>
    %326 = arith.addf %321, %325 : vector<16x16xf32>
    %327 = arith.truncf %326 : vector<16x16xf32> to vector<16x16xbf16>
    %c0_197 = arith.constant 0 : index
    %c6 = arith.constant 6 : index
    %c0_198 = arith.constant 0 : index
    %c0_199 = arith.constant 0 : index
    %328 = vector.load %arg10[%c0_197, %c6, %c0_198, %c0_199] : memref<1x8x16x16xbf16, #tpu.memory_space<vmem>>, vector<1x1x16x16xbf16>
    %329 = vector.shape_cast %328 : vector<1x1x16x16xbf16> to vector<16x16xbf16>
    %330 = vector.shape_cast %327 : vector<16x16xbf16> to vector<1x1x16x16xbf16>
    tpu.vector_store %arg10[%c0_197, %c6, %c0_198, %c0_199], %330 {strides = array<i32>} : memref<1x8x16x16xbf16, #tpu.memory_space<vmem>>, vector<1x1x16x16xbf16>,
    %c7_i32_200 = arith.constant 7 : i32
    %331 = arith.addi %1, %c7_i32_200 : i32
    %c0_201 = arith.constant 0 : index
    %332 = arith.index_cast %331 : i32 to index
    %c0_202 = arith.constant 0 : index
    %c0_203 = arith.constant 0 : index
    %333 = vector.load %arg2[%c0_201, %332, %c0_202, %c0_203] : memref<1x16x16x16xbf16, #tpu.memory_space<vmem>>, vector<1x1x16x16xbf16>
    %334 = vector.shape_cast %333 : vector<1x1x16x16xbf16> to vector<16x16xbf16>
    %335 = arith.extf %334 : vector<16x16xbf16> to vector<16x16xf32>
    %336 = vector.extract_strided_slice %204 {offsets = [168, 0], sizes = [16, 16], strides = [1, 1]} : vector<192x16xf32> to vector<16x16xf32>
    %337 = arith.addf %336, %335 : vector<16x16xf32>
    %cst_204 = arith.constant 0.000000e+00 : f32
    %338 = vector.broadcast %cst_204 : f32 to vector<16x16xf32>
    %339 = arith.maximumf %337, %338 : vector<16x16xf32>
    %cst_205 = arith.constant 0.000000e+00 : f32
    %340 = vector.broadcast %cst_205 : f32 to vector<16x16xf32>
    %341 = arith.minimumf %337, %340 : vector<16x16xf32>
    %342 = vector.broadcast %0 : f32 to vector<16x16xf32>
    %343 = arith.mulf %342, %341 : vector<16x16xf32>
    %344 = arith.addf %339, %343 : vector<16x16xf32>
    %345 = arith.truncf %344 : vector<16x16xf32> to vector<16x16xbf16>
    %c0_206 = arith.constant 0 : index
    %c7 = arith.constant 7 : index
    %c0_207 = arith.constant 0 : index
    %c0_208 = arith.constant 0 : index
    %346 = vector.load %arg10[%c0_206, %c7, %c0_207, %c0_208] : memref<1x8x16x16xbf16, #tpu.memory_space<vmem>>, vector<1x1x16x16xbf16>
    %347 = vector.shape_cast %346 : vector<1x1x16x16xbf16> to vector<16x16xbf16>
    %348 = vector.shape_cast %345 : vector<16x16xbf16> to vector<1x1x16x16xbf16>
    tpu.vector_store %arg10[%c0_206, %c7, %c0_207, %c0_208], %348 {strides = array<i32>} : memref<1x8x16x16xbf16, #tpu.memory_space<vmem>>, vector<1x1x16x16xbf16>,
    return
  }
  func.func @transform_0(%arg0: i32, %arg1: i32) -> (i32, i32, i32, i32) {
    %c0_i32 = arith.constant 0 : i32
    %c0_i32_0 = arith.constant 0 : i32
    %c0_i32_1 = arith.constant 0 : i32
    %c0_i32_2 = arith.constant 0 : i32
    return %arg0, %c0_i32, %c0_i32_0, %c0_i32_1 : i32, i32, i32, i32
  }
  func.func @transform_1(%arg0: i32, %arg1: i32) -> (i32, i32) {
    %c0_i32 = arith.constant 0 : i32
    %c0_i32_0 = arith.constant 0 : i32
    %c0_i32_1 = arith.constant 0 : i32
    return %c0_i32, %c0_i32_0 : i32, i32
  }
  func.func @transform_2(%arg0: i32, %arg1: i32) -> (i32, i32) {
    %c0_i32 = arith.constant 0 : i32
    %c0_i32_0 = arith.constant 0 : i32
    %c0_i32_1 = arith.constant 0 : i32
    return %c0_i32, %c0_i32_0 : i32, i32
  }
  func.func @transform_3(%arg0: i32, %arg1: i32) -> (i32, i32) {
    %c0_i32 = arith.constant 0 : i32
    %c0_i32_0 = arith.constant 0 : i32
    %c0_i32_1 = arith.constant 0 : i32
    return %c0_i32, %c0_i32_0 : i32, i32
  }
  func.func @transform_4(%arg0: i32, %arg1: i32) -> (i32, i32) {
    %c0_i32 = arith.constant 0 : i32
    %c0_i32_0 = arith.constant 0 : i32
    %c0_i32_1 = arith.constant 0 : i32
    return %c0_i32, %c0_i32_0 : i32, i32
  }
  func.func @transform_5(%arg0: i32, %arg1: i32) -> (i32, i32) {
    %c0_i32 = arith.constant 0 : i32
    %c0_i32_0 = arith.constant 0 : i32
    %c0_i32_1 = arith.constant 0 : i32
    return %c0_i32, %c0_i32_0 : i32, i32
  }
  func.func @transform_6(%arg0: i32, %arg1: i32) -> (i32, i32) {
    %c0_i32 = arith.constant 0 : i32
    %c0_i32_0 = arith.constant 0 : i32
    %c0_i32_1 = arith.constant 0 : i32
    return %c0_i32, %c0_i32_0 : i32, i32
  }
  func.func @transform_7(%arg0: i32, %arg1: i32) -> (i32, i32) {
    %c0_i32 = arith.constant 0 : i32
    %c0_i32_0 = arith.constant 0 : i32
    %c0_i32_1 = arith.constant 0 : i32
    return %c0_i32, %c0_i32_0 : i32, i32
  }
  func.func @transform_8(%arg0: i32, %arg1: i32) -> (i32, i32, i32, i32) {
    %c0_i32 = arith.constant 0 : i32
    %c0_i32_0 = arith.constant 0 : i32
    %c0_i32_1 = arith.constant 0 : i32
    return %arg0, %arg1, %c0_i32, %c0_i32_0 : i32, i32, i32, i32
  }
}

</mosaic_0001>

<bundles_post_ra>
// kernel: bottleneck_forward.1
= control target key start
LH: loop header
LB: loop body
LE: loop exit
PB: predicated region body
PF: predicated region fallthrough
CT: control target
= control target key end

     0   :  { %s4895_s29 = smov 0   ;;  %s4897_s30 = smov 0   ;;  %s5771_s0 = inlined_call_operand.vmem [shape: bf16[2,16,16,16], index: 0, kind: input, shape index: {}]   ;;  %s5772_s1 = inlined_call_operand.vmem [shape: bf16[16,4], index: 1, kind: input, shape index: {}]   ;;  %s5773_s2 = inlined_call_operand.vmem [shape: f32[1,4], index: 2, kind: input, shape index: {}]   ;;  %s5774_s3 = inlined_call_operand.vmem [shape: bf16[36,4], index: 3, kind: input, shape index: {}]   ;;  %s5775_s4 = inlined_call_operand.vmem [shape: f32[1,4], index: 4, kind: input, shape index: {}]   ;;  %s5776_s5 = inlined_call_operand.vmem [shape: bf16[4,16], index: 5, kind: input, shape index: {}]   ;;  %s5777_s6 = inlined_call_operand.vmem [shape: f32[1,16], index: 6, kind: input, shape index: {}]   ;;  %s5778_s7 = inlined_call_operand.<no memory space> [shape: f32[1,1], index: 7, kind: input, shape index: {}]   ;;  %s5779_s8 = inlined_call_operand.vmem [shape: bf16[2,16,16,16], index: 8, kind: output, shape index: {}]  }
   0x1   :  { %13 = sst [smem:[#allocation3]] %s5778_s7  ;;  %s4899_s9 = smov 0  }
   0x2   :  { %s4901_s10 = smov 0   ;;  %s4903_s11 = smov 0  }
   0x3 LB: > { %s28_s7 = sadd.s32 1, %s4836_s9  ;;  %s31_s12 = sadd.s32 1, %s4840_s10  ;;  %s4844_s11 = sphi %s4903_s11, %s19_s11   ;;  %s4840_s10 = sphi %s4901_s10, %s5783_s10   ;;  %s4836_s9 = sphi %s4899_s9, %s5782_s9   ;;  %s4832_s30 = sphi %s4897_s30, %s5781_s30   ;;  %s4828_s29 = sphi %s4895_s29, %s5780_s29  }
   0x4   : > { %p29_p0 = scmp.ge.s32.totalorder %s28_s7, 2  ;;  %p3804_p1 = scmp.ge.s32.totalorder %s4844_s11, 1 }
   0x5   : > { %p277_p2 = scmp.lt.s32.totalorder %s4844_s11, 5 }
   0x6   : > { %s5785_s7 = smov (%p29_p0, %s28_s7), 0  ;;  %s5787_s12 = smov (!%p29_p0, %s31_s12), %s4840_s10 }
   0x7   : > { %p278_p3 = pnand %p3804_p1, %p277_p2  ;;  %p33_p4 = scmp.ge.s32.totalorder %s5787_s12, 2 }
   0x8   : > { %p316_p5 = scmp.lt.s32.totalorder (!%p278_p3), %s4832_s30, 1  ;;  %s4928_s13 = sshll.u32 (!%p278_p3), %s4828_s29, 3 }
   0x9   : > { %s5789_s12 = smov (%p33_p4, %s5787_s12), 0  ;;  %281 = sbr.rel (%p278_p3) target bundleno = 1291 (0x50b), region = 52 }
   0xa   : > { %p324_p6 = scmp.lt.s32.totalorder (!%p278_p3), %s4928_s13, 15  ;;  %s4931_s14 = sld [smem:[#allocation3]] (!%p278_p3) }
   0xb   : > { %p3812_p7 = scmp.le.s32.totalorder (!%p278_p3), %s4828_s29, 0 }
   0xe   : > { %vm335_vm0 = vcmask 27648   ;;  %s5791_s30 = smov (!%p316_p5, %s4832_s30), 1  ;;  %v4846_v0 = vmov 0  }
   0xf   : > { %337 = vst.msk [vmem:[#allocation2 + $0x4] sm:$0xf] %vm335_vm0, %v4846_v0  ;;  %s325_s15 = scalar_select %p324_p6, %s4928_s13, 15 }
  0x10   : > { %338 = vst.msk [vmem:[#allocation2 + $0x8] sm:$0xf] %vm335_vm0, %v4846_v0  ;;  %s4235_s16 = sshll.u32 %s5791_s30, 7  ;;  %s3809_s17 = sshll.u32 %s5791_s30, 5 }
  0x11   : > { %339 = vst.msk [vmem:[#allocation2 + $0xc] sm:$0xf] %vm335_vm0, %v4846_v0  ;;  %s4940_s20 = scalar_lea.vmem %s5771_s0, %s4235_s16  ;;  %s3808_s21 = sshll.u32 %s325_s15, 1 }
  0x12   : > { %340 = vst.msk [vmem:[#allocation2 + $0x10] sm:$0xf] %vm335_vm0, %v4846_v0  ;;  %s328_s22 = sadd.s32 %s3809_s17, %s3808_s21  ;;  %s3813_s30 = sadd.s32 (!%p3812_p7), 4294967295, %s4928_s13 }
  0x13   : > { %341 = vst.msk [vmem:[#allocation2 + $0x14] sm:$0xf] %vm335_vm0, %v4846_v0  ;;  %s3810_s23 = sshll.u32 %s328_s22, 2  ;;  %s4236_s15 = sshll.u32 (!%p3812_p7), %s3813_s30, 3 }
  0x14   : > { %342 = vst.msk [vmem:[#allocation2 + $0x18] sm:$0xf] %vm335_vm0, %v4846_v0  ;;  %s4948_s26 = scalar_lea.vmem %s5779_s8, %s3810_s23  ;;  %s376_s16 = scalar_lea.vmem (!%p3812_p7), %s4940_s20, %s4236_s15 }
  0x15   : > { %343 = vst.msk [vmem:[#allocation2 + $0x1c] sm:$0xf] %vm335_vm0, %v4846_v0 }
  0x16   : > { %344 = vst.msk [vmem:[#allocation2 + $0x20] sm:$0xf] %vm335_vm0, %v4846_v0 }
  0x17   : > { %345 = vst.msk [vmem:[#allocation2 + $0x24] sm:$0xf] %vm335_vm0, %v4846_v0 }
  0x18   : > { %346 = vst.msk [vmem:[#allocation2 + $0x28] sm:$0xf] %vm335_vm0, %v4846_v0 }
  0x19   : > { %347 = vst.msk [vmem:[#allocation2 + $0x2c] sm:$0xf] %vm335_vm0, %v4846_v0 }
  0x1a   : > { %348 = vst.msk [vmem:[#allocation2 + $0x30] sm:$0xf] %vm335_vm0, %v4846_v0 }
  0x1b   : > { %349 = vst.msk [vmem:[#allocation2 + $0x34] sm:$0xf] %vm335_vm0, %v4846_v0 }
  0x1c   : > { %350 = vst.msk [vmem:[#allocation2 + $0x38] sm:$0xf] %vm335_vm0, %v4846_v0 }
  0x1d   : > { %351 = vst.msk [vmem:[#allocation2 + $0x3c] sm:$0xf] %vm335_vm0, %v4846_v0 }
  0x1e   : > { %352 = vst.msk [vmem:[#allocation2 + $0x40] sm:$0xf] %vm335_vm0, %v4846_v0 }
  0x1f   : > { %353 = vst.msk [vmem:[#allocation2 + $0x44] sm:$0xf] %vm335_vm0, %v4846_v0 }
  0x20   : > { %354 = vst.msk [vmem:[#allocation2 + $0x48] sm:$0xf] %vm335_vm0, %v4846_v0 }
  0x21   : > { %355 = vst.msk [vmem:[#allocation2 + $0x4c] sm:$0xf] %vm335_vm0, %v4846_v0 }
  0x22   : > { %356 = vst.msk [vmem:[#allocation2 + $0x50] sm:$0xf] %vm335_vm0, %v4846_v0 }
  0x23   : > { %357 = vst.msk [vmem:[#allocation2 + $0x54] sm:$0xf] %vm335_vm0, %v4846_v0 }
  0x24   : > { %358 = vst.msk [vmem:[#allocation2 + $0x58] sm:$0xf] %vm335_vm0, %v4846_v0 }
  0x25   : > { %359 = vst.msk [vmem:[#allocation2 + $0x5c] sm:$0xf] %vm335_vm0, %v4846_v0 }
  0x26   : > { %360 = vst.msk [vmem:[#allocation2 + $0x60] sm:$0xf] %vm335_vm0, %v4846_v0 }
  0x27   : > { %361 = vst.msk [vmem:[#allocation2 + $0x64] sm:$0xf] %vm335_vm0, %v4846_v0 }
  0x28   : > { %362 = vst.msk [vmem:[#allocation2 + $0x68] sm:$0xf] %vm335_vm0, %v4846_v0 }
  0x29   : > { %363 = vst.msk [vmem:[#allocation2 + $0x6c] sm:$0xf] %vm335_vm0, %v4846_v0 }
  0x2a   : > { %364 = vst.msk [vmem:[#allocation2 + $0x70] sm:$0xf] %vm335_vm0, %v4846_v0  ;;  %372 = sbr.rel (%p3812_p7) target bundleno = 196 (0xc4), region = 56 }
  0x2b   : > { %365 = vst.msk [vmem:[#allocation2 + $0x74] sm:$0xf] %vm335_vm0, %v4846_v0 }
  0x2c   : > { %366 = vst.msk [vmem:[#allocation2 + $0x78] sm:$0xf] %vm335_vm0, %v4846_v0 }
  0x2d   : > { %367 = vst.msk [vmem:[#allocation2 + $0x7c] sm:$0xf] %vm335_vm0, %v4846_v0 }
  0x2e   : > { %368 = vst.msk [vmem:[#allocation2 + $0x80] sm:$0xf] %vm335_vm0, %v4846_v0 }
  0x2f   : > { %v4238_v1 = vld [vmem:[%s5772_s1] sm:$0xff]  ;;  %vm396_vm1 = vcmask 130048   ;;  %v418_v6 = vstv %s4931_s14 }
  0x30   : > { %407 = vmatpush.bf16.msra.mxu0 %v4238_v1  ;;  %v4237_v2 = vld [vmem:[%s376_s16] sm:$0xff] }
  0x31   : > { %v4794_v3 = vld [vmem:[%s5773_s2] ss:$0 sm:$0xff] }
  0x33   : > { %3824 = vmatmul.msk.bf16.vlgmr.msra.gmra.mxu0 %vm396_vm1, %v4237_v2 }
  0xb0   : > { %v409_v4 = vpop.f32.mrf.mxu0 }
  0xb1   : > { %v410_v5 = vadd.f32 %v4794_v3, %v409_v4 }
  0xb3   : > { %v416_v7 = vmin.f32 %v410_v5, 0.0  ;;  %v414_v8 = vmax.f32 %v410_v5, 0.0 }
  0xb5   : > { %v419_v9 = vmul.f32 %v418_v6, %v416_v7 }
  0xb7   : > { %v421_v10 = vadd.f32 %v419_v9, %v414_v8 }
  0xb8   : > { %v411_v11 = vpop.f32.mrf.mxu0 }
  0xb9   : > { %v423_v12 = vpack.c.bf16 %v421_v10, %v421_v10  ;;  %v412_v13 = vadd.f32 %v4794_v3, %v411_v11 }
  0xbb   : > { %425 = vst.msk [vmem:[#allocation2 + $0x8] sm:$0xf] %vm335_vm0, %v423_v12  ;;  %v417_v14 = vmin.f32 %v412_v13, 0.0  ;;  %v415_v15 = vmax.f32 %v412_v13, 0.0 }
  0xbd   : > { %v420_v16 = vmul.f32 %v418_v6, %v417_v14 }
  0xbf   : > { %v422_v17 = vadd.f32 %v420_v16, %v415_v15 }
  0xc1   : > { %v424_v18 = vpack.c.bf16 %v422_v17, %v422_v17 }
  0xc3   : > { %426 = vst.msk [vmem:[#allocation2 + $0xc] sm:$0xf] %vm335_vm0, %v424_v18 }
  0xc4 PF: > { %v4242_v19 = vld [vmem:[%s5772_s1] sm:$0xff]  ;;  %s4240_s25 = sshll.u32 %s4828_s29, 6  ;;  %vm449_vm2 = vcmask 130048   ;;  %v5039_v41 = vstv %s4931_s14  ;;  %p3927_p8 = scmp.ge.s32.totalorder %s4828_s29, 1 }
  0xc5   : > { %v4245_v20 = vld [vmem:[%s5772_s1] sm:$0xff]  ;;  %s5002_s30 = scalar_lea.vmem %s4940_s20, %s4240_s25  ;;  %460 = vmatpush.bf16.msra.mxu0 %v4242_v19 }
  0xc6   : > { %v4248_v21 = vld [vmem:[%s5772_s1] sm:$0xff]  ;;  %513 = vmatpush.bf16.msra.mxu1 %v4245_v20  ;;  %v4244_v26 = vld [vmem:[%s5002_s30 + $0x8] sm:$0xff]  ;;  %v4247_v27 = vld [vmem:[%s5002_s30 + $0x10] sm:$0xff] }
  0xc7   : > { %v4251_v22 = vld [vmem:[%s5772_s1] sm:$0xff]  ;;  %565 = vmatpush.bf16.msra.mxu2 %v4248_v21  ;;  %v4250_v28 = vld [vmem:[%s5002_s30 + $0x18] sm:$0xff]  ;;  %v4256_v32 = vld [vmem:[%s5002_s30 + $0x28] sm:$0xff] }
  0xc8   : > { %v4260_v23 = vld [vmem:[%s5772_s1] sm:$0xff]  ;;  %617 = vmatpush.bf16.msra.mxu3 %v4251_v22  ;;  %v4259_v33 = vld [vmem:[%s5002_s30 + $0x30] sm:$0xff]  ;;  %v4262_v34 = vld [vmem:[%s5002_s30 + $0x38] sm:$0xff] }
  0xc9   : > { %v4263_v24 = vld [vmem:[%s5772_s1] sm:$0xff]  ;;  %3848 = vmatmul.msk.bf16.vlgmr.msra.gmra.mxu1 %vm449_vm2, %v4244_v26 }
  0xca   : > { %v4241_v25 = vld [vmem:[%s5002_s30] sm:$0xff]  ;;  %3861 = vmatmul.msk.bf16.vlgmr.msra.gmra.mxu2 %vm449_vm2, %v4247_v27 }
  0xcb   : > { %v4254_v29 = vld [vmem:[%s5772_s1] sm:$0xff]  ;;  %773 = vmatpush.bf16.msrb.mxu2 %v4260_v23  ;;  %3835 = vmatmul.msk.bf16.vlgmr.msra.gmra.mxu0 %vm449_vm2, %v4241_v25 }
  0xcc   : > { %v4257_v30 = vld [vmem:[%s5772_s1] sm:$0xff]  ;;  %825 = vmatpush.bf16.msrb.mxu3 %v4263_v24  ;;  %669 = vmatpush.bf16.msrb.mxu0 %v4254_v29 }
  0xcd   : > { %3874 = vmatmul.msk.bf16.vlgmr.msra.gmra.mxu3 %vm449_vm2, %v4250_v28  ;;  %721 = vmatpush.bf16.msrb.mxu1 %v4257_v30  ;;  %v4253_v31 = vld [vmem:[%s5002_s30 + $0x20] sm:$0xff] }
  0xce   : > { %v4795_v35 = vld [vmem:[%s5773_s2] ss:$0 sm:$0xff] }
  0xcf   : > { %v4796_v36 = vld [vmem:[%s5773_s2] ss:$0 sm:$0xff] }
  0xd0   : > { %v4797_v46 = vld [vmem:[%s5773_s2] ss:$0 sm:$0xff] }
  0xd1   : > { %v4798_v47 = vld [vmem:[%s5773_s2] ss:$0 sm:$0xff] }
  0xd2   : > { %v4799_v10 = vld [vmem:[%s5773_s2] ss:$0 sm:$0xff] }
  0xd3   : > { %v4800_v11 = vld [vmem:[%s5773_s2] ss:$0 sm:$0xff] }
  0xd4   : > { %v4801_v30 = vld [vmem:[%s5773_s2] ss:$0 sm:$0xff] }
  0xd9   : > { %3900 = vmatmul.msk.bf16.vlgmr.msrb.gmra.mxu1 %vm449_vm2, %v4256_v32 }
  0xda   : > { %3913 = vmatmul.msk.bf16.vlgmr.msrb.gmra.mxu2 %vm449_vm2, %v4259_v33 }
  0xdb   : > { %3887 = vmatmul.msk.bf16.vlgmr.msrb.gmra.mxu0 %vm449_vm2, %v4253_v31 }
  0xdd   : > { %3926 = vmatmul.msk.bf16.vlgmr.msrb.gmra.mxu3 %vm449_vm2, %v4262_v34 }
 0x146   : > { %v515_v38 = vpop.f32.mrf.mxu1 }
 0x147   : > { %v516_v40 = vadd.f32 %v4796_v36, %v515_v38 }
 0x148   : > { %v462_v37 = vpop.f32.mrf.mxu0 }
 0x149   : > { %v463_v39 = vadd.f32 %v4795_v35, %v462_v37  ;;  %v520_v44 = vmax.f32 %v516_v40, 0.0  ;;  %v522_v45 = vmin.f32 %v516_v40, 0.0 }
 0x14b   : > { %v467_v42 = vmax.f32 %v463_v39, 0.0  ;;  %v469_v43 = vmin.f32 %v463_v39, 0.0  ;;  %v524_v49 = vmul.f32 %v522_v45, %v5039_v41  ;;  %v4802_v39 = vld [vmem:[%s5773_s2] ss:$0 sm:$0xff] }
 0x14d   : > { %v472_v48 = vmul.f32 %v5039_v41, %v469_v43  ;;  %v526_v51 = vadd.f32 %v524_v49, %v520_v44  ;;  %v567_v52 = vpop.f32.mrf.mxu2 }
 0x14e   : > { %v568_v54 = vadd.f32 %v4797_v46, %v567_v52  ;;  %v517_v57 = vpop.f32.mrf.mxu1 }
 0x14f   : > { %v474_v50 = vadd.f32 %v472_v48, %v467_v42  ;;  %v528_v59 = vpack.c.bf16 %v526_v51, %v526_v51  ;;  %v518_v61 = vadd.f32 %v4796_v36, %v517_v57 }
 0x150   : > { %v619_v53 = vpop.f32.mrf.mxu3  ;;  %v464_v56 = vpop.f32.mrf.mxu0  ;;  %v574_v62 = vmin.f32 %v568_v54, 0.0  ;;  %v572_v2 = vmax.f32 %v568_v54, 0.0 }
 0x151   : > { %v620_v55 = vadd.f32 %v4798_v47, %v619_v53  ;;  %v476_v58 = vpack.c.bf16 %v474_v50, %v474_v50  ;;  %v465_v60 = vadd.f32 %v4795_v35, %v464_v56  ;;  %v523_v1 = vmin.f32 %v518_v61, 0.0  ;;  %530 = vst.msk [vmem:[#allocation2 + $0x20] sm:$0xf] %vm335_vm0, %v528_v59 }
 0x152   : > { %v576_v3 = vmul.f32 %v574_v62, %v5039_v41  ;;  %v521_v8 = vmax.f32 %v518_v61, 0.0 }
 0x153   : > { %v626_v63 = vmin.f32 %v620_v55, 0.0  ;;  %478 = vst.msk [vmem:[#allocation2 + $0x14] sm:$0xf] %vm335_vm0, %v476_v58  ;;  %v470_v0 = vmin.f32 %v465_v60, 0.0  ;;  %v624_v4 = vmax.f32 %v620_v55, 0.0  ;;  %v468_v6 = vmax.f32 %v465_v60, 0.0 }
 0x154   : > { %v525_v9 = vmul.f32 %v523_v1, %v5039_v41  ;;  %v578_v12 = vadd.f32 %v576_v3, %v572_v2 }
 0x155   : > { %v628_v5 = vmul.f32 %v626_v63, %v5039_v41  ;;  %v473_v7 = vmul.f32 %v5039_v41, %v470_v0  ;;  %v569_v16 = vpop.f32.mrf.mxu2 }
 0x156   : > { %v527_v15 = vadd.f32 %v525_v9, %v521_v8  ;;  %v580_v18 = vpack.c.bf16 %v578_v12, %v578_v12  ;;  %v570_v20 = vadd.f32 %v4797_v46, %v569_v16  ;;  %v723_v23 = vpop.f32.mrf.mxu1 }
 0x157   : > { %v630_v13 = vadd.f32 %v628_v5, %v624_v4  ;;  %v475_v14 = vadd.f32 %v473_v7, %v468_v6  ;;  %v724_v27 = vadd.f32 %v4800_v11, %v723_v23 }
 0x158   : > { %v621_v17 = vpop.f32.mrf.mxu3  ;;  %v671_v22 = vpop.f32.mrf.mxu0  ;;  %v529_v25 = vpack.c.bf16 %v527_v15, %v527_v15  ;;  %582 = vst.msk [vmem:[#allocation2 + $0x2c] sm:$0xf] %vm335_vm0, %v580_v18  ;;  %v575_v28 = vmin.f32 %v570_v20, 0.0  ;;  %v573_v35 = vmax.f32 %v570_v20, 0.0 }
 0x159   : > { %v632_v19 = vpack.c.bf16 %v630_v13, %v630_v13  ;;  %v622_v21 = vadd.f32 %v4798_v47, %v621_v17  ;;  %v477_v24 = vpack.c.bf16 %v475_v14, %v475_v14  ;;  %v672_v26 = vadd.f32 %v4799_v10, %v671_v22 }
 0x15a   : > { %v728_v33 = vmax.f32 %v724_v27, 0.0  ;;  %v730_v34 = vmin.f32 %v724_v27, 0.0  ;;  %v577_v36 = vmul.f32 %v575_v28, %v5039_v41  ;;  %531 = vst.msk [vmem:[#allocation2 + $0x24] sm:$0xf] %vm335_vm0, %v529_v25 }
 0x15b   : > { %v627_v29 = vmin.f32 %v622_v21, 0.0  ;;  %634 = vst.msk [vmem:[#allocation2 + $0x38] sm:$0xf] %vm335_vm0, %v632_v19  ;;  %v676_v31 = vmax.f32 %v672_v26, 0.0  ;;  %v678_v32 = vmin.f32 %v672_v26, 0.0  ;;  %v625_v37 = vmax.f32 %v622_v21, 0.0 }
 0x15c   : > { %479 = vst.msk [vmem:[#allocation2 + $0x18] sm:$0xf] %vm335_vm0, %v477_v24  ;;  %v732_v42 = vmul.f32 %v730_v34, %v5039_v41  ;;  %v579_v43 = vadd.f32 %v577_v36, %v573_v35 }
 0x15d   : > { %v629_v38 = vmul.f32 %v627_v29, %v5039_v41  ;;  %v680_v40 = vmul.f32 %v678_v32, %v5039_v41  ;;  %v775_v47 = vpop.f32.mrf.mxu2 }
 0x15e   : > { %v734_v46 = vadd.f32 %v732_v42, %v728_v33  ;;  %v581_v49 = vpack.c.bf16 %v579_v43, %v579_v43  ;;  %v776_v51 = vadd.f32 %v4801_v30, %v775_v47  ;;  %v725_v54 = vpop.f32.mrf.mxu1 }
 0x15f   : > { %v631_v44 = vadd.f32 %v629_v38, %v625_v37  ;;  %v682_v45 = vadd.f32 %v680_v40, %v676_v31  ;;  %v726_v58 = vadd.f32 %v4800_v11, %v725_v54 }
 0x160   : > { %v827_v48 = vpop.f32.mrf.mxu3  ;;  %v673_v53 = vpop.f32.mrf.mxu0  ;;  %v736_v56 = vpack.c.bf16 %v734_v46, %v734_v46  ;;  %583 = vst.msk [vmem:[#allocation2 + $0x30] sm:$0xf] %vm335_vm0, %v581_v49  ;;  %v782_v59 = vmin.f32 %v776_v51, 0.0  ;;  %v780_v63 = vmax.f32 %v776_v51, 0.0 }
 0x161   : > { %v633_v50 = vpack.c.bf16 %v631_v44, %v631_v44  ;;  %v828_v52 = vadd.f32 %v4802_v39, %v827_v48  ;;  %v684_v55 = vpack.c.bf16 %v682_v45, %v682_v45  ;;  %v674_v57 = vadd.f32 %v4799_v10, %v673_v53 }
 0x162   : > { %v731_v62 = vmin.f32 %v726_v58, 0.0  ;;  %v784_v0 = vmul.f32 %v782_v59, %v5039_v41  ;;  %738 = vst.msk [vmem:[#allocation2 + $0x50] sm:$0xf] %vm335_vm0, %v736_v56  ;;  %v729_v5 = vmax.f32 %v726_v58, 0.0 }
 0x163   : > { %v834_v60 = vmin.f32 %v828_v52, 0.0  ;;  %635 = vst.msk [vmem:[#allocation2 + $0x3c] sm:$0xf] %vm335_vm0, %v633_v50  ;;  %v679_v61 = vmin.f32 %v674_v57, 0.0  ;;  %v832_v1 = vmax.f32 %v828_v52, 0.0  ;;  %v677_v3 = vmax.f32 %v674_v57, 0.0 }
 0x164   : > { %686 = vst.msk [vmem:[#allocation2 + $0x44] sm:$0xf] %vm335_vm0, %v684_v55  ;;  %v733_v6 = vmul.f32 %v731_v62, %v5039_v41  ;;  %v786_v7 = vadd.f32 %v784_v0, %v780_v63 }
 0x165   : > { %v836_v2 = vmul.f32 %v834_v60, %v5039_v41  ;;  %v681_v4 = vmul.f32 %v679_v61, %v5039_v41  ;;  %v777_v11 = vpop.f32.mrf.mxu2 }
 0x166   : > { %v735_v10 = vadd.f32 %v733_v6, %v729_v5  ;;  %v788_v13 = vpack.c.bf16 %v786_v7, %v786_v7  ;;  %v778_v15 = vadd.f32 %v4801_v30, %v777_v11 }
 0x167   : > { %v838_v8 = vadd.f32 %v836_v2, %v832_v1  ;;  %v683_v9 = vadd.f32 %v681_v4, %v677_v3 }
 0x168   : > { %v829_v12 = vpop.f32.mrf.mxu3  ;;  %v737_v18 = vpack.c.bf16 %v735_v10, %v735_v10  ;;  %790 = vst.msk [vmem:[#allocation2 + $0x5c] sm:$0xf] %vm335_vm0, %v788_v13  ;;  %v783_v19 = vmin.f32 %v778_v15, 0.0  ;;  %v781_v21 = vmax.f32 %v778_v15, 0.0 }
 0x169   : > { %v840_v14 = vpack.c.bf16 %v838_v8, %v838_v8  ;;  %v830_v16 = vadd.f32 %v4802_v39, %v829_v12  ;;  %v685_v17 = vpack.c.bf16 %v683_v9, %v683_v9 }
 0x16a   : > { %v785_v22 = vmul.f32 %v783_v19, %v5039_v41  ;;  %739 = vst.msk [vmem:[#allocation2 + $0x54] sm:$0xf] %vm335_vm0, %v737_v18 }
 0x16b   : > { %v835_v20 = vmin.f32 %v830_v16, 0.0  ;;  %842 = vst.msk [vmem:[#allocation2 + $0x68] sm:$0xf] %vm335_vm0, %v840_v14  ;;  %v833_v23 = vmax.f32 %v830_v16, 0.0 }
 0x16c   : > { %687 = vst.msk [vmem:[#allocation2 + $0x48] sm:$0xf] %vm335_vm0, %v685_v17  ;;  %v787_v25 = vadd.f32 %v785_v22, %v781_v21 }
 0x16d   : > { %v837_v24 = vmul.f32 %v835_v20, %v5039_v41 }
 0x16e   : > { %v789_v27 = vpack.c.bf16 %v787_v25, %v787_v25 }
 0x16f   : > { %v839_v26 = vadd.f32 %v837_v24, %v833_v23  ;;  %847 = sbr.rel (%p3927_p8) target bundleno = 521 (0x209), region = 60 }
 0x170   : > { %791 = vst.msk [vmem:[#allocation2 + $0x60] sm:$0xf] %vm335_vm0, %v789_v27 }
 0x171   : > { %v841_v28 = vpack.c.bf16 %v839_v26, %v839_v26 }
 0x173   : > { %843 = vst.msk [vmem:[#allocation2 + $0x6c] sm:$0xf] %vm335_vm0, %v841_v28 }
 0x174   : > { %v4266_v29 = vld [vmem:[%s5772_s1] sm:$0xff] }
 0x175   : > { %v4265_v30 = vld [vmem:[%s5002_s30 + $0x40] sm:$0xff]  ;;  %881 = vmatpush.bf16.msra.mxu0 %v4266_v29 }
 0x176   : > { %v4803_v31 = vld [vmem:[%s5773_s2] ss:$0 sm:$0xff] }
 0x178   : > { %3940 = vmatmul.msk.bf16.vlgmr.msra.gmra.mxu0 %vm449_vm2, %v4265_v30 }
 0x1f5   : > { %v883_v32 = vpop.f32.mrf.mxu0 }
 0x1f6   : > { %v884_v33 = vadd.f32 %v4803_v31, %v883_v32 }
 0x1f8   : > { %v890_v34 = vmin.f32 %v884_v33, 0.0  ;;  %v888_v35 = vmax.f32 %v884_v33, 0.0 }
 0x1fa   : > { %v892_v36 = vmul.f32 %v890_v34, %v5039_v41 }
 0x1fc   : > { %v894_v37 = vadd.f32 %v892_v36, %v888_v35 }
 0x1fd   : > { %v885_v38 = vpop.f32.mrf.mxu0 }
 0x1fe   : > { %v896_v39 = vpack.c.bf16 %v894_v37, %v894_v37  ;;  %v886_v40 = vadd.f32 %v4803_v31, %v885_v38 }
 0x200   : > { %898 = vst.msk [vmem:[#allocation2 + $0x74] sm:$0xf] %vm335_vm0, %v896_v39  ;;  %v891_v42 = vmin.f32 %v886_v40, 0.0  ;;  %v889_v43 = vmax.f32 %v886_v40, 0.0 }
 0x202   : > { %v893_v44 = vmul.f32 %v891_v42, %v5039_v41 }
 0x204   : > { %v895_v45 = vadd.f32 %v893_v44, %v889_v43 }
 0x206   : > { %v897_v46 = vpack.c.bf16 %v895_v45, %v895_v45 }
 0x208   : > { %899 = vst.msk [vmem:[#allocation2 + $0x78] sm:$0xf] %vm335_vm0, %v897_v46 }
 0x209 PF: > { %v925_v47 = vld [vmem:[%s5774_s3] sm:$0x3]  ;;  %vm1028_vm3 = vcmask 1041408   ;;  %v926_v48 = vld [vmem:[%s5774_s3] sm:$0xc]  ;;  %v4639_v49 = vld [vmem:[#allocation2 + $0x34] sm:$0xff]  }
 0x20a   : > { %v1270_v50 = vsel %vm1028_vm3, %v925_v47, 0  ;;  %v988_v51 = vunpack.c.l.b16 %v926_v48  ;;  %v4641_v52 = vld [vmem:[#allocation2 + $0x3c] sm:$0xff]   ;;  %vm1116_vm4 = vsmask.f32 4352  ;;  %vm991_vm5 = vcmask 31744   ;;  %v4629_v56 = vld [vmem:[#allocation2 + $0xc] sm:$0xff]  }
 0x20b   : > { %4729 = vmatpush.bf16.msra.mxu3 %v1270_v50  ;;  %1279 = vmatpush.bf16.msra.mxu1 %v1270_v50  ;;  %v1171_v53 = vshrl.u32 %v4639_v49, 16  ;;  %v1174_v54 = vshll.u32 %v4639_v49, 16  ;;  %v1366_v55 = vld [vmem:[%s5774_s3 + $0x4] sm:$0x3]  ;;  %v1180_v58 = vshrl.u32 %v4641_v52, 16  ;;  %v1183_v59 = vshll.u32 %v4641_v52, 16 }
 0x20c   : > { %v989_v57 = vpack.c.b16 %v988_v51, %v988_v51  ;;  %v1568_v60 = vsel %vm1028_vm3, %v1366_v55, 0  ;;  %v4489_v61 = vld [vmem:[#allocation2 + $0x4] sm:$0x8]  ;;  %v4627_v0 = vld [vmem:[#allocation2 + $0x4] sm:$0xf0]   ;;  %v1126_v1 = vshrl.u32 %v4629_v56, 16 }
 0x20d   : > { %v1173_v62 = vrot.slane %v1171_v53, 3  ;;  %v1176_v63 = vrot.slane %v1174_v54, 4  ;;  %v1129_v2 = vshll.u32 %v4629_v56, 16  ;;  %v1182_v4 = vrot.slane %v1180_v58, 3  ;;  %v1688_v7 = vld [vmem:[%s5774_s3 + $0x4] sm:$0xc] }
 0x20e   : > { %v990_v3 = vrot.slane %v989_v57, 2  ;;  %v1185_v5 = vrot.slane %v1183_v59, 4  ;;  %v4490_v6 = vor.u32 %v4627_v0, %v4489_v61  ;;  %v1128_v9 = vrot.slane %v1126_v1, 3  ;;  %v2004_v12 = vld [vmem:[%s5774_s3 + $0x8] sm:$0x3]  ;;  %v5124_v15 = vld [vmem:[#allocation2 + $0x38] sm:$0xff]  }
 0x20f   : > { %v5118_v8 = vor.u32 %v1176_v63, %v1173_v62  ;;  %v1131_v10 = vrot.slane %v1129_v2, 4  ;;  %v1869_v11 = vunpack.c.l.b16 %v1688_v7  ;;  %v4643_v18 = vld [vmem:[#allocation2 + $0x44] sm:$0xff]   ;;  %v2054_v21 = vsel %vm1028_vm3, %v2004_v12, 0  ;;  %v4631_v30 = vld [vmem:[#allocation2 + $0x14] sm:$0xff]   ;;  %v4645_v43 = vld [vmem:[#allocation2 + $0x4c] sm:$0xff]  }
 0x210   : > { %v1030_v13 = vsel %vm1028_vm3, %v990_v3, 0  ;;  %v1186_v14 = vor.u32 %v1185_v5, %v1182_v4  ;;  %v1118_v16 = vshrl.u32 %v4490_v6, 16  ;;  %v1121_v17 = vshll.u32 %v4490_v6, 16  ;;  %v4475_v19 = vld [vmem:[#allocation2 + $0x8] sm:$0xff]   ;;  %v5137_v44 = vld [vmem:[#allocation2 + $0x40] sm:$0xff]   ;;  %v4476_v45 = vld [vmem:[#allocation2 + $0x10] sm:$0xff]  }
 0x211   : > { %4728 = vmatpush.bf16.msra.mxu2 %v1030_v13  ;;  %1039 = vmatpush.bf16.msra.mxu0 %v1030_v13  ;;  %v1870_v20 = vpack.c.b16 %v1869_v11, %v1869_v11  ;;  %v1132_v25 = vor.u32 %v1131_v10, %v1128_v9  ;;  %v1189_v28 = vshrl.u32 %v4643_v18, 16  ;;  %v1192_v29 = vshll.u32 %v4643_v18, 16  ;;  %v4633_v49 = vld [vmem:[#allocation2 + $0x1c] sm:$0xff]   ;;  %v4647_v59 = vld [vmem:[#allocation2 + $0x54] sm:$0xff]   ;;  %v4635_v1 = vld [vmem:[#allocation2 + $0x24] sm:$0xff]  }
 0x212   : > { %v1187_v22 = vsel %vm1116_vm4, %v5118_v8, %v1186_v14  ;;  %v1120_v23 = vrot.slane %v1118_v16, 3  ;;  %v1123_v24 = vrot.slane %v1121_v17, 4  ;;  %v1135_v35 = vshrl.u32 %v4631_v30, 16  ;;  %v5148_v61 = vld [vmem:[#allocation2 + $0x18] sm:$0xff]   ;;  %v5158_v13 = vld [vmem:[#allocation2 + $0x50] sm:$0xff]  }
 0x213   : > { %3959 = vmatmul.msk.bf16.vlgmr.msra.gmra.mxu3 %vm991_vm5, %v1187_v22  ;;  %v1871_v26 = vrot.slane %v1870_v20, 2  ;;  %v1191_v33 = vrot.slane %v1189_v28, 3  ;;  %v1194_v34 = vrot.slane %v1192_v29, 4  ;;  %v1138_v36 = vshll.u32 %v4631_v30, 16  ;;  %v4648_v12 = vld [vmem:[#allocation2 + $0x5c] sm:$0xff]  }
 0x214   : > { %3947 = vmatmul.msk.bf16.vlgmr.msra.gmra.mxu2 %vm991_vm5, %v5124_v15  ;;  %3941 = vmatmul.msk.bf16.vlgmr.msra.gmra.mxu0 %vm991_vm5, %v4475_v19  ;;  %v1124_v27 = vor.u32 %v1123_v24, %v1120_v23  ;;  %v1137_v38 = vrot.slane %v1135_v35, 3  ;;  %v1198_v47 = vshrl.u32 %v4645_v43, 16  ;;  %v1201_v48 = vshll.u32 %v4645_v43, 16  ;;  %v4637_v19 = vld [vmem:[#allocation2 + $0x2c] sm:$0xff]   ;;  %v5169_v24 = vld [vmem:[#allocation2 + $0x60] sm:$0xff]  }
 0x215   : > { %1577 = vmatpush.bf16.msrb.mxu2 %v1568_v60  ;;  %2063 = vmatpush.bf16.msrb.mxu0 %v2054_v21  ;;  %v1909_v31 = vsel %vm1028_vm3, %v1871_v26, 0  ;;  %v1195_v37 = vor.u32 %v1194_v34, %v1191_v33  ;;  %v1140_v39 = vrot.slane %v1138_v36, 4  ;;  %v1144_v52 = vshrl.u32 %v4633_v49, 16  ;;  %v5146_v60 = vld [vmem:[#allocation2 + $0x48] sm:$0xff]  }
 0x216   : > { %v1133_v32 = vsel %vm1116_vm4, %v1124_v27, %v1132_v25  ;;  %1918 = vmatpush.bf16.msrb.mxu3 %v1909_v31  ;;  %v1200_v50 = vrot.slane %v1198_v47, 3  ;;  %v1203_v51 = vrot.slane %v1201_v48, 4  ;;  %v1147_v53 = vshll.u32 %v4633_v49, 16  ;;  %v5175_v33 = vld [vmem:[#allocation2 + $0x28] sm:$0xff]  }
 0x217   : > { %3953 = vmatmul.msk.bf16.vlgmr.msra.gmra.mxu1 %vm991_vm5, %v1133_v32  ;;  %v1196_v40 = vsel %vm1116_vm4, %v1186_v14, %v1195_v37  ;;  %v1141_v42 = vor.u32 %v1140_v39, %v1137_v38  ;;  %v1146_v55 = vrot.slane %v1144_v52, 3  ;;  %v1207_v63 = vshrl.u32 %v4647_v59, 16  ;;  %v5160_v14 = vld [vmem:[#allocation2 + $0x20] sm:$0xff]   ;;  %v5173_v32 = vld [vmem:[#allocation2 + $0x58] sm:$0xff]   ;;  %v2811_v38 = vld [vmem:[%s5774_s3 + $0xc] sm:$0xc] }
 0x218   : > { %v1204_v54 = vor.u32 %v1203_v51, %v1200_v50  ;;  %v1149_v56 = vrot.slane %v1147_v53, 4  ;;  %v1210_v0 = vshll.u32 %v4647_v59, 16  ;;  %v1153_v4 = vshrl.u32 %v4635_v1, 16  ;;  %v2174_v39 = vld [vmem:[%s5774_s3 + $0x8] sm:$0xc] }
 0x219   : > { %v1142_v46 = vsel %vm1116_vm4, %v1132_v25, %v1141_v42  ;;  %v1209_v2 = vrot.slane %v1207_v63, 3  ;;  %v1156_v5 = vshll.u32 %v4635_v1, 16  ;;  %v1216_v17 = vshrl.u32 %v4648_v12, 16  ;;  %v1663_v51 = vld [vmem:[#allocation2 + $0x10] sm:$0x8]  ;;  %v4267_v1 = vld [vmem:[#allocation2 + $0x8] sm:$0xff] }
 0x21a   : > { %v1205_v57 = vsel %vm1116_vm4, %v1195_v37, %v1204_v54  ;;  %v1150_v58 = vor.u32 %v1149_v56, %v1146_v55  ;;  %v1212_v3 = vrot.slane %v1210_v0, 4  ;;  %v1155_v7 = vrot.slane %v1153_v4, 3  ;;  %v2499_v37 = vld [vmem:[%s5774_s3 + $0xc] sm:$0x3]  ;;  %v1664_v52 = vld [vmem:[#allocation2 + $0x14] sm:$0xf] }
 0x21b   : > { %v1158_v9 = vrot.slane %v1156_v5, 4  ;;  %v1219_v18 = vshll.u32 %v4648_v12, 16  ;;  %v1218_v20 = vrot.slane %v1216_v17, 3  ;;  %v1162_v22 = vshrl.u32 %v4637_v19, 16  ;;  %v5201_v0 = vld [vmem:[#allocation2 + $0x30] sm:$0xff]  }
 0x21c   : > { %v1151_v62 = vsel %vm1116_vm4, %v1141_v42, %v1150_v58  ;;  %v1213_v6 = vor.u32 %v1212_v3, %v1209_v2  ;;  %v1165_v23 = vshll.u32 %v4637_v19, 16  ;;  %v4350_v25 = vunpack.c.h.b16 %v5169_v24 }
 0x21d   : > { %v1159_v11 = vor.u32 %v1158_v9, %v1155_v7  ;;  %v1221_v21 = vrot.slane %v1219_v18, 4  ;;  %v1164_v27 = vrot.slane %v1162_v22, 3  ;;  %v2825_v42 = vunpack.c.l.b16 %v2811_v38  ;;  %v4279_v7 = vld [vmem:[#allocation2 + $0x14] sm:$0xff]  ;;  %v4280_v18 = vld [vmem:[#allocation2 + $0x1c] sm:$0xff] }
 0x21e   : > { %v1214_v10 = vsel %vm1116_vm4, %v1204_v54, %v1213_v6  ;;  %v1167_v28 = vrot.slane %v1165_v23, 4  ;;  %v1115_v29 = vpack.c.b16 %v4350_v25, %v4350_v25  ;;  %v2339_v43 = vunpack.c.l.b16 %v2174_v39  ;;  %v4268_v9 = vld [vmem:[#allocation2 + $0x10] sm:$0xff] }
 0x21f   : > { %v1160_v16 = vsel %vm1116_vm4, %v1150_v58, %v1159_v11  ;;  %v1222_v26 = vor.u32 %v1221_v21, %v1218_v20  ;;  %v2826_v47 = vpack.c.b16 %v2825_v42, %v2825_v42  ;;  %v1714_v55 = vunpack.c.l.b16 %v1663_v51 }
 0x220   : > { %v1168_v31 = vor.u32 %v1167_v28, %v1164_v27  ;;  %v1225_v34 = vshrl.u32 %v1115_v29, 16  ;;  %v1228_v35 = vshll.u32 %v1115_v29, 16  ;;  %v2340_v48 = vpack.c.b16 %v2339_v43, %v2339_v43 }
 0x221   : > { %v1223_v30 = vsel %vm1116_vm4, %v1213_v6, %v1222_v26  ;;  %v2827_v53 = vrot.slane %v2826_v47, 2  ;;  %v1715_v56 = vunpack.c.l.b16 %v1664_v52  ;;  %v1761_v4 = vshrl.u32 %v5148_v61, 16 }
 0x222   : > { %v1169_v36 = vsel %vm1116_vm4, %v1159_v11, %v1168_v31  ;;  %v1227_v49 = vrot.slane %v1225_v34, 3  ;;  %v1230_v50 = vrot.slane %v1228_v35, 4  ;;  %v2341_v54 = vrot.slane %v2340_v48, 2 }
 0x223   : > { %3960 = vmatmul.msk.bf16.gmra.mxu3 %vm991_vm5, %v1196_v40  ;;  %v2716_v40 = vsel %vm1028_vm3, %v2499_v37, 0  ;;  %v1764_v5 = vshll.u32 %v5148_v61, 16  ;;  %v1178_v6 = vsel %vm1116_vm4, %v1168_v31, %v5118_v8  ;;  %v2241_v19 = vshll.u32 %v4279_v7, 16 }
 0x224   : > { %3948 = vmatmul.msk.bf16.gmra.mxu2 %vm991_vm5, %v5137_v44  ;;  %3942 = vmatmul.msk.bf16.gmra.mxu0 %vm991_vm5, %v4476_v45  ;;  %v2985_v45 = vld [vmem:[%s5774_s3 + $0x10] sm:$0x3]  ;;  %v2379_v58 = vsel %vm1028_vm3, %v2341_v54, 0  ;;  %v1231_v59 = vor.u32 %v1230_v50, %v1227_v49  ;;  %v1432_v20 = vshrl.u32 %v4267_v1, 16  ;;  %v1439_v22 = vshll.u32 %v4268_v9, 16  ;;  %v4651_v54 = vld [vmem:[#allocation2 + $0x1c] sm:$0xff]  }
 0x225   : > { %2725 = vmatpush.bf16.msra.mxu2 %v2716_v40  ;;  %2388 = vmatpush.bf16.msrb.mxu1 %v2379_v58  ;;  %v1766_v17 = vrot.slane %v1764_v5, 4  ;;  %v2239_v27 = vshrl.u32 %v4279_v7, 16  ;;  %v2243_v8 = vrot.slane %v2241_v19, 1  ;;  %v2246_v28 = vshll.u32 %v4280_v18, 16  ;;  %v4269_v40 = vld [vmem:[#allocation2 + $0x18] sm:$0xff] }
 0x226   : > { %v1232_v63 = vsel %vm1116_vm4, %v1222_v26, %v1231_v59  ;;  %v4353_v26 = vunpack.c.l.b16 %v5148_v61  ;;  %vm1430_vm6 = vsmask.f32 7424  ;;  %v1770_v38 = vshrl.u32 %v5160_v14, 16 }
 0x227   : > { %3954 = vmatmul.msk.bf16.gmra.mxu1 %vm991_vm5, %v1142_v46  ;;  %v3186_v46 = vsel %vm1028_vm3, %v2985_v45, 0  ;;  %v2244_v35 = vor.u32 %v2243_v8, %v2239_v27  ;;  %v1773_v39 = vshll.u32 %v5160_v14, 16  ;;  %v4281_v45 = vld [vmem:[#allocation2 + $0x24] sm:$0xff]  ;;  %v1447_v47 = vshll.u32 %v4269_v40, 16 }
 0x228   : > { %3195 = vmatpush.bf16.msra.mxu0 %v3186_v46  ;;  %v2005_v34 = vpack.c.b16 %v4353_v26, %v1715_v56  ;;  %v1772_v42 = vrot.slane %v1770_v38, 3  ;;  %v1443_v46 = vshrl.u32 %v4268_v9, 16  ;;  %v2250_v49 = vshrl.u32 %v4280_v18, 16 }
 0x229   : > { %v1775_v43 = vrot.slane %v1773_v39, 4  ;;  %v2254_v50 = vshll.u32 %v4281_v45, 16  ;;  %v1449_v52 = vrot.slane %v1447_v47, 1  ;;  %v1779_v58 = vshrl.u32 %v5175_v33, 16  ;;  %v4655_v47 = vld [vmem:[#allocation2 + $0x2c] sm:$0xff]  }
 0x22a   : > { %v1782_v59 = vshll.u32 %v5175_v33, 16  ;;  %vm3538_vm7 = vcmask 125952  }
 0x22b   : > { %v1776_v48 = vor.u32 %v1775_v43, %v1772_v42 }
 0x233   : > { %3961 = vmatmul.msk.bf16.gmra.mxu3 %vm991_vm5, %v1205_v57  ;;  %v2865_v57 = vsel %vm1028_vm3, %v2827_v53, 0 }
 0x234   : > { %3949 = vmatmul.msk.bf16.gmra.mxu2 %vm991_vm5, %v5146_v60  ;;  %3943 = vmatmul.msk.bf16.gmra.mxu0 %vm991_vm5, %v5148_v61 }
 0x235   : > { %2874 = vmatpush.bf16.msra.mxu3 %v2865_v57 }
 0x237   : > { %3955 = vmatmul.msk.bf16.gmra.mxu1 %vm991_vm5, %v1151_v62  ;;  %v1739_v62 = vpack.c.b16 %v1715_v56, %v1714_v55  ;;  %v2256_v56 = vrot.slane %v2254_v50, 1 }
 0x239   : > { %v1753_v2 = vshrl.u32 %v1739_v62, 16  ;;  %v1756_v3 = vshll.u32 %v1739_v62, 16  ;;  %v4270_v62 = vld [vmem:[#allocation2 + $0x20] sm:$0xff] }
 0x23b   : > { %v1755_v11 = vrot.slane %v1753_v2, 3  ;;  %v1758_v12 = vrot.slane %v1756_v3, 4  ;;  %v4282_v2 = vld [vmem:[#allocation2 + $0x2c] sm:$0xff]  ;;  %v1451_v3 = vshrl.u32 %v4269_v40, 16 }
 0x23c   : > { %v2262_v7 = vshll.u32 %v4282_v2, 16 }
 0x23d   : > { %v1759_v23 = vor.u32 %v1758_v12, %v1755_v11  ;;  %v1453_v9 = vor.u32 %v1451_v3, %v1449_v52  ;;  %v4653_v12 = vld [vmem:[#allocation2 + $0x24] sm:$0xff]  }
 0x243   : > { %3962 = vmatmul.msk.bf16.gmra.mxu3 %vm991_vm5, %v1214_v10  ;;  %v1434_v10 = vshll.u32 %v4267_v1, 16  ;;  %v1784_v1 = vrot.slane %v1782_v59, 4 }
 0x244   : > { %3950 = vmatmul.msk.bf16.gmra.mxu2 %vm991_vm5, %v5158_v13  ;;  %3944 = vmatmul.msk.bf16.gmra.mxu0 %vm991_vm5, %v5160_v14 }
 0x245   : > { %v1436_v21 = vrot.slane %v1434_v10, 1 }
 0x247   : > { %3956 = vmatmul.msk.bf16.gmra.mxu1 %vm991_vm5, %v1160_v16  ;;  %v1763_v16 = vrot.slane %v1761_v4, 3  ;;  %v1437_v29 = vor.u32 %v1436_v21, %v1432_v20  ;;  %v1455_v4 = vshll.u32 %v4270_v62, 16  ;;  %v1788_v21 = vshrl.u32 %v5201_v0, 16 }
 0x249   : > { %v1767_v25 = vor.u32 %v1766_v17, %v1763_v16  ;;  %v1457_v10 = vrot.slane %v1455_v4, 1  ;;  %v2264_v17 = vrot.slane %v2262_v7, 1 }
 0x24b   : > { %v1768_v31 = vsel %vm1116_vm4, %v1759_v23, %v1767_v25  ;;  %v1777_v53 = vsel %vm1116_vm4, %v1767_v25, %v1776_v48  ;;  %v4271_v25 = vld [vmem:[#allocation2 + $0x28] sm:$0xff] }
 0x24c   : > { %v1467_v3 = vshrl.u32 %v4271_v25, 16 }
 0x253   : > { %3963 = vmatmul.msk.bf16.gmra.mxu3 %vm991_vm5, %v1223_v30  ;;  %v1441_v30 = vrot.slane %v1439_v22, 1  ;;  %v1791_v22 = vshll.u32 %v5201_v0, 16 }
 0x254   : > { %3951 = vmatmul.msk.bf16.gmra.mxu2 %vm991_vm5, %v5173_v32  ;;  %3945 = vmatmul.msk.bf16.gmra.mxu0 %vm991_vm5, %v5175_v33  ;;  %v1458_v33 = vsel %vm1430_vm6, %v1453_v9, %v1457_v10 }
 0x255   : > { %v1442_v37 = vsel %vm1430_vm6, %v1437_v29, %v1441_v30  ;;  %v1445_v51 = vor.u32 %v1443_v46, %v1441_v30  ;;  %v1793_v29 = vrot.slane %v1791_v22, 4  ;;  %v4283_v30 = vld [vmem:[#allocation2 + $0x34] sm:$0xff] }
 0x256   : > { %v2270_v38 = vshll.u32 %v4283_v30, 16  ;;  %v2274_v7 = vshrl.u32 %v4283_v30, 16  ;;  %v4273_v30 = vld [vmem:[#allocation2 + $0x38] sm:$0xff] }
 0x257   : > { %3957 = vmatmul.msk.bf16.gmra.mxu1 %vm991_vm5, %v1169_v36  ;;  %v2248_v36 = vrot.slane %v2246_v28, 1  ;;  %v1450_v14 = vsel %vm1430_vm6, %v1445_v51, %v1449_v52  ;;  %v1790_v28 = vrot.slane %v1788_v21, 3 }
 0x259   : > { %v2249_v61 = vsel %vm1430_vm6, %v2244_v35, %v2248_v36  ;;  %v2252_v55 = vor.u32 %v2250_v49, %v2248_v36  ;;  %v1463_v35 = vshll.u32 %v4271_v25, 16  ;;  %v2272_v49 = vrot.slane %v2270_v38, 1 }
 0x25b   : > { %v2257_v57 = vsel %vm1430_vm6, %v2252_v55, %v2256_v56  ;;  %v1465_v40 = vrot.slane %v1463_v35, 1  ;;  %v1800_v55 = vshll.u32 %v5124_v15, 16 }
 0x263   : > { %3964 = vmatmul.msk.bf16.gmra.mxu3 %vm991_vm5, %v1232_v63  ;;  %v1781_v63 = vrot.slane %v1779_v58, 3 }
 0x264   : > { %3952 = vmatmul.msk.bf16.gmra.mxu2 %vm991_vm5, %v5169_v24  ;;  %3946 = vmatmul.msk.bf16.gmra.mxu0 %vm991_vm5, %v5201_v0 }
 0x265   : > { %v1785_v5 = vor.u32 %v1784_v1, %v1781_v63  ;;  %v1802_v63 = vrot.slane %v1800_v55, 4  ;;  %v4284_v1 = vld [vmem:[#allocation2 + $0x3c] sm:$0xff] }
 0x266   : > { %v2278_v9 = vshll.u32 %v4284_v1, 16 }
 0x267   : > { %3958 = vmatmul.msk.bf16.gmra.mxu1 %vm991_vm5, %v1178_v6  ;;  %v2258_v6 = vshrl.u32 %v4281_v45, 16  ;;  %v1786_v11 = vsel %vm1116_vm4, %v1776_v48, %v1785_v5 }
 0x269   : > { %v2260_v16 = vor.u32 %v2258_v6, %v2256_v56 }
 0x26b   : > { %v2265_v20 = vsel %vm1430_vm6, %v2260_v16, %v2264_v17 }
 0x273   : > { %4025 = vmatmul.msk.bf16.vlgmr.msrb.gmra.mxu3 %vm991_vm5, %v1768_v31 }
 0x274   : > { %4013 = vmatmul.msk.bf16.vlgmr.msrb.gmra.mxu2 %vm991_vm5, %v1442_v37  ;;  %4037 = vmatmul.msk.bf16.vlgmr.msrb.gmra.mxu0 %vm991_vm5, %v2005_v34  ;;  %v1459_v34 = vshrl.u32 %v4270_v62, 16  ;;  %v1794_v37 = vor.u32 %v1793_v29, %v1790_v28  ;;  %v1809_v28 = vshll.u32 %v5137_v44, 16 }
 0x276   : > { %v1461_v39 = vor.u32 %v1459_v34, %v1457_v10  ;;  %v1795_v46 = vsel %vm1116_vm4, %v1785_v5, %v1794_v37  ;;  %v1469_v10 = vor.u32 %v1467_v3, %v1465_v40 }
 0x277   : > { %4097 = vmatmul.msk.bf16.vlgmr.msrb.gmra.mxu1 %vm991_vm5, %v2249_v61  ;;  %v2266_v61 = vshrl.u32 %v4282_v2, 16 }
 0x278   : > { %v1466_v51 = vsel %vm1430_vm6, %v1461_v39, %v1465_v40  ;;  %v1479_v40 = vshll.u32 %v4273_v30, 16 }
 0x279   : > { %v2268_v48 = vor.u32 %v2266_v61, %v2264_v17  ;;  %v4285_v61 = vld [vmem:[#allocation2 + $0x44] sm:$0xff] }
 0x283   : > { %4026 = vmatmul.msk.bf16.gmra.mxu3 %vm991_vm5, %v1777_v53  ;;  %v2273_v53 = vsel %vm1430_vm6, %v2268_v48, %v2272_v49 }
 0x284   : > { %4014 = vmatmul.msk.bf16.gmra.mxu2 %vm991_vm5, %v1450_v14  ;;  %4038 = vmatmul.msk.bf16.gmra.mxu0 %vm991_vm5, %v4651_v54  ;;  %v1797_v54 = vshrl.u32 %v5124_v15, 16  ;;  %v4272_v14 = vld [vmem:[#allocation2 + $0x30] sm:$0xff] }
 0x285   : > { %v1471_v4 = vshll.u32 %v4272_v14, 16  ;;  %v1475_v39 = vshrl.u32 %v4272_v14, 16 }
 0x286   : > { %v1799_v62 = vrot.slane %v1797_v54, 3  ;;  %v4659_v54 = vld [vmem:[#allocation2 + $0x3c] sm:$0xff]  }
 0x287   : > { %4098 = vmatmul.msk.bf16.gmra.mxu1 %vm991_vm5, %v2257_v57 }
 0x288   : > { %v1803_v6 = vor.u32 %v1802_v63, %v1799_v62 }
 0x291   : > { %v1041_v18 = vpop.f32.mrf.mxu0 }
 0x293   : > { %4027 = vmatmul.msk.bf16.gmra.mxu3 %vm991_vm5, %v1786_v11  ;;  %v1473_v11 = vrot.slane %v1471_v4, 1  ;;  %v4274_v4 = vld [vmem:[#allocation2 + $0x40] sm:$0xff] }
 0x294   : > { %v1281_v19 = vpop.f32.mrf.mxu1  ;;  %4015 = vmatmul.msk.bf16.gmra.mxu2 %vm991_vm5, %v1458_v33  ;;  %4039 = vmatmul.msk.bf16.gmra.mxu0 %vm991_vm5, %v4653_v12  ;;  %v4657_v33 = vld [vmem:[#allocation2 + $0x34] sm:$0xff]  }
 0x295   : > { %v5240_v23 = vadd.f32 %v1281_v19, %v1041_v18  ;;  %v1804_v18 = vsel %vm1116_vm4, %v1794_v37, %v1803_v6  ;;  %v2276_v19 = vor.u32 %v2274_v7, %v2272_v49  ;;  %v1474_v22 = vsel %vm1430_vm6, %v1469_v10, %v1473_v11 }
 0x296   : > { %v1311_v26 = vpop.f32.mrf.mxu3  ;;  %v1811_v37 = vrot.slane %v1809_v28, 4  ;;  %v1477_v48 = vor.u32 %v1475_v39, %v1473_v11  ;;  %v1481_v49 = vrot.slane %v1479_v40, 1  ;;  %v4286_v11 = vld [vmem:[#allocation2 + $0x4c] sm:$0xff]  ;;  %v1824_v40 = vshrl.u32 %v5158_v13, 16 }
 0x297   : > { %v1071_v27 = vpop.f32.mrf.mxu2  ;;  %4099 = vmatmul.msk.bf16.gmra.mxu1 %vm991_vm5, %v2265_v20  ;;  %v2280_v20 = vrot.slane %v2278_v9, 1 }
 0x298   : > { %v5243_v8 = vadd.f32 %v1311_v26, %v1071_v27  ;;  %v1806_v27 = vshrl.u32 %v5137_v44, 16  ;;  %v1482_v14 = vsel %vm1430_vm6, %v1477_v48, %v1481_v49 }
 0x299   : > { %v1043_v31 = vpop.f32.mrf.mxu0  ;;  %v2281_v26 = vsel %vm1430_vm6, %v2276_v19, %v2280_v20 }
 0x29c   : > { %v1283_v36 = vpop.f32.mrf.mxu1 }
 0x29d   : > { %v5245_v0 = vadd.f32 %v1283_v36, %v1043_v31  ;;  %v1808_v36 = vrot.slane %v1806_v27, 3 }
 0x29e   : > { %v1313_v42 = vpop.f32.mrf.mxu3 }
 0x29f   : > { %v1073_v43 = vpop.f32.mrf.mxu2 }
 0x2a0   : > { %v5247_v45 = vadd.f32 %v1313_v42, %v1073_v43  ;;  %v1812_v43 = vor.u32 %v1811_v37, %v1808_v36 }
 0x2a1   : > { %v1046_v50 = vpop.f32.mrf.mxu0 }
 0x2a3   : > { %4028 = vmatmul.msk.bf16.gmra.mxu3 %vm991_vm5, %v1795_v46  ;;  %v2282_v46 = vshrl.u32 %v4284_v1, 16  ;;  %v1815_v1 = vshrl.u32 %v5146_v60, 16 }
 0x2a4   : > { %v1286_v52 = vpop.f32.mrf.mxu1  ;;  %4016 = vmatmul.msk.bf16.gmra.mxu2 %vm991_vm5, %v1466_v51  ;;  %4040 = vmatmul.msk.bf16.gmra.mxu0 %vm991_vm5, %v4655_v47  ;;  %v2286_v47 = vshll.u32 %v4285_v61, 16 }
 0x2a5   : > { %v5257_v56 = vadd.f32 %v1286_v52, %v1046_v50  ;;  %v2284_v55 = vor.u32 %v2282_v46, %v2280_v20  ;;  %v1817_v9 = vrot.slane %v1815_v1, 3  ;;  %v2290_v20 = vshrl.u32 %v4285_v61, 16  ;;  %v4275_v46 = vld [vmem:[#allocation2 + $0x48] sm:$0xff] }
 0x2a6   : > { %v1316_v57 = vpop.f32.mrf.mxu3 }
 0x2a7   : > { %v1076_v58 = vpop.f32.mrf.mxu2  ;;  %4100 = vmatmul.msk.bf16.gmra.mxu1 %vm991_vm5, %v2273_v53  ;;  %v1813_v53 = vsel %vm1116_vm4, %v1803_v6, %v1812_v43 }
 0x2a8   : > { %v5260_v59 = vadd.f32 %v1316_v57, %v1076_v58  ;;  %v2288_v57 = vrot.slane %v2286_v47, 1 }
 0x2a9   : > { %v1048_v2 = vpop.f32.mrf.mxu0 }
 0x2aa   : > { %v2289_v63 = vsel %vm1430_vm6, %v2284_v55, %v2288_v57  ;;  %v2292_v36 = vor.u32 %v2290_v20, %v2288_v57  ;;  %v1491_v55 = vshrl.u32 %v4274_v4, 16  ;;  %v1495_v57 = vshll.u32 %v4275_v46, 16 }
 0x2ac   : > { %v1288_v5 = vpop.f32.mrf.mxu1 }
 0x2ad   : > { %v5262_v15 = vadd.f32 %v1288_v5, %v1048_v2  ;;  %v1818_v2 = vshll.u32 %v5146_v60, 16 }
 0x2ae   : > { %v1318_v12 = vpop.f32.mrf.mxu3 }
 0x2af   : > { %v1078_v16 = vpop.f32.mrf.mxu2  ;;  %v1820_v10 = vrot.slane %v1818_v2, 4  ;;  %v1497_v2 = vrot.slane %v1495_v57, 1 }
 0x2b0   : > { %v5264_v17 = vadd.f32 %v1318_v12, %v1078_v16  ;;  %v1483_v16 = vshrl.u32 %v4273_v30, 16 }
 0x2b1   : > { %v1051_v21 = vpop.f32.mrf.mxu0  ;;  %v1821_v19 = vor.u32 %v1820_v10, %v1817_v9 }
 0x2b3   : > { %4029 = vmatmul.msk.bf16.gmra.mxu3 %vm991_vm5, %v1804_v18  ;;  %v1487_v18 = vshll.u32 %v4274_v4, 16 }
 0x2b4   : > { %v1291_v25 = vpop.f32.mrf.mxu1  ;;  %4017 = vmatmul.msk.bf16.gmra.mxu2 %vm991_vm5, %v1474_v22  ;;  %4041 = vmatmul.msk.bf16.gmra.mxu0 %vm991_vm5, %v4657_v33  ;;  %v1485_v22 = vor.u32 %v1483_v16, %v1481_v49 }
 0x2b5   : > { %v5274_v29 = vadd.f32 %v1291_v25, %v1051_v21  ;;  %v2294_v21 = vshll.u32 %v4286_v11, 16  ;;  %v1489_v25 = vrot.slane %v1487_v18, 1 }
 0x2b6   : > { %v1321_v31 = vpop.f32.mrf.mxu3 }
 0x2b7   : > { %v1081_v34 = vpop.f32.mrf.mxu2  ;;  %4101 = vmatmul.msk.bf16.gmra.mxu1 %vm991_vm5, %v2281_v26  ;;  %v2296_v37 = vrot.slane %v2294_v21, 1  ;;  %v1490_v30 = vsel %vm1430_vm6, %v1485_v22, %v1489_v25  ;;  %v1493_v1 = vor.u32 %v1491_v55, %v1489_v25  ;;  %v1833_v21 = vshrl.u32 %v5173_v32, 16  ;;  %v4276_v25 = vld [vmem:[#allocation2 + $0x50] sm:$0xff] }
 0x2b8   : > { %v5277_v35 = vadd.f32 %v1321_v31, %v1081_v34  ;;  %v1822_v31 = vsel %vm1116_vm4, %v1812_v43, %v1821_v19  ;;  %v4661_v34 = vld [vmem:[#allocation2 + $0x44] sm:$0xff]   ;;  %v1836_v22 = vshll.u32 %v5173_v32, 16 }
 0x2b9   : > { %v1053_v38 = vpop.f32.mrf.mxu0  ;;  %v2297_v39 = vsel %vm1430_vm6, %v2292_v36, %v2296_v37  ;;  %v1498_v4 = vsel %vm1430_vm6, %v1493_v1, %v1497_v2 }
 0x2ba   : > { %v1838_v36 = vrot.slane %v1836_v22, 4 }
 0x2bc   : > { %v1293_v42 = vpop.f32.mrf.mxu1 }
 0x2bd   : > { %v5279_v44 = vadd.f32 %v1293_v42, %v1053_v38  ;;  %v1827_v42 = vshll.u32 %v5158_v13, 16 }
 0x2be   : > { %v1323_v50 = vpop.f32.mrf.mxu3 }
 0x2bf   : > { %v1083_v51 = vpop.f32.mrf.mxu2 }
 0x2c0   : > { %v5281_v52 = vadd.f32 %v1323_v50, %v1083_v51  ;;  %v1826_v50 = vrot.slane %v1824_v40, 3  ;;  %v1829_v51 = vrot.slane %v1827_v42, 4 }
 0x2c1   : > { %v1056_v58 = vpop.f32.mrf.mxu0 }
 0x2c3   : > { %4030 = vmatmul.msk.bf16.gmra.mxu3 %vm991_vm5, %v1813_v53  ;;  %v4287_v53 = vld [vmem:[#allocation2 + $0x54] sm:$0xff] }
 0x2c4   : > { %v1296_v62 = vpop.f32.mrf.mxu1  ;;  %4018 = vmatmul.msk.bf16.gmra.mxu2 %vm991_vm5, %v1482_v14  ;;  %4042 = vmatmul.msk.bf16.gmra.mxu0 %vm991_vm5, %v4659_v54  ;;  %v1830_v14 = vor.u32 %v1829_v51, %v1826_v50  ;;  %v2306_v42 = vshrl.u32 %v4287_v53, 16 }
 0x2c5   : > { %v5291_v3 = vadd.f32 %v1296_v62, %v1056_v58  ;;  %v2298_v62 = vshrl.u32 %v4286_v11, 16 }
 0x2c6   : > { %v1326_v5 = vpop.f32.mrf.mxu3  ;;  %v1831_v10 = vsel %vm1116_vm4, %v1821_v19, %v1830_v14 }
 0x2c7   : > { %v1086_v6 = vpop.f32.mrf.mxu2  ;;  %4102 = vmatmul.msk.bf16.gmra.mxu1 %vm991_vm5, %v2289_v63  ;;  %v2302_v63 = vshll.u32 %v4287_v53, 16  ;;  %v2300_v16 = vor.u32 %v2298_v62, %v2296_v37  ;;  %v4288_v37 = vld [vmem:[#allocation2 + $0x5c] sm:$0xff] }
 0x2c8   : > { %v5294_v7 = vadd.f32 %v1326_v5, %v1086_v6  ;;  %v3417_v53 = vld [vmem:[%s5776_s5] sm:$0x3] }
 0x2c9   : > { %v1058_v12 = vpop.f32.mrf.mxu0  ;;  %v2304_v18 = vrot.slane %v2302_v63, 1 }
 0x2cb   : > { %v2305_v20 = vsel %vm1430_vm6, %v2300_v16, %v2304_v18  ;;  %v2308_v62 = vor.u32 %v2306_v42, %v2304_v18 }
 0x2cc   : > { %v1298_v33 = vpop.f32.mrf.mxu1 }
 0x2cd   : > { %v5296_v60 = vadd.f32 %v1298_v33, %v1058_v12  ;;  %v4663_v12 = vld [vmem:[#allocation2 + $0x4c] sm:$0xff]  }
 0x2ce   : > { %v1328_v26 = vpop.f32.mrf.mxu3 }
 0x2cf   : > { %v1088_v27 = vpop.f32.mrf.mxu2 }
 0x2d0   : > { %v5298_v28 = vadd.f32 %v1328_v26, %v1088_v27 }
 0x2d1   : > { %v1061_v38 = vpop.f32.mrf.mxu0 }
 0x2d3   : > { %4031 = vmatmul.msk.bf16.gmra.mxu3 %vm991_vm5, %v1822_v31 }
 0x2d4   : > { %v1301_v61 = vpop.f32.mrf.mxu1  ;;  %4019 = vmatmul.msk.bf16.gmra.mxu2 %vm991_vm5, %v1490_v30  ;;  %4043 = vmatmul.msk.bf16.gmra.mxu0 %vm991_vm5, %v4661_v34  ;;  %v1835_v34 = vrot.slane %v1833_v21, 3  ;;  %v1499_v30 = vshrl.u32 %v4275_v46, 16  ;;  %v1507_v21 = vshrl.u32 %v4276_v25, 16 }
 0x2d5   : > { %v5308_v43 = vadd.f32 %v1301_v61, %v1061_v38  ;;  %v1503_v61 = vshll.u32 %v4276_v25, 16 }
 0x2d6   : > { %v1331_v47 = vpop.f32.mrf.mxu3  ;;  %v1839_v40 = vor.u32 %v1838_v36, %v1835_v34  ;;  %v2314_v36 = vshrl.u32 %v4288_v37, 16 }
 0x2d7   : > { %v1091_v48 = vpop.f32.mrf.mxu2  ;;  %4103 = vmatmul.msk.bf16.gmra.mxu1 %vm991_vm5, %v2297_v39  ;;  %v1505_v50 = vrot.slane %v1503_v61, 1 }
 0x2d8   : > { %v5311_v49 = vadd.f32 %v1331_v47, %v1091_v48  ;;  %v2310_v47 = vshll.u32 %v4288_v37, 16  ;;  %v1501_v48 = vor.u32 %v1499_v30, %v1497_v2  ;;  %v1840_v57 = vsel %vm1116_vm4, %v1830_v14, %v1839_v40 }
 0x2d9   : > { %v1063_v54 = vpop.f32.mrf.mxu0  ;;  %v3459_v2 = vsel %vm1028_vm3, %v3417_v53, 0 }
 0x2da   : > { %v2312_v63 = vrot.slane %v2310_v47, 1  ;;  %v1506_v46 = vsel %vm1430_vm6, %v1501_v48, %v1505_v50  ;;  %3468 = vmatpush.bf16.msra.mxu1 %v3459_v2  ;;  %v4667_v47 = vld [vmem:[#allocation2 + $0x5c] sm:$0xff]  }
 0x2dc   : > { %v1303_v58 = vpop.f32.mrf.mxu1  ;;  %v2313_v14 = vsel %vm1430_vm6, %v2308_v62, %v2312_v63  ;;  %v2316_v48 = vor.u32 %v2314_v36, %v2312_v63  ;;  %v4278_v62 = vld [vmem:[#allocation2 + $0x60] sm:$0xff] }
 0x2dd   : > { %v5313_v13 = vadd.f32 %v1303_v58, %v1063_v54  ;;  %v4665_v58 = vld [vmem:[#allocation2 + $0x54] sm:$0xff]  }
 0x2de   : > { %v1333_v5 = vpop.f32.mrf.mxu3 }
 0x2df   : > { %v1093_v6 = vpop.f32.mrf.mxu2 }
 0x2e0   : > { %v5315_v9 = vadd.f32 %v1333_v5, %v1093_v6  ;;  %v1842_v5 = vshrl.u32 %v5169_v24, 16  ;;  %v1845_v6 = vshll.u32 %v5169_v24, 16 }
 0x2e1   : > { %v1066_v33 = vpop.f32.mrf.mxu0 }
 0x2e3   : > { %4032 = vmatmul.msk.bf16.gmra.mxu3 %vm991_vm5, %v1831_v10  ;;  %v4277_v10 = vld [vmem:[#allocation2 + $0x58] sm:$0xff] }
 0x2e4   : > { %v1306_v11 = vpop.f32.mrf.mxu1  ;;  %4020 = vmatmul.msk.bf16.gmra.mxu2 %vm991_vm5, %v1498_v4  ;;  %4044 = vmatmul.msk.bf16.gmra.mxu0 %vm991_vm5, %v4663_v12  ;;  %v1847_v4 = vrot.slane %v1845_v6, 4  ;;  %v1511_v22 = vshll.u32 %v4277_v10, 16 }
 0x2e5   : > { %v5325_v19 = vadd.f32 %v1306_v11, %v1066_v33  ;;  %v1844_v33 = vrot.slane %v1842_v5, 3  ;;  %v4289_v11 = vld [vmem:[#allocation2 + $0x64] sm:$0xff]  ;;  %v1687_v5 = vld [vmem:[#allocation2 + $0x70] sm:$0xf] }
 0x2e6   : > { %v1336_v26 = vpop.f32.mrf.mxu3  ;;  %v2318_v24 = vshll.u32 %v4289_v11, 16  ;;  %v1513_v30 = vrot.slane %v1511_v22, 1 }
 0x2e7   : > { %v1096_v27 = vpop.f32.mrf.mxu2  ;;  %4104 = vmatmul.msk.bf16.gmra.mxu1 %vm991_vm5, %v2305_v20  ;;  %v1848_v34 = vor.u32 %v1847_v4, %v1844_v33  ;;  %v1738_v33 = vunpack.c.l.b16 %v1687_v5 }
 0x2e8   : > { %v5328_v31 = vadd.f32 %v1336_v26, %v1096_v27 }
 0x2e9   : > { %v1068_v38 = vpop.f32.mrf.mxu0 }
 0x2ec   : > { %v1308_v39 = vpop.f32.mrf.mxu1 }
 0x2ed   : > { %v5330_v32 = vadd.f32 %v1308_v39, %v1068_v38  ;;  %v1509_v38 = vor.u32 %v1507_v21, %v1505_v50  ;;  %v2322_v21 = vshrl.u32 %v4289_v11, 16  ;;  %v2173_v11 = vld [vmem:[#allocation2 + $0x74] sm:$0x1] }
 0x2ee   : > { %v1338_v51 = vpop.f32.mrf.mxu3 }
 0x2ef   : > { %v1098_v54 = vpop.f32.mrf.mxu2  ;;  %v1514_v25 = vsel %vm1430_vm6, %v1509_v38, %v1513_v30 }
 0x2f0   : > { %v5332_v55 = vadd.f32 %v1338_v51, %v1098_v54  ;;  %v2320_v51 = vrot.slane %v2318_v24, 1 }
 0x2f1   : > { %v2065_v1 = vpop.f32.mrf.mxu0 }
 0x2f3   : > { %4033 = vmatmul.msk.bf16.gmra.mxu3 %vm991_vm5, %v1840_v57  ;;  %v5353_v57 = vld [vmem:[#allocation2 + $0x68] sm:$0xff]  }
 0x2f4   : > { %4021 = vmatmul.msk.bf16.gmra.mxu2 %vm991_vm5, %v1506_v46  ;;  %4045 = vmatmul.msk.bf16.gmra.mxu0 %vm991_vm5, %v4665_v58  ;;  %v1854_v50 = vshll.u32 %v5353_v57, 16 }
 0x2f6   : > { %v1920_v12 = vpop.f32.mrf.mxu3  ;;  %v1856_v2 = vrot.slane %v1854_v50, 4 }
 0x2f7   : > { %v1579_v16 = vpop.f32.mrf.mxu2  ;;  %4105 = vmatmul.msk.bf16.gmra.mxu1 %vm991_vm5, %v2313_v14  ;;  %v5365_v14 = vld [vmem:[#allocation2 + $0x6c] sm:$0xff] }
 0x2f8   : > { %v1639_v18 = vadd.f32 %v1579_v16, %v5240_v23  ;;  %v1849_v23 = vsel %vm1116_vm4, %v1839_v40, %v1848_v34  ;;  %v1851_v40 = vshrl.u32 %v5353_v57, 16  ;;  %v1519_v16 = vshll.u32 %v4278_v62, 16 }
 0x2f9   : > { %v2067_v20 = vpop.f32.mrf.mxu0  ;;  %v2326_v22 = vshll.u32 %v5365_v14, 16 }
 0x2fa   : > { %v1980_v26 = vadd.f32 %v1920_v12, %v1639_v18  ;;  %v1853_v53 = vrot.slane %v1851_v40, 3  ;;  %v1515_v12 = vshrl.u32 %v4277_v10, 16  ;;  %v1521_v36 = vrot.slane %v1519_v16, 1  ;;  %v4668_v10 = vld [vmem:[#allocation2 + $0x64] sm:$0xff]  }
 0x2fc   : > { %v5348_v27 = vadd.f32 %v2065_v1, %v1980_v26  ;;  %v1517_v26 = vor.u32 %v1515_v12, %v1513_v30  ;;  %v1523_v12 = vshrl.u32 %v4278_v62, 16 }
 0x2fe   : > { %v1922_v61 = vpop.f32.mrf.mxu3 }
 0x2ff   : > { %v1581_v39 = vpop.f32.mrf.mxu2 }
 0x300   : > { %v1640_v42 = vadd.f32 %v1581_v39, %v5245_v0  ;;  %v2321_v0 = vsel %vm1430_vm6, %v2316_v48, %v2320_v51 }
 0x301   : > { %v2070_v54 = vpop.f32.mrf.mxu0 }
 0x302   : > { %v1981_v58 = vadd.f32 %v1922_v61, %v1640_v42  ;;  %v1751_v61 = vpack.c.b16 %v1738_v33, %v1738_v33 }
 0x303   : > { %4034 = vmatmul.msk.bf16.gmra.mxu3 %vm991_vm5, %v1849_v23  ;;  %v2324_v23 = vor.u32 %v2322_v21, %v2320_v51 }
 0x304   : > { %4022 = vmatmul.msk.bf16.gmra.mxu2 %vm991_vm5, %v1514_v25  ;;  %v5357_v37 = vadd.f32 %v2067_v20, %v1981_v58  ;;  %4046 = vmatmul.msk.bf16.gmra.mxu0 %vm991_vm5, %v4667_v47  ;;  %v1857_v20 = vor.u32 %v1856_v2, %v1853_v53  ;;  %v2328_v47 = vrot.slane %v2326_v22, 1  ;;  %v1860_v30 = vshrl.u32 %v1751_v61, 16 }
 0x305   : > { %v4394_v22 = vunpack.c.h.b16 %v5353_v57 }
 0x306   : > { %v1925_v63 = vpop.f32.mrf.mxu3  ;;  %v1858_v42 = vsel %vm1116_vm4, %v1848_v34, %v1857_v20  ;;  %v2224_v34 = vunpack.c.l.b16 %v2173_v11  ;;  %v4733_v11 = vld [vmem:[#allocation2 + $0x24] sm:$0xff]  }
 0x307   : > { %v1584_v1 = vpop.f32.mrf.mxu2  ;;  %4106 = vmatmul.msk.bf16.gmra.mxu1 %vm991_vm5, %v2321_v0  ;;  %v1863_v0 = vshll.u32 %v1751_v61, 16  ;;  %v1525_v61 = vor.u32 %v1523_v12, %v1521_v36 }
 0x308   : > { %v1641_v46 = vadd.f32 %v1584_v1, %v5257_v56  ;;  %v1365_v56 = vld [vmem:[#allocation2 + $0x68] sm:$0x1]  ;;  %v1862_v1 = vrot.slane %v1860_v30, 3  ;;  %v2237_v2 = vpack.c.b16 %v2224_v34, %v2224_v34 }
 0x309   : > { %v2072_v6 = vpop.f32.mrf.mxu0  ;;  %v1416_v25 = vunpack.c.l.b16 %v1365_v56  ;;  %v4671_v56 = vld [vmem:[#allocation2 + $0x1c] sm:$0x8]  ;;  %v4292_v34 = vld [vmem:[#allocation2 + $0x28] sm:$0xff] }
 0x30a   : > { %v1982_v18 = vadd.f32 %v1925_v63, %v1641_v46  ;;  %v1865_v46 = vrot.slane %v1863_v0, 4 }
 0x30b   : > { %v1429_v51 = vpack.c.b16 %v1416_v25, %v1416_v25 }
 0x30c   : > { %v5367_v4 = vadd.f32 %v2070_v54, %v1982_v18  ;;  %v1522_v54 = vsel %vm1430_vm6, %v1517_v26, %v1521_v36  ;;  %v1866_v18 = vor.u32 %v1865_v46, %v1862_v1  ;;  %v2330_v26 = vshrl.u32 %v5365_v14, 16  ;;  %v4291_v14 = vld [vmem:[#allocation2 + $0x20] sm:$0xff] }
 0x30d   : > { %v1527_v16 = vshll.u32 %v1429_v51, 16  ;;  %v3052_v51 = vshll.u32 %v4291_v14, 16 }
 0x30e   : > { %v1927_v24 = vpop.f32.mrf.mxu3  ;;  %v2332_v25 = vor.u32 %v2330_v26, %v2328_v47 }
 0x30f   : > { %v1586_v38 = vpop.f32.mrf.mxu2 }
 0x310   : > { %v1642_v39 = vadd.f32 %v1586_v38, %v5262_v15  ;;  %v2329_v15 = vsel %vm1430_vm6, %v2324_v23, %v2328_v47  ;;  %v4731_v38 = vld [vmem:[#allocation2 + $0x1c] sm:$0xf0]   ;;  %v2575_v47 = vshll.u32 %v4733_v11, 16 }
 0x311   : > { %v2075_v48 = vpop.f32.mrf.mxu0  ;;  %v4672_v23 = vor.u32 %v4731_v38, %v4671_v56 }
 0x312   : > { %v1983_v58 = vadd.f32 %v1927_v24, %v1642_v39  ;;  %v2334_v24 = vshll.u32 %v2237_v2, 16  ;;  %v1529_v39 = vrot.slane %v1527_v16, 1  ;;  %v2577_v12 = vrot.slane %v2575_v47, 4 }
 0x313   : > { %4035 = vmatmul.msk.bf16.gmra.mxu3 %vm991_vm5, %v1858_v42  ;;  %v2564_v36 = vshrl.u32 %v4672_v23, 16  ;;  %v3050_v16 = vshrl.u32 %v4291_v14, 16 }
 0x314   : > { %4023 = vmatmul.msk.bf16.gmra.mxu2 %vm991_vm5, %v1522_v54  ;;  %v5375_v40 = vadd.f32 %v2072_v6, %v1983_v58  ;;  %4047 = vmatmul.msk.bf16.gmra.mxu0 %vm991_vm5, %v4668_v10  ;;  %v2016_v54 = vpack.c.b16 %v1738_v33, %v4394_v22  ;;  %v1530_v30 = vsel %vm1430_vm6, %v1525_v61, %v1529_v39  ;;  %v2567_v33 = vshll.u32 %v4672_v23, 16 }
 0x315   : > { %v2566_v46 = vrot.slane %v2564_v36, 3 }
 0x316   : > { %v1930_v50 = vpop.f32.mrf.mxu3 }
 0x317   : > { %v1589_v63 = vpop.f32.mrf.mxu2  ;;  %4107 = vmatmul.msk.bf16.gmra.mxu1 %vm991_vm5, %v2329_v15 }
 0x318   : > { %v1643_v53 = vadd.f32 %v1589_v63, %v5274_v29  ;;  %v1867_v29 = vsel %vm1116_vm4, %v1857_v20, %v1866_v18  ;;  %v2572_v20 = vshrl.u32 %v4733_v11, 16  ;;  %v3057_v18 = vshll.u32 %v4292_v34, 16 }
 0x319   : > { %v2077_v5 = vpop.f32.mrf.mxu0 }
 0x31a   : > { %v1984_v6 = vadd.f32 %v1930_v50, %v1643_v53  ;;  %v2569_v53 = vrot.slane %v2567_v33, 4  ;;  %v2574_v2 = vrot.slane %v2572_v20, 3  ;;  %v3059_v61 = vrot.slane %v3057_v18, 1  ;;  %v4737_v18 = vld [vmem:[#allocation2 + $0x34] sm:$0xff]  }
 0x31b   : > { %v3061_v20 = vshrl.u32 %v4292_v34, 16 }
 0x31c   : > { %v5381_v21 = vadd.f32 %v2075_v48, %v1984_v6  ;;  %v2336_v48 = vrot.slane %v2334_v24, 1  ;;  %v3054_v6 = vrot.slane %v3052_v51, 1  ;;  %v2570_v24 = vor.u32 %v2569_v53, %v2566_v46 }
 0x31d   : > { %v2578_v56 = vor.u32 %v2577_v12, %v2574_v2  ;;  %v4608_v12 = vld [vmem:[#allocation2 + $0x28] sm:$0xff]  }
 0x31e   : > { %v1932_v42 = vpop.f32.mrf.mxu3  ;;  %v3055_v38 = vor.u32 %v3054_v6, %v3050_v16 }
 0x31f   : > { %v1591_v10 = vpop.f32.mrf.mxu2  ;;  %v2579_v23 = vsel %vm1116_vm4, %v2570_v24, %v2578_v56  ;;  %v2590_v24 = vshrl.u32 %v4737_v18, 16 }
 0x320   : > { %v1644_v62 = vadd.f32 %v1591_v10, %v5279_v44  ;;  %v2337_v44 = vsel %vm1430_vm6, %v2332_v25, %v2336_v48 }
 0x321   : > { %v2080_v58 = vpop.f32.mrf.mxu0 }
 0x322   : > { %v1985_v0 = vadd.f32 %v1932_v42, %v1644_v62  ;;  %v3060_v62 = vsel %vm1430_vm6, %v3055_v38, %v3059_v61  ;;  %v2593_v38 = vshll.u32 %v4737_v18, 16 }
 0x323   : > { %4036 = vmatmul.msk.bf16.gmra.mxu3 %vm991_vm5, %v1867_v29 }
 0x324   : > { %4024 = vmatmul.msk.bf16.gmra.mxu2 %vm991_vm5, %v1530_v30  ;;  %v5390_v15 = vadd.f32 %v2077_v5, %v1985_v0  ;;  %4048 = vmatmul.msk.bf16.gmra.mxu0 %vm991_vm5, %v2016_v54  ;;  %v4735_v54 = vld [vmem:[#allocation2 + $0x2c] sm:$0xff]  }
 0x325   : > { %v2581_v11 = vshrl.u32 %v4735_v54, 16  ;;  %v4293_v30 = vld [vmem:[#allocation2 + $0x30] sm:$0xff] }
 0x326   : > { %v1935_v50 = vpop.f32.mrf.mxu3  ;;  %v3065_v47 = vshll.u32 %v4293_v30, 16 }
 0x327   : > { %v1594_v63 = vpop.f32.mrf.mxu2  ;;  %4108 = vmatmul.msk.bf16.gmra.mxu1 %vm991_vm5, %v2337_v44  ;;  %v2583_v44 = vrot.slane %v2581_v11, 3 }
 0x328   : > { %v1645_v1 = vadd.f32 %v1594_v63, %v5291_v3  ;;  %v4607_v3 = vld [vmem:[#allocation2 + $0x20] sm:$0xff]   ;;  %v3067_v46 = vrot.slane %v3065_v47, 1 }
 0x329   : > { %v2082_v5 = vpop.f32.mrf.mxu0 }
 0x32a   : > { %v1986_v22 = vadd.f32 %v1935_v50, %v1645_v1  ;;  %v3063_v1 = vor.u32 %v3061_v20, %v3059_v61  ;;  %v4294_v61 = vld [vmem:[#allocation2 + $0x38] sm:$0xff] }
 0x32b   : > { %v4739_v20 = vld [vmem:[#allocation2 + $0x3c] sm:$0xff]  }
 0x32c   : > { %v5396_v26 = vadd.f32 %v2080_v58, %v1986_v22  ;;  %v2584_v58 = vshll.u32 %v4735_v54, 16 }
 0x32e   : > { %v1937_v39 = vpop.f32.mrf.mxu3  ;;  %v2586_v33 = vrot.slane %v2584_v58, 4 }
 0x32f   : > { %v1596_v42 = vpop.f32.mrf.mxu2 }
 0x330   : > { %v1646_v10 = vadd.f32 %v1596_v42, %v5296_v60  ;;  %v2587_v63 = vor.u32 %v2586_v33, %v2583_v44 }
 0x331   : > { %v2085_v29 = vpop.f32.mrf.mxu0 }
 0x332   : > { %v1987_v25 = vadd.f32 %v1937_v39, %v1646_v10  ;;  %v2588_v6 = vsel %vm1116_vm4, %v2578_v56, %v2587_v63  ;;  %v2592_v10 = vrot.slane %v2590_v24, 3 }
 0x333   : > { %4121 = vmatmul.msk.bf16.vlgmr.msra.gmra.mxu3 %vm991_vm5, %v4607_v3  ;;  %v2595_v3 = vrot.slane %v2593_v38, 4 }
 0x334   : > { %4109 = vmatmul.msk.bf16.vlgmr.msra.gmra.mxu2 %vm991_vm5, %v2579_v23  ;;  %v5403_v48 = vadd.f32 %v2082_v5, %v1987_v25  ;;  %4181 = vmatmul.msk.bf16.vlgmr.msra.gmra.mxu0 %vm991_vm5, %v3060_v62  ;;  %v3073_v23 = vshll.u32 %v4294_v61, 16 }
 0x335   : > { %v2596_v25 = vor.u32 %v2595_v3, %v2592_v10  ;;  %v4610_v10 = vld [vmem:[#allocation2 + $0x38] sm:$0xff]  }
 0x336   : > { %v1940_v60 = vpop.f32.mrf.mxu3  ;;  %v3075_v58 = vrot.slane %v3073_v23, 1 }
 0x337   : > { %v1599_v14 = vpop.f32.mrf.mxu2  ;;  %v2597_v33 = vsel %vm1116_vm4, %v2587_v63, %v2596_v25 }
 0x338   : > { %v1647_v0 = vadd.f32 %v1599_v14, %v5308_v43  ;;  %v3068_v43 = vsel %vm1430_vm6, %v3063_v1, %v3067_v46  ;;  %v2602_v1 = vshll.u32 %v4739_v20, 16 }
 0x339   : > { %v2087_v36 = vpop.f32.mrf.mxu0 }
 0x33a   : > { %v1988_v51 = vadd.f32 %v1940_v60, %v1647_v0 }
 0x33c   : > { %v5407_v50 = vadd.f32 %v2085_v29, %v1988_v51  ;;  %v3069_v29 = vshrl.u32 %v4293_v30, 16  ;;  %v2599_v51 = vshrl.u32 %v4739_v20, 16 }
 0x33e   : > { %v1942_v53 = vpop.f32.mrf.mxu3  ;;  %v3071_v11 = vor.u32 %v3069_v29, %v3067_v46  ;;  %v4295_v46 = vld [vmem:[#allocation2 + $0x40] sm:$0xff] }
 0x33f   : > { %v1601_v2 = vpop.f32.mrf.mxu2 }
 0x340   : > { %v1648_v5 = vadd.f32 %v1601_v2, %v5313_v13 }
 0x341   : > { %v2090_v16 = vpop.f32.mrf.mxu0 }
 0x342   : > { %v1989_v22 = vadd.f32 %v1942_v53, %v1648_v5  ;;  %v2601_v5 = vrot.slane %v2599_v51, 3 }
 0x343   : > { %4122 = vmatmul.msk.bf16.gmra.mxu3 %vm991_vm5, %v4608_v12  ;;  %v2604_v12 = vrot.slane %v2602_v1, 4 }
 0x344   : > { %4110 = vmatmul.msk.bf16.gmra.mxu2 %vm991_vm5, %v2588_v6  ;;  %v5414_v34 = vadd.f32 %v2087_v36, %v1989_v22  ;;  %4182 = vmatmul.msk.bf16.gmra.mxu0 %vm991_vm5, %v3068_v43  ;;  %v4609_v36 = vld [vmem:[#allocation2 + $0x30] sm:$0xff]   ;;  %v3081_v6 = vshll.u32 %v4295_v46, 16 }
 0x345   : > { %v2605_v22 = vor.u32 %v2604_v12, %v2601_v5  ;;  %v4611_v12 = vld [vmem:[#allocation2 + $0x40] sm:$0xff]  }
 0x346   : > { %v1945_v13 = vpop.f32.mrf.mxu3  ;;  %v3083_v38 = vrot.slane %v3081_v6, 1 }
 0x347   : > { %v1604_v39 = vpop.f32.mrf.mxu2 }
 0x348   : > { %v1649_v42 = vadd.f32 %v1604_v39, %v5325_v19  ;;  %v3076_v19 = vsel %vm1430_vm6, %v3071_v11, %v3075_v58  ;;  %v5431_v39 = vpop.f32.mrf.mxu1 }
 0x349   : > { %v2092_v56 = vpop.f32.mrf.mxu0 }
 0x34a   : > { %v1990_v62 = vadd.f32 %v1945_v13, %v1649_v42 }
 0x34c   : > { %v5418_v54 = vadd.f32 %v2090_v16, %v1990_v62  ;;  %v3077_v16 = vshrl.u32 %v4294_v61, 16  ;;  %v4741_v61 = vld [vmem:[#allocation2 + $0x44] sm:$0xff]  }
 0x34d   : > { %v2608_v11 = vshrl.u32 %v4741_v61, 16 }
 0x34e   : > { %v1947_v60 = vpop.f32.mrf.mxu3  ;;  %v3079_v24 = vor.u32 %v3077_v16, %v3075_v58  ;;  %v2611_v58 = vshll.u32 %v4741_v61, 16 }
 0x34f   : > { %v1606_v14 = vpop.f32.mrf.mxu2 }
 0x350   : > { %v1650_v0 = vadd.f32 %v1606_v14, %v5330_v32  ;;  %v3084_v29 = vsel %vm1430_vm6, %v3079_v24, %v3083_v38 }
 0x351   : > { %v2095_v44 = vpop.f32.mrf.mxu0 }
 0x352   : > { %v1991_v47 = vadd.f32 %v1947_v60, %v1650_v0  ;;  %v4296_v60 = vld [vmem:[#allocation2 + $0x48] sm:$0xff] }
 0x353   : > { %4123 = vmatmul.msk.bf16.gmra.mxu3 %vm991_vm5, %v4609_v36  ;;  %v3089_v20 = vshll.u32 %v4296_v60, 16  ;;  %v3093_v61 = vshrl.u32 %v4296_v60, 16  ;;  %v4745_v60 = vld [vmem:[#allocation2 + $0x54] sm:$0xff]  }
 0x354   : > { %4111 = vmatmul.msk.bf16.gmra.mxu2 %vm991_vm5, %v2597_v33  ;;  %v5425_v30 = vadd.f32 %v2092_v56, %v1991_v47  ;;  %4183 = vmatmul.msk.bf16.gmra.mxu0 %vm991_vm5, %v3076_v19  ;;  %v2613_v33 = vrot.slane %v2611_v58, 4  ;;  %v3085_v19 = vshrl.u32 %v4295_v46, 16 }
 0x356   : > { %v1950_v32 = vpop.f32.mrf.mxu3 }
 0x357   : > { %v1609_v53 = vpop.f32.mrf.mxu2 }
 0x358   : > { %v1651_v2 = vadd.f32 %v1609_v53, %v5243_v8  ;;  %v2606_v8 = vsel %vm1116_vm4, %v2596_v25, %v2605_v22  ;;  %v5442_v25 = vpop.f32.mrf.mxu1  ;;  %v3091_v53 = vrot.slane %v3089_v20, 1  ;;  %v4612_v20 = vld [vmem:[#allocation2 + $0x48] sm:$0xff]  }
 0x359   : > { %v2097_v63 = vpop.f32.mrf.mxu0 }
 0x35a   : > { %v1992_v43 = vadd.f32 %v1950_v32, %v1651_v2  ;;  %v3087_v32 = vor.u32 %v3085_v19, %v3083_v38 }
 0x35c   : > { %v5429_v18 = vadd.f32 %v2095_v44, %v1992_v43  ;;  %v2610_v44 = vrot.slane %v2608_v11, 3  ;;  %v3092_v6 = vsel %vm1430_vm6, %v3087_v32, %v3091_v53  ;;  %v4743_v43 = vld [vmem:[#allocation2 + $0x4c] sm:$0xff]  }
 0x35e   : > { %v1952_v13 = vpop.f32.mrf.mxu3  ;;  %v2614_v1 = vor.u32 %v2613_v33, %v2610_v44 }
 0x35f   : > { %v1611_v42 = vpop.f32.mrf.mxu2 }
 0x360   : > { %v1652_v56 = vadd.f32 %v1611_v42, %v5247_v45  ;;  %v5449_v46 = vpop.f32.mrf.mxu1  ;;  %v4297_v42 = vld [vmem:[#allocation2 + $0x50] sm:$0xff] }
 0x361   : > { %v2100_v3 = vpop.f32.mrf.mxu0 }
 0x362   : > { %v1993_v23 = vadd.f32 %v1952_v13, %v1652_v56  ;;  %v2617_v13 = vshrl.u32 %v4743_v43, 16 }
 0x363   : > { %4124 = vmatmul.msk.bf16.gmra.mxu3 %vm991_vm5, %v4610_v10 }
 0x364   : > { %4112 = vmatmul.msk.bf16.gmra.mxu2 %vm991_vm5, %v2606_v8  ;;  %v5438_v62 = vadd.f32 %v2097_v63, %v1993_v23  ;;  %4184 = vmatmul.msk.bf16.gmra.mxu0 %vm991_vm5, %v3084_v29  ;;  %v2619_v8 = vrot.slane %v2617_v13, 3  ;;  %v3097_v23 = vshll.u32 %v4297_v42, 16  ;;  %v3101_v13 = vshrl.u32 %v4297_v42, 16  ;;  %v4747_v42 = vld [vmem:[#allocation2 + $0x5c] sm:$0xff]  }
 0x366   : > { %v1955_v45 = vpop.f32.mrf.mxu3 }
 0x367   : > { %v1614_v14 = vpop.f32.mrf.mxu2 }
 0x368   : > { %v1653_v0 = vadd.f32 %v1614_v14, %v5260_v59  ;;  %v2615_v59 = vsel %vm1116_vm4, %v2605_v22, %v2614_v1 }
 0x369   : > { %v2102_v36 = vpop.f32.mrf.mxu0 }
 0x36a   : > { %v1994_v47 = vadd.f32 %v1955_v45, %v1653_v0  ;;  %v5459_v45 = vpop.f32.mrf.mxu1  ;;  %v3095_v0 = vor.u32 %v3093_v61, %v3091_v53  ;;  %v2626_v53 = vshrl.u32 %v4745_v60, 16 }
 0x36c   : > { %v5444_v51 = vadd.f32 %v2100_v3, %v1994_v47 }
 0x36e   : > { %v1957_v2 = vpop.f32.mrf.mxu3 }
 0x36f   : > { %v1616_v63 = vpop.f32.mrf.mxu2 }
 0x370   : > { %v1654_v5 = vadd.f32 %v1616_v63, %v5264_v17  ;;  %v2620_v17 = vshll.u32 %v4743_v43, 16  ;;  %v2628_v43 = vrot.slane %v2626_v53, 3 }
 0x371   : > { %v2105_v16 = vpop.f32.mrf.mxu0 }
 0x372   : > { %v1995_v24 = vadd.f32 %v1957_v2, %v1654_v5  ;;  %v2622_v29 = vrot.slane %v2620_v17, 4  ;;  %v2629_v5 = vshll.u32 %v4745_v60, 16 }
 0x373   : > { %4125 = vmatmul.msk.bf16.gmra.mxu3 %vm991_vm5, %v4611_v12  ;;  %v4298_v12 = vld [vmem:[#allocation2 + $0x58] sm:$0xff] }
 0x374   : > { %4113 = vmatmul.msk.bf16.gmra.mxu2 %vm991_vm5, %v2615_v59  ;;  %v5453_v38 = vadd.f32 %v2102_v36, %v1995_v24  ;;  %4185 = vmatmul.msk.bf16.gmra.mxu0 %vm991_vm5, %v3092_v6  ;;  %v2623_v14 = vor.u32 %v2622_v29, %v2619_v8  ;;  %v3099_v36 = vrot.slane %v3097_v23, 1  ;;  %v2631_v24 = vrot.slane %v2629_v5, 4 }
 0x375   : > { %v3105_v17 = vshll.u32 %v4298_v12, 16  ;;  %v3109_v5 = vshrl.u32 %v4298_v12, 16  ;;  %v4749_v12 = vld [vmem:[#allocation2 + $0x64] sm:$0xff]  }
 0x376   : > { %v1960_v56 = vpop.f32.mrf.mxu3  ;;  %v3100_v32 = vsel %vm1430_vm6, %v3095_v0, %v3099_v36 }
 0x377   : > { %v1619_v10 = vpop.f32.mrf.mxu2  ;;  %v3107_v8 = vrot.slane %v3105_v17, 1 }
 0x378   : > { %v1655_v22 = vadd.f32 %v1619_v10, %v5277_v35  ;;  %v2624_v35 = vsel %vm1116_vm4, %v2614_v1, %v2623_v14 }
 0x379   : > { %v2107_v3 = vpop.f32.mrf.mxu0 }
 0x37a   : > { %v1996_v11 = vadd.f32 %v1960_v56, %v1655_v22  ;;  %v2632_v22 = vor.u32 %v2631_v24, %v2628_v43  ;;  %v3111_v24 = vor.u32 %v3109_v5, %v3107_v8 }
 0x37c   : > { %v5457_v58 = vadd.f32 %v2105_v16, %v1996_v11  ;;  %v5469_v16 = vpop.f32.mrf.mxu1  ;;  %v4613_v11 = vld [vmem:[#allocation2 + $0x50] sm:$0xff]  }
 0x37e   : > { %v1962_v44 = vpop.f32.mrf.mxu3 }
 0x37f   : > { %v1621_v33 = vpop.f32.mrf.mxu2 }
 0x380   : > { %v1656_v19 = vadd.f32 %v1621_v33, %v5281_v52 }
 0x381   : > { %v2110_v47 = vpop.f32.mrf.mxu0 }
 0x382   : > { %v1997_v2 = vadd.f32 %v1962_v44, %v1656_v19 }
 0x383   : > { %4126 = vmatmul.msk.bf16.gmra.mxu3 %vm991_vm5, %v4612_v20  ;;  %v2635_v20 = vshrl.u32 %v4747_v42, 16 }
 0x384   : > { %4114 = vmatmul.msk.bf16.gmra.mxu2 %vm991_vm5, %v2624_v35  ;;  %v5466_v63 = vadd.f32 %v2107_v3, %v1997_v2  ;;  %4186 = vmatmul.msk.bf16.gmra.mxu0 %vm991_vm5, %v3100_v32  ;;  %v3103_v3 = vor.u32 %v3101_v13, %v3099_v36  ;;  %v5475_v0 = vpop.f32.mrf.mxu1 }
 0x385   : > { %v2637_v2 = vrot.slane %v2635_v20, 3 }
 0x386   : > { %v1965_v52 = vpop.f32.mrf.mxu3  ;;  %v3108_v33 = vsel %vm1430_vm6, %v3103_v3, %v3107_v8 }
 0x387   : > { %v1624_v59 = vpop.f32.mrf.mxu2 }
 0x388   : > { %v1657_v1 = vadd.f32 %v1624_v59, %v5294_v7  ;;  %v2633_v7 = vsel %vm1116_vm4, %v2623_v14, %v2632_v22 }
 0x389   : > { %v2112_v6 = vpop.f32.mrf.mxu0 }
 0x38a   : > { %v1998_v56 = vadd.f32 %v1965_v52, %v1657_v1 }
 0x38c   : > { %v5472_v10 = vadd.f32 %v2110_v47, %v1998_v56  ;;  %v4299_v47 = vld [vmem:[#allocation2 + $0x60] sm:$0xff]  ;;  %v5485_v1 = vpop.f32.mrf.mxu1 }
 0x38d   : > { %v3113_v52 = vshll.u32 %v4299_v47, 16 }
 0x38e   : > { %v1967_v29 = vpop.f32.mrf.mxu3 }
 0x38f   : > { %v1626_v61 = vpop.f32.mrf.mxu2  ;;  %v3115_v13 = vrot.slane %v3113_v52, 1 }
 0x390   : > { %v1658_v23 = vadd.f32 %v1626_v61, %v5298_v28  ;;  %v2638_v28 = vshll.u32 %v4747_v42, 16 }
 0x391   : > { %v2115_v44 = vpop.f32.mrf.mxu0 }
 0x392   : > { %v1999_v19 = vadd.f32 %v1967_v29, %v1658_v23  ;;  %v2640_v53 = vrot.slane %v2638_v28, 4  ;;  %v4614_v29 = vld [vmem:[#allocation2 + $0x58] sm:$0xff]   ;;  %v3116_v23 = vsel %vm1430_vm6, %v3111_v24, %v3115_v13 }
 0x393   : > { %4127 = vmatmul.msk.bf16.gmra.mxu3 %vm991_vm5, %v4613_v11 }
 0x394   : > { %4115 = vmatmul.msk.bf16.gmra.mxu2 %vm991_vm5, %v2633_v7  ;;  %v5481_v36 = vadd.f32 %v2112_v6, %v1999_v19  ;;  %4187 = vmatmul.msk.bf16.gmra.mxu0 %vm991_vm5, %v3108_v33  ;;  %v2641_v6 = vor.u32 %v2640_v53, %v2637_v2  ;;  %v5497_v8 = vpop.f32.mrf.mxu1  ;;  %v2644_v7 = vshrl.u32 %v4749_v12, 16  ;;  %v4300_v33 = vld [vmem:[#allocation2 + $0x68] sm:$0xff] }
 0x396   : > { %v1970_v35 = vpop.f32.mrf.mxu3  ;;  %v2646_v28 = vrot.slane %v2644_v7, 3 }
 0x397   : > { %v1629_v32 = vpop.f32.mrf.mxu2 }
 0x398   : > { %v1659_v60 = vadd.f32 %v1629_v32, %v5311_v49  ;;  %v2642_v49 = vsel %vm1116_vm4, %v2632_v22, %v2641_v6  ;;  %v3117_v32 = vshrl.u32 %v4299_v47, 16  ;;  %v4751_v47 = vld [vmem:[#allocation2 + $0x6c] sm:$0xff]  }
 0x399   : > { %v2117_v14 = vpop.f32.mrf.mxu0 }
 0x39a   : > { %v2000_v59 = vadd.f32 %v1970_v35, %v1659_v60  ;;  %v3121_v60 = vshll.u32 %v4300_v33, 16  ;;  %v3119_v5 = vor.u32 %v3117_v32, %v3115_v13 }
 0x39c   : > { %v5487_v43 = vadd.f32 %v2115_v44, %v2000_v59  ;;  %v3123_v52 = vrot.slane %v3121_v60, 1  ;;  %v5502_v24 = vpop.f32.mrf.mxu1 }
 0x39e   : > { %v1972_v17 = vpop.f32.mrf.mxu3 }
 0x39f   : > { %v1631_v56 = vpop.f32.mrf.mxu2 }
 0x3a0   : > { %v1660_v3 = vadd.f32 %v1631_v56, %v5315_v9  ;;  %v2647_v9 = vshll.u32 %v4749_v12, 16  ;;  %v2656_v12 = vshll.u32 %v4751_v47, 16 }
 0x3a1   : > { %v2120_v61 = vpop.f32.mrf.mxu0 }
 0x3a2   : > { %v2001_v11 = vadd.f32 %v1972_v17, %v1660_v3  ;;  %v2649_v35 = vrot.slane %v2647_v9, 4  ;;  %v4615_v3 = vld [vmem:[#allocation2 + $0x60] sm:$0xff]  }
 0x3a3   : > { %4128 = vmatmul.msk.bf16.gmra.mxu3 %vm991_vm5, %v4614_v29 }
 0x3a4   : > { %4116 = vmatmul.msk.bf16.gmra.mxu2 %vm991_vm5, %v2642_v49  ;;  %v5494_v44 = vadd.f32 %v2117_v14, %v2001_v11  ;;  %4188 = vmatmul.msk.bf16.gmra.mxu0 %vm991_vm5, %v3116_v23  ;;  %v2650_v14 = vor.u32 %v2649_v35, %v2646_v28  ;;  %v3124_v49 = vsel %vm1430_vm6, %v3119_v5, %v3123_v52  ;;  %v4301_v11 = vld [vmem:[#allocation2 + $0x70] sm:$0xff]  ;;  %v2658_v28 = vrot.slane %v2656_v12, 4 }
 0x3a5   : > { %v3125_v35 = vshrl.u32 %v4300_v33, 16  ;;  %v3129_v32 = vshll.u32 %v4301_v11, 16 }
 0x3a6   : > { %v1975_v42 = vpop.f32.mrf.mxu3 }
 0x3a7   : > { %v1634_v19 = vpop.f32.mrf.mxu2 }
 0x3a8   : > { %v1661_v22 = vadd.f32 %v1634_v19, %v5328_v31  ;;  %v2651_v31 = vsel %vm1116_vm4, %v2641_v6, %v2650_v14 }
 0x3a9   : > { %v2122_v20 = vpop.f32.mrf.mxu0 }
 0x3aa   : > { %v2002_v2 = vadd.f32 %v1975_v42, %v1661_v22  ;;  %v5514_v42 = vpop.f32.mrf.mxu1 }
 0x3ac   : > { %v5500_v53 = vadd.f32 %v2120_v61, %v2002_v2  ;;  %v2653_v61 = vshrl.u32 %v4751_v47, 16  ;;  %v5519_v2 = vld [vmem:[%s5775_s4] ss:$0 sm:$0xff]  ;;  %v4752_v47 = vld [vmem:[#allocation2 + $0x74] sm:$0xff]  }
 0x3ae   : > { %v1977_v59 = vpop.f32.mrf.mxu3  ;;  %v2655_v22 = vrot.slane %v2653_v61, 3 }
 0x3af   : > { %v1636_v17 = vpop.f32.mrf.mxu2 }
 0x3b0   : > { %v1662_v56 = vadd.f32 %v1636_v17, %v5332_v55  ;;  %v2450_v55 = vadd.f32 %v5431_v39, %v5348_v27  ;;  %v2659_v5 = vor.u32 %v2658_v28, %v2655_v22  ;;  %v3131_v27 = vrot.slane %v3129_v32, 1 }
 0x3b1   : > { %v3197_v29 = vpop.f32.mrf.mxu0  ;;  %v2451_v39 = vadd.f32 %v5442_v25, %v5357_v37  ;;  %v2662_v37 = vshrl.u32 %v4752_v47, 16  ;;  %v2665_v25 = vshll.u32 %v4752_v47, 16 }
 0x3b2   : > { %v2003_v23 = vadd.f32 %v1977_v59, %v1662_v56  ;;  %v3127_v59 = vor.u32 %v3125_v35, %v3123_v52  ;;  %v5526_v61 = vpop.f32.mrf.mxu1 }
 0x3b3   : > { %4129 = vmatmul.msk.bf16.gmra.mxu3 %vm991_vm5, %v4615_v3  ;;  %v2664_v35 = vrot.slane %v2662_v37, 3  ;;  %v2667_v32 = vrot.slane %v2665_v25, 4  ;;  %v2984_v25 = vld [vmem:[#allocation2 + $0x80] sm:$0x1] }
 0x3b4   : > { %4117 = vmatmul.msk.bf16.gmra.mxu2 %vm991_vm5, %v2651_v31  ;;  %v5509_v13 = vadd.f32 %v2122_v20, %v2003_v23  ;;  %4189 = vmatmul.msk.bf16.gmra.mxu0 %vm991_vm5, %v3124_v49  ;;  %v2660_v49 = vsel %vm1116_vm4, %v2650_v14, %v2659_v5  ;;  %v2452_v14 = vadd.f32 %v5449_v46, %v5367_v4  ;;  %v5540_v4 = vld [vmem:[#allocation2 + $0x78] sm:$0xff]  }
 0x3b5   : > { %v2668_v47 = vor.u32 %v2667_v32, %v2664_v35 }
 0x3b6   : > { %v2876_v7 = vpop.f32.mrf.mxu3 }
 0x3b7   : > { %v2727_v6 = vpop.f32.mrf.mxu2 }
 0x3b8   : > { %v2787_v9 = vadd.f32 %v2727_v6, %v2450_v55  ;;  %v5532_v55 = vld [vmem:[#allocation2 + $0x78] sm:$0xff] }
 0x3b9   : > { %v3199_v19 = vpop.f32.mrf.mxu0 }
 0x3ba   : > { %v2936_v20 = vadd.f32 %v2876_v7, %v2787_v9 }
 0x3bc   : > { %v3257_v60 = vadd.f32 %v3197_v29, %v2936_v20  ;;  %v3132_v29 = vsel %vm1430_vm6, %v3127_v59, %v3131_v27  ;;  %v3133_v20 = vshrl.u32 %v4301_v11, 16  ;;  %v2453_v11 = vadd.f32 %v5459_v45, %v5375_v40 }
 0x3be   : > { %v2878_v17 = vpop.f32.mrf.mxu3  ;;  %v3285_v3 = vadd.f32 %v5519_v2, %v3257_v60  ;;  %v3137_v60 = vshll.u32 %v5532_v55, 16 }
 0x3bf   : > { %v2729_v56 = vpop.f32.mrf.mxu2 }
 0x3c0   : > { %v2788_v31 = vadd.f32 %v2729_v56, %v2451_v39  ;;  %v3333_v52 = vmin.f32 %v3285_v3, 0.0  ;;  %v3309_v59 = vmax.f32 %v3285_v3, 0.0 }
 0x3c1   : > { %v3202_v33 = vpop.f32.mrf.mxu0 }
 0x3c2   : > { %v2937_v23 = vadd.f32 %v2878_v17, %v2788_v31  ;;  %v3357_v22 = vmul.f32 %v3333_v52, %v5039_v41  ;;  %v3139_v52 = vrot.slane %v3137_v60, 1 }
 0x3c3   : > { %4130 = vmatmul.msk.bf16.gmra.mxu3 %vm991_vm5, %v5353_v57 }
 0x3c4   : > { %v3258_v12 = vadd.f32 %v3199_v19, %v2937_v23  ;;  %4118 = vmatmul.msk.bf16.gmra.mxu2 %vm991_vm5, %v2660_v49  ;;  %4190 = vmatmul.msk.bf16.gmra.mxu0 %vm991_vm5, %v3132_v29  ;;  %v3381_v46 = vadd.f32 %v3357_v22, %v3309_v59  ;;  %v5542_v29 = vpop.f32.mrf.mxu1  ;;  %v3135_v23 = vor.u32 %v3133_v20, %v3131_v27 }
 0x3c5   : > { %v2669_v22 = vsel %vm1116_vm4, %v2659_v5, %v2668_v47  ;;  %v2454_v59 = vadd.f32 %v5469_v16, %v5381_v21 }
 0x3c6   : > { %v3286_v7 = vadd.f32 %v5519_v2, %v3258_v12  ;;  %v2881_v6 = vpop.f32.mrf.mxu3  ;;  %v4442_v12 = vunpack.c.h.b16 %v5540_v4  ;;  %v3140_v27 = vsel %vm1430_vm6, %v3135_v23, %v3139_v52 }
 0x3c7   : > { %v2732_v9 = vpop.f32.mrf.mxu2 }
 0x3c8   : > { %v3334_v57 = vmin.f32 %v3286_v7, 0.0  ;;  %v2789_v28 = vadd.f32 %v2732_v9, %v2452_v14  ;;  %v3310_v39 = vmax.f32 %v3286_v7, 0.0 }
 0x3c9   : > { %v3204_v19 = vpop.f32.mrf.mxu0 }
 0x3ca   : > { %v3358_v17 = vmul.f32 %v3334_v57, %v5039_v41  ;;  %v2938_v56 = vadd.f32 %v2881_v6, %v2789_v28  ;;  %v2562_v57 = vpack.c.b16 %v4442_v12, %v4442_v12  ;;  %v3035_v28 = vunpack.c.l.b16 %v2984_v25 }
 0x3cc   : > { %v3382_v31 = vadd.f32 %v3358_v17, %v3310_v39  ;;  %v3259_v49 = vadd.f32 %v3202_v33, %v2938_v56  ;;  %v4617_v33 = vld [vmem:[#allocation2 + $0x70] sm:$0xff]   ;;  %v2671_v32 = vshrl.u32 %v2562_v57, 16  ;;  %v2674_v20 = vshll.u32 %v2562_v57, 16  ;;  %v5557_v17 = vpop.f32.mrf.mxu1 }
 0x3cd   : > { %v3048_v60 = vpack.c.b16 %v3035_v28, %v3035_v28  ;;  %v2455_v28 = vadd.f32 %v5475_v0, %v5390_v15 }
 0x3ce   : > { %v3405_v3 = vpack.c.bf16 %v3382_v31, %v3381_v46  ;;  %v2883_v37 = vpop.f32.mrf.mxu3  ;;  %v3287_v7 = vadd.f32 %v5519_v2, %v3259_v49  ;;  %v2673_v23 = vrot.slane %v2671_v32, 3  ;;  %v2676_v12 = vrot.slane %v2674_v20, 4 }
 0x3cf   : > { %v2734_v14 = vpop.f32.mrf.mxu2 }
 0x3d0   : > { %v2790_v6 = vadd.f32 %v2734_v14, %v2453_v11  ;;  %4193 = vmatmul.msk.bf16.vlgmr.msra.gmra.mxu1 %vm991_vm5, %v3405_v3  ;;  %v3335_v40 = vmin.f32 %v3287_v7, 0.0  ;;  %v3141_v11 = vshrl.u32 %v5532_v55, 16  ;;  %v3145_v3 = vshll.u32 %v3048_v60, 16 }
 0x3d1   : > { %v3207_v9 = vpop.f32.mrf.mxu0 }
 0x3d2   : > { %v2939_v35 = vadd.f32 %v2883_v37, %v2790_v6  ;;  %v3359_v46 = vmul.f32 %v3335_v40, %v5039_v41  ;;  %v3311_v37 = vmax.f32 %v3287_v7, 0.0  ;;  %v3147_v57 = vrot.slane %v3145_v3, 1 }
 0x3d3   : > { %4131 = vmatmul.msk.bf16.gmra.mxu3 %vm991_vm5, %v4617_v33 }
 0x3d4   : > { %v3260_v45 = vadd.f32 %v3204_v19, %v2939_v35  ;;  %4119 = vmatmul.msk.bf16.gmra.mxu2 %vm991_vm5, %v2669_v22  ;;  %4191 = vmatmul.msk.bf16.gmra.mxu0 %vm991_vm5, %v3140_v27  ;;  %v3383_v6 = vadd.f32 %v3359_v46, %v3311_v37  ;;  %v2677_v22 = vor.u32 %v2676_v12, %v2673_v23  ;;  %v5566_v7 = vpop.f32.mrf.mxu1 }
 0x3d5   : > { %v3143_v27 = vor.u32 %v3141_v11, %v3139_v52 }
 0x3d6   : > { %v3288_v5 = vadd.f32 %v5519_v2, %v3260_v45  ;;  %v2886_v39 = vpop.f32.mrf.mxu3 }
 0x3d7   : > { %v2737_v56 = vpop.f32.mrf.mxu2  ;;  %v3148_v60 = vsel %vm1430_vm6, %v3143_v27, %v3147_v57 }
 0x3d8   : > { %v3336_v31 = vmin.f32 %v3288_v5, 0.0  ;;  %v2791_v19 = vadd.f32 %v2737_v56, %v2454_v59  ;;  %v3312_v25 = vmax.f32 %v3288_v5, 0.0  ;;  %v2456_v59 = vadd.f32 %v5485_v1, %v5396_v26 }
 0x3d9   : > { %v3209_v49 = vpop.f32.mrf.mxu0  ;;  %v2457_v26 = vadd.f32 %v5497_v8, %v5403_v48 }
 0x3da   : > { %v3360_v21 = vmul.f32 %v3336_v31, %v5039_v41  ;;  %v2940_v16 = vadd.f32 %v2886_v39, %v2791_v19 }
 0x3dc   : > { %v3261_v14 = vadd.f32 %v3207_v9, %v2940_v16  ;;  %v3384_v33 = vadd.f32 %v3360_v21, %v3312_v25  ;;  %v2678_v9 = vsel %vm1116_vm4, %v2668_v47, %v2677_v22  ;;  %v5579_v11 = vpop.f32.mrf.mxu1 }
 0x3de   : > { %v2888_v35 = vpop.f32.mrf.mxu3  ;;  %v3406_v40 = vpack.c.bf16 %v3384_v33, %v3383_v6  ;;  %v3289_v55 = vadd.f32 %v5519_v2, %v3261_v14 }
 0x3df   : > { %v2739_v45 = vpop.f32.mrf.mxu2 }
 0x3e0   : > { %v2792_v32 = vadd.f32 %v2739_v45, %v2455_v28  ;;  %4194 = vmatmul.msk.bf16.gmra.mxu1 %vm991_vm5, %v3406_v40  ;;  %v3337_v15 = vmin.f32 %v3289_v55, 0.0  ;;  %v3313_v23 = vmax.f32 %v3289_v55, 0.0 }
 0x3e1   : > { %v3212_v20 = vpop.f32.mrf.mxu0 }
 0x3e2   : > { %v2941_v52 = vadd.f32 %v2888_v35, %v2792_v32  ;;  %v3361_v47 = vmul.f32 %v3337_v15, %v5039_v41  ;;  %v2458_v35 = vadd.f32 %v5502_v24, %v5407_v50  ;;  %v2459_v50 = vadd.f32 %v5514_v42, %v5414_v34 }
 0x3e3   : > { %4132 = vmatmul.msk.bf16.gmra.mxu3 %vm991_vm5, %v5540_v4 }
 0x3e4   : > { %v3262_v0 = vadd.f32 %v3209_v49, %v2941_v52  ;;  %4120 = vmatmul.msk.bf16.gmra.mxu2 %vm991_vm5, %v2678_v9  ;;  %4192 = vmatmul.msk.bf16.gmra.mxu0 %vm991_vm5, %v3148_v60  ;;  %v3385_v37 = vadd.f32 %v3361_v47, %v3313_v23  ;;  %v5585_v28 = vpop.f32.mrf.mxu1 }
 0x3e6   : > { %v3290_v5 = vadd.f32 %v5519_v2, %v3262_v0  ;;  %v2891_v39 = vpop.f32.mrf.mxu3 }
 0x3e7   : > { %v2742_v56 = vpop.f32.mrf.mxu2 }
 0x3e8   : > { %v3338_v46 = vmin.f32 %v3290_v5, 0.0  ;;  %v2793_v31 = vadd.f32 %v2742_v56, %v2456_v59  ;;  %v3314_v4 = vmax.f32 %v3290_v5, 0.0 }
 0x3e9   : > { %v3214_v19 = vpop.f32.mrf.mxu0 }
 0x3ea   : > { %v3362_v49 = vmul.f32 %v3338_v46, %v5039_v41  ;;  %v2942_v12 = vadd.f32 %v2891_v39, %v2793_v31 }
 0x3ec   : > { %v3263_v3 = vadd.f32 %v3212_v20, %v2942_v12  ;;  %v3386_v25 = vadd.f32 %v3362_v49, %v3314_v4  ;;  %v5594_v56 = vpop.f32.mrf.mxu1  ;;  %v2460_v12 = vadd.f32 %v5526_v61, %v5418_v54  ;;  %v2461_v54 = vadd.f32 %v5542_v29, %v5425_v30 }
 0x3ee   : > { %v2893_v1 = vpop.f32.mrf.mxu3  ;;  %v3407_v21 = vpack.c.bf16 %v3386_v25, %v3385_v37  ;;  %v3291_v14 = vadd.f32 %v5519_v2, %v3263_v3 }
 0x3ef   : > { %v2744_v16 = vpop.f32.mrf.mxu2 }
 0x3f0   : > { %v2794_v6 = vadd.f32 %v2744_v16, %v2457_v26  ;;  %4195 = vmatmul.msk.bf16.gmra.mxu1 %vm991_vm5, %v3407_v21  ;;  %v3339_v27 = vmin.f32 %v3291_v14, 0.0  ;;  %v3315_v9 = vmax.f32 %v3291_v14, 0.0 }
 0x3f1   : > { %v3217_v33 = vpop.f32.mrf.mxu0 }
 0x3f2   : > { %v2943_v22 = vadd.f32 %v2893_v1, %v2794_v6  ;;  %v3363_v45 = vmul.f32 %v3339_v27, %v5039_v41 }
 0x3f4   : > { %v3264_v57 = vadd.f32 %v3214_v19, %v2943_v22  ;;  %v3387_v59 = vadd.f32 %v3363_v45, %v3315_v9  ;;  %v5602_v1 = vpop.f32.mrf.mxu1 }
 0x3f6   : > { %v3292_v40 = vadd.f32 %v5519_v2, %v3264_v57  ;;  %v2896_v48 = vpop.f32.mrf.mxu3 }
 0x3f7   : > { %v2747_v8 = vpop.f32.mrf.mxu2 }
 0x3f8   : > { %v3340_v55 = vmin.f32 %v3292_v40, 0.0  ;;  %v2795_v32 = vadd.f32 %v2747_v8, %v2458_v35  ;;  %v3316_v60 = vmax.f32 %v3292_v40, 0.0 }
 0x3f9   : > { %v3219_v20 = vpop.f32.mrf.mxu0 }
 0x3fa   : > { %v3364_v52 = vmul.f32 %v3340_v55, %v5039_v41  ;;  %v2944_v15 = vadd.f32 %v2896_v48, %v2795_v32 }
 0x3fc   : > { %v3265_v0 = vadd.f32 %v3217_v33, %v2944_v15  ;;  %v3388_v5 = vadd.f32 %v3364_v52, %v3316_v60  ;;  %v5609_v32 = vpop.f32.mrf.mxu1  ;;  %v2462_v60 = vadd.f32 %v5557_v17, %v5429_v18  ;;  %v2463_v18 = vadd.f32 %v5566_v7, %v5438_v62 }
 0x3fe   : > { %v2898_v24 = vpop.f32.mrf.mxu3  ;;  %v3408_v39 = vpack.c.bf16 %v3388_v5, %v3387_v59  ;;  %v3293_v46 = vadd.f32 %v5519_v2, %v3265_v0 }
 0x3ff   : > { %v2749_v47 = vpop.f32.mrf.mxu2 }
 0x400   : > { %v2796_v31 = vadd.f32 %v2749_v47, %v2459_v50  ;;  %4196 = vmatmul.msk.bf16.gmra.mxu1 %vm991_vm5, %v3408_v39  ;;  %v3341_v4 = vmin.f32 %v3293_v46, 0.0  ;;  %v3317_v16 = vmax.f32 %v3293_v46, 0.0 }
 0x401   : > { %v3222_v19 = vpop.f32.mrf.mxu0 }
 0x402   : > { %v2945_v23 = vadd.f32 %v2898_v24, %v2796_v31  ;;  %v3365_v37 = vmul.f32 %v3341_v4, %v5039_v41 }
 0x404   : > { %v3266_v49 = vadd.f32 %v3219_v20, %v2945_v23  ;;  %v3389_v27 = vadd.f32 %v3365_v37, %v3317_v16  ;;  %v5616_v23 = vpop.f32.mrf.mxu1 }
 0x406   : > { %v3294_v3 = vadd.f32 %v5519_v2, %v3266_v49  ;;  %v2901_v34 = vpop.f32.mrf.mxu3 }
 0x407   : > { %v2752_v42 = vpop.f32.mrf.mxu2 }
 0x408   : > { %v3342_v25 = vmin.f32 %v3294_v3, 0.0  ;;  %v2797_v26 = vadd.f32 %v2752_v42, %v2460_v12  ;;  %v3318_v14 = vmax.f32 %v3294_v3, 0.0 }
 0x409   : > { %v3224_v21 = vpop.f32.mrf.mxu0 }
 0x40a   : > { %v3366_v6 = vmul.f32 %v3342_v25, %v5039_v41  ;;  %v2946_v33 = vadd.f32 %v2901_v34, %v2797_v26  ;;  %v2464_v26 = vadd.f32 %v5579_v11, %v5444_v51  ;;  %v2465_v51 = vadd.f32 %v5585_v28, %v5453_v38 }
 0x40c   : > { %v3267_v22 = vadd.f32 %v3222_v19, %v2946_v33  ;;  %v3390_v57 = vadd.f32 %v3366_v6, %v3318_v14  ;;  %v5625_v14 = vpop.f32.mrf.mxu1 }
 0x40e   : > { %v2903_v61 = vpop.f32.mrf.mxu3  ;;  %v3409_v35 = vpack.c.bf16 %v3390_v57, %v3389_v27  ;;  %v3295_v48 = vadd.f32 %v5519_v2, %v3267_v22 }
 0x40f   : > { %v2754_v40 = vpop.f32.mrf.mxu2 }
 0x410   : > { %v2798_v8 = vadd.f32 %v2754_v40, %v2461_v54  ;;  %4197 = vmatmul.msk.bf16.gmra.mxu1 %vm991_vm5, %v3409_v35  ;;  %v3343_v20 = vmin.f32 %v3295_v48, 0.0  ;;  %v3319_v50 = vmax.f32 %v3295_v48, 0.0 }
 0x411   : > { %v3227_v45 = vpop.f32.mrf.mxu0 }
 0x412   : > { %v2947_v55 = vadd.f32 %v2903_v61, %v2798_v8  ;;  %v3367_v15 = vmul.f32 %v3343_v20, %v5039_v41 }
 0x414   : > { %v3268_v9 = vadd.f32 %v3224_v21, %v2947_v55  ;;  %v3391_v31 = vadd.f32 %v3367_v15, %v3319_v50  ;;  %v2466_v15 = vadd.f32 %v5594_v56, %v5457_v58  ;;  %v2467_v58 = vadd.f32 %v5602_v1, %v5466_v63 }
 0x416   : > { %v3296_v52 = vadd.f32 %v5519_v2, %v3268_v9  ;;  %v2906_v30 = vpop.f32.mrf.mxu3  ;;  %v5633_v9 = vpop.f32.mrf.mxu1 }
 0x417   : > { %v2757_v29 = vpop.f32.mrf.mxu2 }
 0x418   : > { %v3344_v0 = vmin.f32 %v3296_v52, 0.0  ;;  %v2799_v59 = vadd.f32 %v2757_v29, %v2462_v60  ;;  %v3320_v24 = vmax.f32 %v3296_v52, 0.0 }
 0x419   : > { %v3229_v5 = vpop.f32.mrf.mxu0 }
 0x41a   : > { %v3368_v39 = vmul.f32 %v3344_v0, %v5039_v41  ;;  %v2948_v47 = vadd.f32 %v2906_v30, %v2799_v59 }
 0x41c   : > { %v3269_v46 = vadd.f32 %v3227_v45, %v2948_v47  ;;  %v3392_v19 = vadd.f32 %v3368_v39, %v3320_v24 }
 0x41e   : > { %v2908_v17 = vpop.f32.mrf.mxu3  ;;  %v3410_v4 = vpack.c.bf16 %v3392_v19, %v3391_v31  ;;  %v3297_v12 = vadd.f32 %v5519_v2, %v3269_v46  ;;  %v5640_v19 = vpop.f32.mrf.mxu1 }
 0x41f   : > { %v2759_v49 = vpop.f32.mrf.mxu2 }
 0x420   : > { %v2800_v3 = vadd.f32 %v2759_v49, %v2463_v18  ;;  %4198 = vmatmul.msk.bf16.gmra.mxu1 %vm991_vm5, %v3410_v4  ;;  %v3345_v37 = vmin.f32 %v3297_v12, 0.0  ;;  %v3321_v27 = vmax.f32 %v3297_v12, 0.0 }
 0x421   : > { %v3232_v34 = vpop.f32.mrf.mxu0 }
 0x422   : > { %v2949_v42 = vadd.f32 %v2908_v17, %v2800_v3  ;;  %v3369_v7 = vmul.f32 %v3345_v37, %v5039_v41 }
 0x424   : > { %v3270_v25 = vadd.f32 %v3229_v5, %v2949_v42  ;;  %v3393_v40 = vadd.f32 %v3369_v7, %v3321_v27 }
 0x426   : > { %v3298_v21 = vadd.f32 %v5519_v2, %v3270_v25  ;;  %v2911_v16 = vpop.f32.mrf.mxu3 }
 0x427   : > { %v2762_v62 = vpop.f32.mrf.mxu2 }
 0x428   : > { %v3346_v6 = vmin.f32 %v3298_v21, 0.0  ;;  %v2801_v33 = vadd.f32 %v2762_v62, %v2464_v26  ;;  %v3322_v57 = vmax.f32 %v3298_v21, 0.0  ;;  %v5646_v21 = vpop.f32.mrf.mxu1 }
 0x429   : > { %v3234_v22 = vpop.f32.mrf.mxu0 }
 0x42a   : > { %v3370_v54 = vmul.f32 %v3346_v6, %v5039_v41  ;;  %v2950_v61 = vadd.f32 %v2911_v16, %v2801_v33  ;;  %v2468_v16 = vadd.f32 %v5609_v32, %v5472_v10 }
 0x42c   : > { %v3271_v35 = vadd.f32 %v3232_v34, %v2950_v61  ;;  %v3394_v48 = vadd.f32 %v3370_v54, %v3322_v57 }
 0x42e   : > { %v2913_v11 = vpop.f32.mrf.mxu3  ;;  %v3411_v8 = vpack.c.bf16 %v3394_v48, %v3393_v40  ;;  %v3299_v55 = vadd.f32 %v5519_v2, %v3271_v35  ;;  %v5657_v35 = vld [vmem:[%s5777_s6] ss:$0 sm:$0xff] }
 0x42f   : > { %v2764_v45 = vpop.f32.mrf.mxu2 }
 0x430   : > { %v2802_v20 = vadd.f32 %v2764_v45, %v2465_v51  ;;  %4199 = vmatmul.msk.bf16.gmra.mxu1 %vm991_vm5, %v3411_v8  ;;  %v3347_v30 = vmin.f32 %v3299_v55, 0.0  ;;  %v3323_v39 = vmax.f32 %v3299_v55, 0.0  ;;  %v2469_v8 = vadd.f32 %v5616_v23, %v5481_v36 }
 0x431   : > { %v3237_v60 = vpop.f32.mrf.mxu0 }
 0x432   : > { %v2951_v52 = vadd.f32 %v2913_v11, %v2802_v20  ;;  %v3371_v59 = vmul.f32 %v3347_v30, %v5039_v41 }
 0x434   : > { %v3272_v29 = vadd.f32 %v3234_v22, %v2951_v52  ;;  %v3395_v17 = vadd.f32 %v3371_v59, %v3323_v39  ;;  %v4444_v22 = vld [vmem:[%s5002_s30] sm:$0xff]  }
 0x435   : > { %v4445_v40 = vunpack.c.l.bf16 %v4444_v22 }
 0x436   : > { %v3300_v0 = vadd.f32 %v5519_v2, %v3272_v29  ;;  %v2916_v38 = vpop.f32.mrf.mxu3 }
 0x437   : > { %v2767_v28 = vpop.f32.mrf.mxu2 }
 0x438   : > { %v3348_v5 = vmin.f32 %v3300_v0, 0.0  ;;  %v2803_v50 = vadd.f32 %v2767_v28, %v2466_v15  ;;  %v3324_v47 = vmax.f32 %v3300_v0, 0.0 }
 0x439   : > { %v3239_v24 = vpop.f32.mrf.mxu0 }
 0x43a   : > { %v3372_v46 = vmul.f32 %v3348_v5, %v5039_v41  ;;  %v2952_v31 = vadd.f32 %v2916_v38, %v2803_v50  ;;  %v4446_v38 = vunpack.c.h.bf16 %v4444_v22 }
 0x43c   : > { %v3273_v18 = vadd.f32 %v3237_v60, %v2952_v31  ;;  %v3396_v4 = vadd.f32 %v3372_v46, %v3324_v47  ;;  %v2470_v31 = vadd.f32 %v5625_v14, %v5487_v43 }
 0x43e   : > { %v2918_v56 = vpop.f32.mrf.mxu3  ;;  %v3412_v49 = vpack.c.bf16 %v3396_v4, %v3395_v17  ;;  %v3301_v3 = vadd.f32 %v5519_v2, %v3273_v18 }
 0x43f   : > { %v2769_v12 = vpop.f32.mrf.mxu2 }
 0x440   : > { %v2804_v34 = vadd.f32 %v2769_v12, %v2467_v58  ;;  %4200 = vmatmul.msk.bf16.gmra.mxu1 %vm991_vm5, %v3412_v49  ;;  %v3349_v25 = vmin.f32 %v3301_v3, 0.0  ;;  %v3325_v27 = vmax.f32 %v3301_v3, 0.0 }
 0x441   : > { %v3242_v37 = vpop.f32.mrf.mxu0 }
 0x442   : > { %v2953_v42 = vadd.f32 %v2918_v56, %v2804_v34  ;;  %v3373_v7 = vmul.f32 %v3349_v25, %v5039_v41 }
 0x444   : > { %v3274_v26 = vadd.f32 %v3239_v24, %v2953_v42  ;;  %v3397_v48 = vadd.f32 %v3373_v7, %v3325_v27 }
 0x446   : > { %v3302_v63 = vadd.f32 %v5519_v2, %v3274_v26  ;;  %v2921_v1 = vpop.f32.mrf.mxu3 }
 0x447   : > { %v2772_v62 = vpop.f32.mrf.mxu2 }
 0x448   : > { %v3350_v6 = vmin.f32 %v3302_v63, 0.0  ;;  %v2805_v33 = vadd.f32 %v2772_v62, %v2468_v16  ;;  %v3326_v57 = vmax.f32 %v3302_v63, 0.0 }
 0x449   : > { %v3244_v32 = vpop.f32.mrf.mxu0 }
 0x44a   : > { %v3374_v54 = vmul.f32 %v3350_v6, %v5039_v41  ;;  %v2954_v61 = vadd.f32 %v2921_v1, %v2805_v33  ;;  %v2471_v1 = vadd.f32 %v5633_v9, %v5494_v44  ;;  %v2472_v44 = vadd.f32 %v5640_v19, %v5500_v53 }
 0x44c   : > { %v3275_v10 = vadd.f32 %v3242_v37, %v2954_v61  ;;  %v3398_v51 = vadd.f32 %v3374_v54, %v3326_v57  ;;  %v4619_v61 = vld [vmem:[%s5002_s30 + $0x8] sm:$0xff]  }
 0x44d   : > { %v3470_v11 = vpop.f32.mrf.mxu1 }
 0x44e   : > { %v3471_v45 = vadd.f32 %v5657_v35, %v3470_v11  ;;  %v2923_v55 = vpop.f32.mrf.mxu3  ;;  %v3413_v20 = vpack.c.bf16 %v3398_v51, %v3397_v48  ;;  %v3303_v52 = vadd.f32 %v5519_v2, %v3275_v10  ;;  %v4449_v48 = vunpack.c.l.bf16 %v4619_v61 }
 0x44f   : > { %v2774_v60 = vpop.f32.mrf.mxu2 }
 0x450   : > { %v3526_v30 = vadd.f32 %v4445_v40, %v3471_v45  ;;  %v2806_v29 = vadd.f32 %v2774_v60, %v2469_v8  ;;  %4201 = vmatmul.msk.bf16.gmra.mxu1 %vm991_vm5, %v3413_v20  ;;  %v3351_v28 = vmin.f32 %v3303_v52, 0.0  ;;  %v3327_v12 = vmax.f32 %v3303_v52, 0.0 }
 0x451   : > { %v3247_v39 = vpop.f32.mrf.mxu0 }
 0x452   : > { %v3530_v15 = vmin.f32 %v3526_v30, 0.0  ;;  %v2955_v0 = vadd.f32 %v2923_v55, %v2806_v29  ;;  %v3528_v59 = vmax.f32 %v3526_v30, 0.0  ;;  %v3375_v17 = vmul.f32 %v3351_v28, %v5039_v41 }
 0x454   : > { %v3532_v5 = vmul.f32 %v3530_v15, %v5039_v41  ;;  %v3276_v50 = vadd.f32 %v3244_v32, %v2955_v0  ;;  %v3399_v14 = vadd.f32 %v3375_v17, %v3327_v12 }
 0x455   : > { %v3472_v36 = vpop.f32.mrf.mxu1 }
 0x456   : > { %v3534_v23 = vadd.f32 %v3532_v5, %v3528_v59  ;;  %v3304_v24 = vadd.f32 %v5519_v2, %v3276_v50  ;;  %v3473_v47 = vadd.f32 %v5657_v35, %v3472_v36  ;;  %v2926_v46 = vpop.f32.mrf.mxu3  ;;  %v4450_v59 = vunpack.c.h.bf16 %v4619_v61 }
 0x457   : > { %v2777_v18 = vpop.f32.mrf.mxu2 }
 0x458   : > { %v3536_v4 = vpack.c.bf16 %v3534_v23, %v3534_v23  ;;  %v3352_v58 = vmin.f32 %v3304_v24, 0.0  ;;  %v3527_v56 = vadd.f32 %v4446_v38, %v3473_v47  ;;  %v2807_v49 = vadd.f32 %v2777_v18, %v2470_v31 }
 0x459   : > { %v3328_v3 = vmax.f32 %v3304_v24, 0.0  ;;  %v3249_v57 = vpop.f32.mrf.mxu0 }
 0x45a   : > { %3539 = vst.msk [vmem:[%s4948_s26] sm:$0xf] %vm3538_vm7, %v3536_v4  ;;  %v3376_v34 = vmul.f32 %v3352_v58, %v5039_v41  ;;  %v3531_v42 = vmin.f32 %v3527_v56, 0.0  ;;  %v2956_v37 = vadd.f32 %v2926_v46, %v2807_v49  ;;  %v3529_v25 = vmax.f32 %v3527_v56, 0.0 }
 0x45b   : > { %v2473_v46 = vadd.f32 %v5646_v21, %v5509_v13 }
 0x45c   : > { %v3533_v43 = vmul.f32 %v3531_v42, %v5039_v41  ;;  %v3400_v26 = vadd.f32 %v3376_v34, %v3328_v3  ;;  %v3277_v16 = vadd.f32 %v3247_v39, %v2956_v37 }
 0x45d   : > { %v3475_v63 = vpop.f32.mrf.mxu1 }
 0x45e   : > { %v3535_v62 = vadd.f32 %v3533_v43, %v3529_v25  ;;  %v2928_v7 = vpop.f32.mrf.mxu3  ;;  %v3414_v6 = vpack.c.bf16 %v3400_v26, %v3399_v14  ;;  %v3305_v27 = vadd.f32 %v5519_v2, %v3277_v16  ;;  %v4620_v63 = vld [vmem:[%s5002_s30 + $0x10] sm:$0xff]  }
 0x45f   : > { %v2779_v33 = vpop.f32.mrf.mxu2 }
 0x460   : > { %v3537_v22 = vpack.c.bf16 %v3535_v62, %v3535_v62  ;;  %v2808_v54 = vadd.f32 %v2779_v33, %v2471_v1  ;;  %4202 = vmatmul.msk.bf16.gmra.mxu1 %vm991_vm5, %v3414_v6  ;;  %v3353_v32 = vmin.f32 %v3305_v27, 0.0  ;;  %v3329_v30 = vmax.f32 %v3305_v27, 0.0 }
 0x461   : > { %v3252_v0 = vpop.f32.mrf.mxu0  ;;  %v4453_v6 = vunpack.c.l.bf16 %v4620_v63 }
 0x462   : > { %3540 = vst.msk [vmem:[%s4948_s26 + $0x4] sm:$0xf] %vm3538_vm7, %v3537_v22  ;;  %v2957_v10 = vadd.f32 %v2928_v7, %v2808_v54  ;;  %v3377_v45 = vmul.f32 %v3353_v32, %v5039_v41 }
 0x464   : > { %v3278_v40 = vadd.f32 %v3249_v57, %v2957_v10  ;;  %v3401_v5 = vadd.f32 %v3377_v45, %v3329_v30  ;;  %v4621_v30 = vld [vmem:[%s5002_s30 + $0x18] sm:$0xff]  }
 0x465   : > { %v3476_v51 = vpop.f32.mrf.mxu1 }
 0x466   : > { %v3306_v9 = vadd.f32 %v5519_v2, %v3278_v40  ;;  %v3477_v11 = vadd.f32 %v5657_v35, %v3476_v51  ;;  %v2931_v60 = vpop.f32.mrf.mxu3  ;;  %v4454_v40 = vunpack.c.h.bf16 %v4620_v63 }
 0x467   : > { %v2782_v8 = vpop.f32.mrf.mxu2 }
 0x468   : > { %v3354_v55 = vmin.f32 %v3306_v9, 0.0  ;;  %v3545_v20 = vadd.f32 %v4449_v48, %v3477_v11  ;;  %v2809_v52 = vadd.f32 %v2782_v8, %v2472_v44  ;;  %v3330_v29 = vmax.f32 %v3306_v9, 0.0 }
 0x469   : > { %v3254_v3 = vpop.f32.mrf.mxu0 }
 0x46a   : > { %v3378_v15 = vmul.f32 %v3354_v55, %v5039_v41  ;;  %v3549_v38 = vmin.f32 %v3545_v20, 0.0  ;;  %v2958_v28 = vadd.f32 %v2931_v60, %v2809_v52  ;;  %v3547_v53 = vmax.f32 %v3545_v20, 0.0 }
 0x46c   : > { %v3551_v19 = vmul.f32 %v3549_v38, %v5039_v41  ;;  %v3402_v50 = vadd.f32 %v3378_v15, %v3330_v29  ;;  %v3279_v36 = vadd.f32 %v3252_v0, %v2958_v28  ;;  %v4457_v29 = vunpack.c.l.bf16 %v4621_v30 }
 0x46d   : > { %v3479_v23 = vpop.f32.mrf.mxu1 }
 0x46e   : > { %v3553_v24 = vadd.f32 %v3551_v19, %v3547_v53  ;;  %v3480_v39 = vadd.f32 %v5657_v35, %v3479_v23  ;;  %v3415_v47 = vpack.c.bf16 %v3402_v50, %v3401_v5  ;;  %v3307_v4 = vadd.f32 %v5519_v2, %v3279_v36  ;;  %v2933_v49 = vpop.f32.mrf.mxu3 }
 0x46f   : > { %v2784_v31 = vpop.f32.mrf.mxu2  ;;  %v4458_v19 = vunpack.c.h.bf16 %v4621_v30 }
 0x470   : > { %v3555_v18 = vpack.c.bf16 %v3553_v24, %v3553_v24  ;;  %v3546_v17 = vadd.f32 %v4450_v59, %v3480_v39  ;;  %4203 = vmatmul.msk.bf16.gmra.mxu1 %vm991_vm5, %v3415_v47  ;;  %v2810_v58 = vadd.f32 %v2784_v31, %v2473_v46  ;;  %v3355_v13 = vmin.f32 %v3307_v4, 0.0 }
 0x471   : > { %v3331_v1 = vmax.f32 %v3307_v4, 0.0  ;;  %v4622_v4 = vld [vmem:[%s5002_s30 + $0x20] sm:$0xff]  }
 0x472   : > { %4207 = vst.msk [vmem:[%s4948_s26 + $0x8] sm:$0xf] %vm3538_vm7, %v3555_v18  ;;  %v3550_v56 = vmin.f32 %v3546_v17, 0.0  ;;  %v2959_v12 = vadd.f32 %v2933_v49, %v2810_v58  ;;  %v3548_v34 = vmax.f32 %v3546_v17, 0.0  ;;  %v3379_v26 = vmul.f32 %v3355_v13, %v5039_v41 }
 0x473   : > { %v4461_v58 = vunpack.c.l.bf16 %v4622_v4  ;;  %v4462_v13 = vunpack.c.h.bf16 %v4622_v4 }
 0x474   : > { %v3552_v42 = vmul.f32 %v3550_v56, %v5039_v41  ;;  %v3280_v21 = vadd.f32 %v3254_v3, %v2959_v12  ;;  %v3403_v22 = vadd.f32 %v3379_v26, %v3331_v1 }
 0x475   : > { %v3481_v37 = vpop.f32.mrf.mxu1 }
 0x476   : > { %v3554_v25 = vadd.f32 %v3552_v42, %v3548_v34  ;;  %v3308_v43 = vadd.f32 %v5519_v2, %v3280_v21 }
 0x478   : > { %v3556_v14 = vpack.c.bf16 %v3554_v25, %v3554_v25  ;;  %v3356_v16 = vmin.f32 %v3308_v43, 0.0  ;;  %v3332_v62 = vmax.f32 %v3308_v43, 0.0 }
 0x47a   : > { %4208 = vst.msk [vmem:[%s4948_s26 + $0xc] sm:$0xf] %vm3538_vm7, %v3556_v14  ;;  %v3380_v7 = vmul.f32 %v3356_v16, %v5039_v41 }
 0x47c   : > { %v3404_v27 = vadd.f32 %v3380_v7, %v3332_v62 }
 0x47d   : > { %v3483_v33 = vpop.f32.mrf.mxu1 }
 0x47e   : > { %v3484_v57 = vadd.f32 %v5657_v35, %v3483_v33  ;;  %v3416_v54 = vpack.c.bf16 %v3404_v27, %v3403_v22 }
 0x480   : > { %v3564_v2 = vadd.f32 %v4453_v6, %v3484_v57  ;;  %4204 = vmatmul.msk.bf16.gmra.mxu1 %vm991_vm5, %v3416_v54  ;;  %v4623_v6 = vld [vmem:[%s5002_s30 + $0x28] sm:$0xff]  }
 0x481   : > { %v4465_v33 = vunpack.c.l.bf16 %v4623_v6 }
 0x482   : > { %v3568_v61 = vmin.f32 %v3564_v2, 0.0  ;;  %v3566_v10 = vmax.f32 %v3564_v2, 0.0 }
 0x484   : > { %v3570_v32 = vmul.f32 %v3568_v61, %v5039_v41 }
 0x485   : > { %v3485_v48 = vpop.f32.mrf.mxu1 }
 0x486   : > { %v3572_v51 = vadd.f32 %v3570_v32, %v3566_v10  ;;  %v3486_v44 = vadd.f32 %v5657_v35, %v3485_v48  ;;  %v4466_v10 = vunpack.c.h.bf16 %v4623_v6 }
 0x488   : > { %v3574_v9 = vpack.c.bf16 %v3572_v51, %v3572_v51  ;;  %v3565_v11 = vadd.f32 %v4454_v40, %v3486_v44 }
 0x48a   : > { %4211 = vst.msk [vmem:[%s4948_s26 + $0x10] sm:$0xf] %vm3538_vm7, %v3574_v9  ;;  %v3569_v8 = vmin.f32 %v3565_v11, 0.0  ;;  %v3567_v45 = vmax.f32 %v3565_v11, 0.0 }
 0x48c   : > { %v3571_v55 = vmul.f32 %v3569_v8, %v5039_v41 }
 0x48d   : > { %v3488_v20 = vpop.f32.mrf.mxu1 }
 0x48e   : > { %v3573_v60 = vadd.f32 %v3571_v55, %v3567_v45 }
 0x490   : > { %v3575_v52 = vpack.c.bf16 %v3573_v60, %v3573_v60  ;;  %v4624_v60 = vld [vmem:[%s5002_s30 + $0x30] sm:$0xff]  }
 0x492   : > { %4212 = vst.msk [vmem:[%s4948_s26 + $0x14] sm:$0xf] %vm3538_vm7, %v3575_v52  ;;  %v4469_v52 = vunpack.c.l.bf16 %v4624_v60 }
 0x495   : > { %v3489_v15 = vpop.f32.mrf.mxu1 }
 0x496   : > { %v3490_v0 = vadd.f32 %v5657_v35, %v3489_v15 }
 0x498   : > { %v3583_v38 = vadd.f32 %v4457_v29, %v3490_v0 }
 0x49a   : > { %v3587_v28 = vmin.f32 %v3583_v38, 0.0  ;;  %v3585_v59 = vmax.f32 %v3583_v38, 0.0 }
 0x49c   : > { %v3589_v53 = vmul.f32 %v3587_v28, %v5039_v41 }
 0x49d   : > { %v3492_v5 = vpop.f32.mrf.mxu1 }
 0x49e   : > { %v3591_v50 = vadd.f32 %v3589_v53, %v3585_v59  ;;  %v3493_v36 = vadd.f32 %v5657_v35, %v3492_v5  ;;  %v4470_v59 = vunpack.c.h.bf16 %v4624_v60 }
 0x4a0   : > { %v3593_v23 = vpack.c.bf16 %v3591_v50, %v3591_v50  ;;  %v3584_v24 = vadd.f32 %v4458_v19, %v3493_v36 }
 0x4a2   : > { %4215 = vst.msk [vmem:[%s4948_s26 + $0x18] sm:$0xf] %vm3538_vm7, %v3593_v23  ;;  %v3588_v39 = vmin.f32 %v3584_v24, 0.0  ;;  %v3586_v47 = vmax.f32 %v3584_v24, 0.0 }
 0x4a4   : > { %v3590_v46 = vmul.f32 %v3588_v39, %v5039_v41 }
 0x4a5   : > { %v3494_v31 = vpop.f32.mrf.mxu1 }
 0x4a6   : > { %v3592_v18 = vadd.f32 %v3590_v46, %v3586_v47 }
 0x4a8   : > { %v3594_v17 = vpack.c.bf16 %v3592_v18, %v3592_v18  ;;  %v4625_v18 = vld [vmem:[%s5002_s30 + $0x38] sm:$0xff]  }
 0x4aa   : > { %4216 = vst.msk [vmem:[%s4948_s26 + $0x1c] sm:$0xf] %vm3538_vm7, %v3594_v17  ;;  %v4473_v17 = vunpack.c.l.bf16 %v4625_v18 }
 0x4ad   : > { %v3496_v56 = vpop.f32.mrf.mxu1 }
 0x4ae   : > { %v3497_v49 = vadd.f32 %v5657_v35, %v3496_v56 }
 0x4b0   : > { %v3602_v12 = vadd.f32 %v4461_v58, %v3497_v49 }
 0x4b2   : > { %v3606_v3 = vmin.f32 %v3602_v12, 0.0  ;;  %v3604_v34 = vmax.f32 %v3602_v12, 0.0 }
 0x4b4   : > { %v3608_v42 = vmul.f32 %v3606_v3, %v5039_v41 }
 0x4b5   : > { %v3498_v21 = vpop.f32.mrf.mxu1 }
 0x4b6   : > { %v3610_v37 = vadd.f32 %v3608_v42, %v3604_v34  ;;  %v3499_v25 = vadd.f32 %v5657_v35, %v3498_v21  ;;  %v4474_v34 = vunpack.c.h.bf16 %v4625_v18 }
 0x4b8   : > { %v3612_v43 = vpack.c.bf16 %v3610_v37, %v3610_v37  ;;  %v3603_v14 = vadd.f32 %v4462_v13, %v3499_v25 }
 0x4ba   : > { %4219 = vst.msk [vmem:[%s4948_s26 + $0x20] sm:$0xf] %vm3538_vm7, %v3612_v43  ;;  %v3607_v26 = vmin.f32 %v3603_v14, 0.0  ;;  %v3605_v16 = vmax.f32 %v3603_v14, 0.0 }
 0x4bc   : > { %v3609_v63 = vmul.f32 %v3607_v26, %v5039_v41 }
 0x4bd   : > { %v3501_v1 = vpop.f32.mrf.mxu1 }
 0x4be   : > { %v3611_v62 = vadd.f32 %v3609_v63, %v3605_v16 }
 0x4c0   : > { %v3613_v7 = vpack.c.bf16 %v3611_v62, %v3611_v62 }
 0x4c2   : > { %4220 = vst.msk [vmem:[%s4948_s26 + $0x24] sm:$0xf] %vm3538_vm7, %v3613_v7 }
 0x4c5   : > { %v3502_v22 = vpop.f32.mrf.mxu1 }
 0x4c6   : > { %v3503_v27 = vadd.f32 %v5657_v35, %v3502_v22 }
 0x4c8   : > { %v3621_v57 = vadd.f32 %v4465_v33, %v3503_v27 }
 0x4ca   : > { %v3625_v54 = vmin.f32 %v3621_v57, 0.0  ;;  %v3623_v2 = vmax.f32 %v3621_v57, 0.0 }
 0x4cc   : > { %v3627_v61 = vmul.f32 %v3625_v54, %v5039_v41 }
 0x4cd   : > { %v3505_v32 = vpop.f32.mrf.mxu1 }
 0x4ce   : > { %v3629_v40 = vadd.f32 %v3627_v61, %v3623_v2  ;;  %v3506_v48 = vadd.f32 %v5657_v35, %v3505_v32 }
 0x4d0   : > { %v3631_v51 = vpack.c.bf16 %v3629_v40, %v3629_v40  ;;  %v3622_v44 = vadd.f32 %v4466_v10, %v3506_v48 }
 0x4d2   : > { %4223 = vst.msk [vmem:[%s4948_s26 + $0x28] sm:$0xf] %vm3538_vm7, %v3631_v51  ;;  %v3626_v9 = vmin.f32 %v3622_v44, 0.0  ;;  %v3624_v11 = vmax.f32 %v3622_v44, 0.0 }
 0x4d4   : > { %v3628_v8 = vmul.f32 %v3626_v9, %v5039_v41 }
 0x4d5   : > { %v3507_v45 = vpop.f32.mrf.mxu1 }
 0x4d6   : > { %v3630_v55 = vadd.f32 %v3628_v8, %v3624_v11 }
 0x4d8   : > { %v3632_v20 = vpack.c.bf16 %v3630_v55, %v3630_v55 }
 0x4da   : > { %4224 = vst.msk [vmem:[%s4948_s26 + $0x2c] sm:$0xf] %vm3538_vm7, %v3632_v20 }
 0x4dd   : > { %v3509_v30 = vpop.f32.mrf.mxu1 }
 0x4de   : > { %v3510_v29 = vadd.f32 %v5657_v35, %v3509_v30 }
 0x4e0   : > { %v3640_v15 = vadd.f32 %v4469_v52, %v3510_v29 }
 0x4e2   : > { %v3644_v0 = vmin.f32 %v3640_v15, 0.0  ;;  %v3642_v38 = vmax.f32 %v3640_v15, 0.0 }
 0x4e4   : > { %v3646_v28 = vmul.f32 %v3644_v0, %v5039_v41 }
 0x4e5   : > { %v3511_v53 = vpop.f32.mrf.mxu1 }
 0x4e6   : > { %v3648_v19 = vadd.f32 %v3646_v28, %v3642_v38  ;;  %v3512_v5 = vadd.f32 %v5657_v35, %v3511_v53 }
 0x4e8   : > { %v3650_v50 = vpack.c.bf16 %v3648_v19, %v3648_v19  ;;  %v3641_v36 = vadd.f32 %v4470_v59, %v3512_v5 }
 0x4ea   : > { %4227 = vst.msk [vmem:[%s4948_s26 + $0x30] sm:$0xf] %vm3538_vm7, %v3650_v50  ;;  %v3645_v23 = vmin.f32 %v3641_v36, 0.0  ;;  %v3643_v24 = vmax.f32 %v3641_v36, 0.0 }
 0x4ec   : > { %v3647_v39 = vmul.f32 %v3645_v23, %v5039_v41 }
 0x4ed   : > { %v3514_v47 = vpop.f32.mrf.mxu1 }
 0x4ee   : > { %v3649_v46 = vadd.f32 %v3647_v39, %v3643_v24 }
 0x4f0   : > { %v3651_v31 = vpack.c.bf16 %v3649_v46, %v3649_v46 }
 0x4f2   : > { %4228 = vst.msk [vmem:[%s4948_s26 + $0x34] sm:$0xf] %vm3538_vm7, %v3651_v31 }
 0x4f5   : > { %v3515_v4 = vpop.f32.mrf.mxu1 }
 0x4f6   : > { %v3516_v58 = vadd.f32 %v5657_v35, %v3515_v4 }
 0x4f8   : > { %v3659_v56 = vadd.f32 %v4473_v17, %v3516_v58 }
 0x4fa   : > { %v3663_v49 = vmin.f32 %v3659_v56, 0.0  ;;  %v3661_v12 = vmax.f32 %v3659_v56, 0.0 }
 0x4fc   : > { %v3665_v3 = vmul.f32 %v3663_v49, %v5039_v41 }
 0x4fd   : > { %v3518_v13 = vpop.f32.mrf.mxu1 }
 0x4fe   : > { %v3667_v42 = vadd.f32 %v3665_v3, %v3661_v12  ;;  %v3519_v21 = vadd.f32 %v5657_v35, %v3518_v13 }
 0x500   : > { %v3669_v37 = vpack.c.bf16 %v3667_v42, %v3667_v42  ;;  %v3660_v25 = vadd.f32 %v4474_v34, %v3519_v21 }
 0x502   : > { %4231 = vst.msk [vmem:[%s4948_s26 + $0x38] sm:$0xf] %vm3538_vm7, %v3669_v37  ;;  %v3664_v43 = vmin.f32 %v3660_v25, 0.0  ;;  %v3662_v14 = vmax.f32 %v3660_v25, 0.0 }
 0x504   : > { %v3666_v26 = vmul.f32 %v3664_v43, %v5039_v41 }
 0x505   : > { %v3520_v16 = vpop.f32.mrf.mxu1 }
 0x506   : > { %v3668_v63 = vadd.f32 %v3666_v26, %v3662_v14 }
 0x508   : > { %v3670_v1 = vpack.c.bf16 %v3668_v63, %v3668_v63 }
 0x50a   : > { %4232 = vst.msk [vmem:[%s4948_s26 + $0x3c] sm:$0xf] %vm3538_vm7, %v3670_v1 }
 0x50b PF: > { %s19_s11 = sadd.s32 1, %s4844_s11   ;;  %s5780_s29 = smov %s4836_s9 }
 0x50c   : > { %p16_p9 = scmp.ge.s32.totalorder %s19_s11, 6   ;;  %s5781_s30 = smov %s4840_s10 }
 0x50d   : > { %s5782_s9 = smov %s5785_s7  ;;  %s5783_s10 = smov %s5789_s12 }
 0x50e   :  { %18 = sbr.rel (!%p16_p9) target bundleno = 3 (0x3), region = 107 }

</bundles_post_ra>
